<compile_context>
chip_gen: v6e
topology: v6e:2x2x1
jax: 0.10.0
libtpu: 0.0.40
codegen_flags: <defaults>
</compile_context>

<pallas_src>
import jax
import jax.numpy as jnp
import numpy as np
from jax.experimental import pallas as pl
from jax.experimental.pallas import tpu as pltpu

_PREC = jax.lax.Precision.HIGHEST   # exact fp32 MXU contraction


def _mm(a, b):
    return jnp.dot(a, b, preferred_element_type=jnp.float32, precision=_PREC)


def downblock_kernel(xp_ref, a1_ref, a2_ref, b1_ref, b2_ref,
                     se_ref, so_ref, re_ref, ro_ref,
                     conv_ref, pool_ref, h1p_ref):
    H = conv_ref.shape[1]           # output height (== input height, 'same' padding)
    Wc = conv_ref.shape[2]          # W * Cout (lane-packed width*channels)

    x = xp_ref[0]                   # (H+2, W*Cin): row-padded, lane-packed input

    # ---- conv1 ('same', bias) + ReLU: three vertical-tap matmuls on the MXU ----
    h1 = _mm(x[0:H, :], a1_ref[0])
    h1 = h1 + _mm(x[1:H + 1, :], a1_ref[1])
    h1 = h1 + _mm(x[2:H + 2, :], a1_ref[2])
    h1 = jnp.maximum(h1 + b1_ref[...], 0.0)                    # (H, W*Cout)

    # ---- re-pad rows (zero top/bottom) for the second 'same' conv ----
    zrow = jnp.zeros((1, Wc), jnp.float32)
    h1p_ref[0:1, :] = zrow
    h1p_ref[1:H + 1, :] = h1
    h1p_ref[H + 1:H + 2, :] = zrow

    # ---- conv2 ('same', bias), no activation (matches the PyTorch Sequential) ----
    h2 = _mm(h1p_ref[0:H, :], a2_ref[0])
    h2 = h2 + _mm(h1p_ref[1:H + 1, :], a2_ref[1])
    h2 = h2 + _mm(h1p_ref[2:H + 2, :], a2_ref[2])
    h2 = h2 + b2_ref[...]                                       # (H, W*Cout)

    conv_ref[0] = h2                                            # single lane-dense store

    # ---- 2x2 / stride-2 max pool computed from the in-register h2 ----
    # W direction: pick even / odd (w, c) lane blocks via 0/1 selection matmuls.
    wmax = jnp.maximum(_mm(h2, se_ref[...]), _mm(h2, so_ref[...]))        # (H, (W/2)*Cout)
    # H direction: pick even / odd rows via 0/1 selection matmuls.
    pool = jnp.maximum(_mm(re_ref[...], wmax), _mm(ro_ref[...], wmax))    # (H/2, (W/2)*Cout)
    pool_ref[0] = pool


def _build_tap_weights(w_hwio, W):
    """(3,3,Cin,Cout) conv weights -> (3, W*Cin, W*Cout) block matrices, one per row tap."""
    KH, KW, Cin, Cout = w_hwio.shape
    a = np.zeros((KH, W * Cin, W * Cout), np.float32)
    for ki in range(KH):
        for kj in range(KW):
            for wo in range(W):
                wi = wo + kj - 1                      # 'same' padding = 1
                if 0 <= wi < W:
                    a[ki, wi * Cin:(wi + 1) * Cin, wo * Cout:(wo + 1) * Cout] = w_hwio[ki, kj]
    return jnp.asarray(a)


def _build_pool_selectors(H, W, Cout):
    """0/1 selection matrices implementing even/odd picks for the 2x2 pool."""
    H2, W2 = H // 2, W // 2
    se = np.zeros((W * Cout, W2 * Cout), np.float32)
    so = np.zeros((W * Cout, W2 * Cout), np.float32)
    for w2 in range(W2):
        for c in range(Cout):
            se[(2 * w2) * Cout + c, w2 * Cout + c] = 1.0
            so[(2 * w2 + 1) * Cout + c, w2 * Cout + c] = 1.0
    re_ = np.zeros((H2, H), np.float32)
    ro = np.zeros((H2, H), np.float32)
    for h2 in range(H2):
        re_[h2, 2 * h2] = 1.0
        ro[h2, 2 * h2 + 1] = 1.0
    return jnp.asarray(se), jnp.asarray(so), jnp.asarray(re_), jnp.asarray(ro)


def pack_params(params, H, W):
    """One-time host-side packing of conv weights/biases into the kernel layout."""
    w1, b1, w2, b2 = params
    Cout = w1.shape[3]
    a1 = _build_tap_weights(np.asarray(w1), W)                  # (3, W*Cin,  W*Cout)
    a2 = _build_tap_weights(np.asarray(w2), W)                  # (3, W*Cout, W*Cout)
    b1p = jnp.tile(jnp.asarray(b1), W).reshape(1, W * Cout)
    b2p = jnp.tile(jnp.asarray(b2), W).reshape(1, W * Cout)
    se, so, re_, ro = _build_pool_selectors(H, W, Cout)
    return a1, a2, b1p, b2p, se, so, re_, ro


def downblock_forward(x_nchw, packed):
    """Returns (x_conv, x_down) in NCHW, matching the PyTorch module."""
    a1, a2, b1p, b2p, se, so, re_, ro = packed
    N, Cin, H, W = x_nchw.shape
    Cout = b1p.shape[-1] // W
    H2, W2 = H // 2, W // 2

    # NCHW -> lane-packed (N, H, W*Cin), zero-pad H by 1 on each side ('same' rows).
    x_pack = jnp.transpose(x_nchw, (0, 2, 3, 1)).astype(jnp.float32).reshape(N, H, W * Cin)
    x_pad = jnp.pad(x_pack, ((0, 0), (1, 1), (0, 0)))

    conv_p, pool_p = pl.pallas_call(
        downblock_kernel,
        grid=(N,),
        out_shape=(jax.ShapeDtypeStruct((N, H, W * Cout), jnp.float32),
                   jax.ShapeDtypeStruct((N, H2, W2 * Cout), jnp.float32)),
        in_specs=[
            pl.BlockSpec((1, H + 2, W * Cin), lambda n: (n, 0, 0)),
            pl.BlockSpec((3, W * Cin, W * Cout), lambda n: (0, 0, 0)),
            pl.BlockSpec((3, W * Cout, W * Cout), lambda n: (0, 0, 0)),
            pl.BlockSpec((1, W * Cout), lambda n: (0, 0)),
            pl.BlockSpec((1, W * Cout), lambda n: (0, 0)),
            pl.BlockSpec((W * Cout, W2 * Cout), lambda n: (0, 0)),
            pl.BlockSpec((W * Cout, W2 * Cout), lambda n: (0, 0)),
            pl.BlockSpec((H2, H), lambda n: (0, 0)),
            pl.BlockSpec((H2, H), lambda n: (0, 0)),
        ],
        out_specs=(pl.BlockSpec((1, H, W * Cout), lambda n: (n, 0, 0)),
                   pl.BlockSpec((1, H2, W2 * Cout), lambda n: (n, 0, 0))),
        scratch_shapes=[pltpu.VMEM((H + 2, W * Cout), jnp.float32)],
        compiler_params=pltpu.CompilerParams(dimension_semantics=("parallel",)),
    )(x_pad, a1, a2, b1p, b2p, se, so, re_, ro)

    x_conv = jnp.transpose(conv_p.reshape(N, H, W, Cout), (0, 3, 1, 2))
    x_down = jnp.transpose(pool_p.reshape(N, H2, W2, Cout), (0, 3, 1, 2))
    return x_conv, x_down


def init_params(key, in_channels, out_channels):
    """Deterministic synthetic init mirroring nn.Conv2d defaults (weights + biases)."""
    k1, k2, k3, k4 = jax.random.split(key, 4)
    bound1 = 1.0 / np.sqrt(in_channels * 9)
    bound2 = 1.0 / np.sqrt(out_channels * 9)
    w1 = jax.random.uniform(k1, (3, 3, in_channels, out_channels), jnp.float32, -bound1, bound1)
    b1 = jax.random.uniform(k2, (out_channels,), jnp.float32, -bound1, bound1)
    w2 = jax.random.uniform(k3, (3, 3, out_channels, out_channels), jnp.float32, -bound2, bound2)
    b2 = jax.random.uniform(k4, (out_channels,), jnp.float32, -bound2, bound2)
    return w1, b1, w2, b2


def reference(x_nchw, w1, b1, w2, b2):
    """Pure-JAX reference mirroring the PyTorch forward."""
    def conv(x, w, b):
        y = jax.lax.conv_general_dilated(
            x, w, (1, 1), 'SAME',
            dimension_numbers=('NCHW', 'HWIO', 'NCHW'),
            precision=jax.lax.Precision.HIGHEST)
        return y + b.reshape(1, -1, 1, 1)

    h = jnp.maximum(conv(x_nchw, w1, b1), 0.0)
    h = conv(h, w2, b2)
    pool = jax.lax.reduce_window(h, -jnp.inf, jax.lax.max,
                                 (1, 1, 2, 2), (1, 1, 2, 2), 'VALID')
    return h, pool


if __name__ == "__main__":
    key = jax.random.PRNGKey(0)
    kx, kp = jax.random.split(key)

    N, Cin, Cout, H, W = 2, 4, 8, 16, 16
    x = jax.random.normal(kx, (N, Cin, H, W), jnp.float32)
    params = init_params(kp, Cin, Cout)
    packed = pack_params(params, H, W)

    fwd = jax.jit(downblock_forward)
    conv_out, pool_out = fwd(x, packed)
    conv_out = jax.block_until_ready(conv_out)
    pool_out = jax.block_until_ready(pool_out)

    ref_conv, ref_pool = reference(x, *params)
    np.testing.assert_allclose(np.asarray(conv_out), np.asarray(ref_conv),
                               rtol=1e-3, atol=1e-3)
    np.testing.assert_allclose(np.asarray(pool_out), np.asarray(ref_pool),
                               rtol=1e-3, atol=1e-3)

    assert conv_out.shape == (N, Cout, H, W)
    assert pool_out.shape == (N, Cout, H // 2, W // 2)
    print("KERNEL_OK")
</pallas_src>

<mosaic_0001>
module attributes {stable_mosaic.version = 11 : i64} {
  func.func @downblock_kernel(%arg0: i32, %arg1: memref<1x18x64xf32, #tpu.memory_space<vmem>>, %arg2: memref<3x64x128xf32, #tpu.memory_space<vmem>>, %arg3: memref<3x128x128xf32, #tpu.memory_space<vmem>>, %arg4: memref<1x128xf32, #tpu.memory_space<vmem>>, %arg5: memref<1x128xf32, #tpu.memory_space<vmem>>, %arg6: memref<128x64xf32, #tpu.memory_space<vmem>>, %arg7: memref<128x64xf32, #tpu.memory_space<vmem>>, %arg8: memref<8x16xf32, #tpu.memory_space<vmem>>, %arg9: memref<8x16xf32, #tpu.memory_space<vmem>>, %arg10: memref<1x16x128xf32, #tpu.memory_space<vmem>>, %arg11: memref<1x8x64xf32, #tpu.memory_space<vmem>>, %arg12: memref<18x128xf32, #tpu.memory_space<vmem>>) attributes {dimension_semantics = [#tpu.dimension_semantics<parallel>], iteration_bounds = array<i64: 2>, scalar_prefetch = 0 : i64, scratch_operands = 1 : i64, tpu.core_type = #tpu.core_type<tc>, window_params = [{transform_indices = @transform_0, window_bounds = array<i64: 1, 18, 64>}, {pipeline_mode = #tpu.pipeline_mode<synchronous>, transform_indices = @transform_1, window_bounds = array<i64: 3, 64, 128>}, {pipeline_mode = #tpu.pipeline_mode<synchronous>, transform_indices = @transform_2, window_bounds = array<i64: 3, 128, 128>}, {pipeline_mode = #tpu.pipeline_mode<synchronous>, transform_indices = @transform_3, window_bounds = array<i64: 1, 128>}, {pipeline_mode = #tpu.pipeline_mode<synchronous>, transform_indices = @transform_4, window_bounds = array<i64: 1, 128>}, {pipeline_mode = #tpu.pipeline_mode<synchronous>, transform_indices = @transform_5, window_bounds = array<i64: 128, 64>}, {pipeline_mode = #tpu.pipeline_mode<synchronous>, transform_indices = @transform_6, window_bounds = array<i64: 128, 64>}, {pipeline_mode = #tpu.pipeline_mode<synchronous>, transform_indices = @transform_7, window_bounds = array<i64: 8, 16>}, {pipeline_mode = #tpu.pipeline_mode<synchronous>, transform_indices = @transform_8, window_bounds = array<i64: 8, 16>}, {transform_indices = @transform_9, window_bounds = array<i64: 1, 16, 128>}, {transform_indices = @transform_10, window_bounds = array<i64: 1, 8, 64>}]} {
    %c0 = arith.constant 0 : index
    %c0_0 = arith.constant 0 : index
    %c0_1 = arith.constant 0 : index
    %0 = vector.load %arg1[%c0, %c0_0, %c0_1] : memref<1x18x64xf32, #tpu.memory_space<vmem>>, vector<1x18x64xf32>
    %1 = vector.shape_cast %0 : vector<1x18x64xf32> to vector<18x64xf32>
    %2 = vector.extract_strided_slice %1 {offsets = [0, 0], sizes = [16, 64], strides = [1, 1]} : vector<18x64xf32> to vector<16x64xf32>
    %c0_2 = arith.constant 0 : index
    %c0_3 = arith.constant 0 : index
    %c0_4 = arith.constant 0 : index
    %3 = vector.load %arg2[%c0_2, %c0_3, %c0_4] : memref<3x64x128xf32, #tpu.memory_space<vmem>>, vector<1x64x128xf32>
    %4 = vector.shape_cast %3 : vector<1x64x128xf32> to vector<64x128xf32>
    %cst = arith.constant dense<0.000000e+00> : vector<16x128xf32>
    %5 = tpu.matmul %2, %4, %cst {dimension_numbers = #tpu.dot_dimension_numbers<[1], [0], [0], [1], [0, 0, 1, 1], [], []>, precision = #tpu.contract_precision<fp32>} : vector<16x64xf32>, vector<64x128xf32>, vector<16x128xf32> -> vector<16x128xf32>
    %6 = vector.extract_strided_slice %1 {offsets = [1, 0], sizes = [16, 64], strides = [1, 1]} : vector<18x64xf32> to vector<16x64xf32>
    %c1 = arith.constant 1 : index
    %c0_5 = arith.constant 0 : index
    %c0_6 = arith.constant 0 : index
    %7 = vector.load %arg2[%c1, %c0_5, %c0_6] : memref<3x64x128xf32, #tpu.memory_space<vmem>>, vector<1x64x128xf32>
    %8 = vector.shape_cast %7 : vector<1x64x128xf32> to vector<64x128xf32>
    %cst_7 = arith.constant dense<0.000000e+00> : vector<16x128xf32>
    %9 = tpu.matmul %6, %8, %cst_7 {dimension_numbers = #tpu.dot_dimension_numbers<[1], [0], [0], [1], [0, 0, 1, 1], [], []>, precision = #tpu.contract_precision<fp32>} : vector<16x64xf32>, vector<64x128xf32>, vector<16x128xf32> -> vector<16x128xf32>
    %10 = arith.addf %5, %9 : vector<16x128xf32>
    %11 = vector.extract_strided_slice %1 {offsets = [2, 0], sizes = [16, 64], strides = [1, 1]} : vector<18x64xf32> to vector<16x64xf32>
    %c2 = arith.constant 2 : index
    %c0_8 = arith.constant 0 : index
    %c0_9 = arith.constant 0 : index
    %12 = vector.load %arg2[%c2, %c0_8, %c0_9] : memref<3x64x128xf32, #tpu.memory_space<vmem>>, vector<1x64x128xf32>
    %13 = vector.shape_cast %12 : vector<1x64x128xf32> to vector<64x128xf32>
    %cst_10 = arith.constant dense<0.000000e+00> : vector<16x128xf32>
    %14 = tpu.matmul %11, %13, %cst_10 {dimension_numbers = #tpu.dot_dimension_numbers<[1], [0], [0], [1], [0, 0, 1, 1], [], []>, precision = #tpu.contract_precision<fp32>} : vector<16x64xf32>, vector<64x128xf32>, vector<16x128xf32> -> vector<16x128xf32>
    %15 = arith.addf %10, %14 : vector<16x128xf32>
    %c0_11 = arith.constant 0 : index
    %c0_12 = arith.constant 0 : index
    %16 = vector.load %arg4[%c0_11, %c0_12] : memref<1x128xf32, #tpu.memory_space<vmem>>, vector<1x128xf32>
    %17 = vector.broadcast %16 : vector<1x128xf32> to vector<16x128xf32>
    %18 = arith.addf %15, %17 : vector<16x128xf32>
    %cst_13 = arith.constant 0.000000e+00 : f32
    %19 = vector.broadcast %cst_13 : f32 to vector<16x128xf32>
    %20 = arith.maximumf %18, %19 : vector<16x128xf32>
    %cst_14 = arith.constant 0.000000e+00 : f32
    %21 = vector.broadcast %cst_14 : f32 to vector<1x128xf32>
    %c0_15 = arith.constant 0 : index
    %c0_16 = arith.constant 0 : index
    %22 = vector.load %arg12[%c0_15, %c0_16] : memref<18x128xf32, #tpu.memory_space<vmem>>, vector<1x128xf32>
    tpu.vector_store %arg12[%c0_15, %c0_16], %21 {strides = array<i32>} : memref<18x128xf32, #tpu.memory_space<vmem>>, vector<1x128xf32>,
    %c1_17 = arith.constant 1 : index
    %c0_18 = arith.constant 0 : index
    %23 = vector.load %arg12[%c1_17, %c0_18] : memref<18x128xf32, #tpu.memory_space<vmem>>, vector<16x128xf32>
    tpu.vector_store %arg12[%c1_17, %c0_18], %20 {strides = array<i32>} : memref<18x128xf32, #tpu.memory_space<vmem>>, vector<16x128xf32>,
    %c17 = arith.constant 17 : index
    %c0_19 = arith.constant 0 : index
    %24 = vector.load %arg12[%c17, %c0_19] : memref<18x128xf32, #tpu.memory_space<vmem>>, vector<1x128xf32>
    tpu.vector_store %arg12[%c17, %c0_19], %21 {strides = array<i32>} : memref<18x128xf32, #tpu.memory_space<vmem>>, vector<1x128xf32>,
    %c0_20 = arith.constant 0 : index
    %c0_21 = arith.constant 0 : index
    %25 = vector.load %arg12[%c0_20, %c0_21] : memref<18x128xf32, #tpu.memory_space<vmem>>, vector<16x128xf32>
    %c0_22 = arith.constant 0 : index
    %c0_23 = arith.constant 0 : index
    %c0_24 = arith.constant 0 : index
    %26 = vector.load %arg3[%c0_22, %c0_23, %c0_24] : memref<3x128x128xf32, #tpu.memory_space<vmem>>, vector<1x128x128xf32>
    %27 = vector.shape_cast %26 : vector<1x128x128xf32> to vector<128x128xf32>
    %cst_25 = arith.constant dense<0.000000e+00> : vector<16x128xf32>
    %28 = tpu.matmul %25, %27, %cst_25 {dimension_numbers = #tpu.dot_dimension_numbers<[1], [0], [0], [1], [0, 0, 1, 1], [], []>, precision = #tpu.contract_precision<fp32>} : vector<16x128xf32>, vector<128x128xf32>, vector<16x128xf32> -> vector<16x128xf32>
    %c1_26 = arith.constant 1 : index
    %c0_27 = arith.constant 0 : index
    %29 = vector.load %arg12[%c1_26, %c0_27] : memref<18x128xf32, #tpu.memory_space<vmem>>, vector<16x128xf32>
    %c1_28 = arith.constant 1 : index
    %c0_29 = arith.constant 0 : index
    %c0_30 = arith.constant 0 : index
    %30 = vector.load %arg3[%c1_28, %c0_29, %c0_30] : memref<3x128x128xf32, #tpu.memory_space<vmem>>, vector<1x128x128xf32>
    %31 = vector.shape_cast %30 : vector<1x128x128xf32> to vector<128x128xf32>
    %cst_31 = arith.constant dense<0.000000e+00> : vector<16x128xf32>
    %32 = tpu.matmul %29, %31, %cst_31 {dimension_numbers = #tpu.dot_dimension_numbers<[1], [0], [0], [1], [0, 0, 1, 1], [], []>, precision = #tpu.contract_precision<fp32>} : vector<16x128xf32>, vector<128x128xf32>, vector<16x128xf32> -> vector<16x128xf32>
    %33 = arith.addf %28, %32 : vector<16x128xf32>
    %c2_32 = arith.constant 2 : index
    %c0_33 = arith.constant 0 : index
    %34 = vector.load %arg12[%c2_32, %c0_33] : memref<18x128xf32, #tpu.memory_space<vmem>>, vector<16x128xf32>
    %c2_34 = arith.constant 2 : index
    %c0_35 = arith.constant 0 : index
    %c0_36 = arith.constant 0 : index
    %35 = vector.load %arg3[%c2_34, %c0_35, %c0_36] : memref<3x128x128xf32, #tpu.memory_space<vmem>>, vector<1x128x128xf32>
    %36 = vector.shape_cast %35 : vector<1x128x128xf32> to vector<128x128xf32>
    %cst_37 = arith.constant dense<0.000000e+00> : vector<16x128xf32>
    %37 = tpu.matmul %34, %36, %cst_37 {dimension_numbers = #tpu.dot_dimension_numbers<[1], [0], [0], [1], [0, 0, 1, 1], [], []>, precision = #tpu.contract_precision<fp32>} : vector<16x128xf32>, vector<128x128xf32>, vector<16x128xf32> -> vector<16x128xf32>
    %38 = arith.addf %33, %37 : vector<16x128xf32>
    %c0_38 = arith.constant 0 : index
    %c0_39 = arith.constant 0 : index
    %39 = vector.load %arg5[%c0_38, %c0_39] : memref<1x128xf32, #tpu.memory_space<vmem>>, vector<1x128xf32>
    %40 = vector.broadcast %39 : vector<1x128xf32> to vector<16x128xf32>
    %41 = arith.addf %38, %40 : vector<16x128xf32>
    %c0_40 = arith.constant 0 : index
    %c0_41 = arith.constant 0 : index
    %c0_42 = arith.constant 0 : index
    %42 = vector.load %arg10[%c0_40, %c0_41, %c0_42] : memref<1x16x128xf32, #tpu.memory_space<vmem>>, vector<1x16x128xf32>
    %43 = vector.shape_cast %42 : vector<1x16x128xf32> to vector<16x128xf32>
    %44 = vector.shape_cast %41 : vector<16x128xf32> to vector<1x16x128xf32>
    tpu.vector_store %arg10[%c0_40, %c0_41, %c0_42], %44 {strides = array<i32>} : memref<1x16x128xf32, #tpu.memory_space<vmem>>, vector<1x16x128xf32>,
    %c0_43 = arith.constant 0 : index
    %c0_44 = arith.constant 0 : index
    %45 = vector.load %arg6[%c0_43, %c0_44] : memref<128x64xf32, #tpu.memory_space<vmem>>, vector<128x64xf32>
    %cst_45 = arith.constant dense<0.000000e+00> : vector<16x64xf32>
    %46 = tpu.matmul %41, %45, %cst_45 {dimension_numbers = #tpu.dot_dimension_numbers<[1], [0], [0], [1], [0, 0, 1, 1], [], []>, precision = #tpu.contract_precision<fp32>} : vector<16x128xf32>, vector<128x64xf32>, vector<16x64xf32> -> vector<16x64xf32>
    %c0_46 = arith.constant 0 : index
    %c0_47 = arith.constant 0 : index
    %47 = vector.load %arg7[%c0_46, %c0_47] : memref<128x64xf32, #tpu.memory_space<vmem>>, vector<128x64xf32>
    %cst_48 = arith.constant dense<0.000000e+00> : vector<16x64xf32>
    %48 = tpu.matmul %41, %47, %cst_48 {dimension_numbers = #tpu.dot_dimension_numbers<[1], [0], [0], [1], [0, 0, 1, 1], [], []>, precision = #tpu.contract_precision<fp32>} : vector<16x128xf32>, vector<128x64xf32>, vector<16x64xf32> -> vector<16x64xf32>
    %49 = arith.maximumf %46, %48 : vector<16x64xf32>
    %c0_49 = arith.constant 0 : index
    %c0_50 = arith.constant 0 : index
    %50 = vector.load %arg8[%c0_49, %c0_50] : memref<8x16xf32, #tpu.memory_space<vmem>>, vector<8x16xf32>
    %cst_51 = arith.constant dense<0.000000e+00> : vector<8x64xf32>
    %51 = tpu.matmul %50, %49, %cst_51 {dimension_numbers = #tpu.dot_dimension_numbers<[1], [0], [0], [1], [0, 0, 1, 1], [], []>, precision = #tpu.contract_precision<fp32>} : vector<8x16xf32>, vector<16x64xf32>, vector<8x64xf32> -> vector<8x64xf32>
    %c0_52 = arith.constant 0 : index
    %c0_53 = arith.constant 0 : index
    %52 = vector.load %arg9[%c0_52, %c0_53] : memref<8x16xf32, #tpu.memory_space<vmem>>, vector<8x16xf32>
    %cst_54 = arith.constant dense<0.000000e+00> : vector<8x64xf32>
    %53 = tpu.matmul %52, %49, %cst_54 {dimension_numbers = #tpu.dot_dimension_numbers<[1], [0], [0], [1], [0, 0, 1, 1], [], []>, precision = #tpu.contract_precision<fp32>} : vector<8x16xf32>, vector<16x64xf32>, vector<8x64xf32> -> vector<8x64xf32>
    %54 = arith.maximumf %51, %53 : vector<8x64xf32>
    %c0_55 = arith.constant 0 : index
    %c0_56 = arith.constant 0 : index
    %c0_57 = arith.constant 0 : index
    %55 = vector.load %arg11[%c0_55, %c0_56, %c0_57] : memref<1x8x64xf32, #tpu.memory_space<vmem>>, vector<1x8x64xf32>
    %56 = vector.shape_cast %55 : vector<1x8x64xf32> to vector<8x64xf32>
    %57 = vector.shape_cast %54 : vector<8x64xf32> to vector<1x8x64xf32>
    tpu.vector_store %arg11[%c0_55, %c0_56, %c0_57], %57 {strides = array<i32>} : memref<1x8x64xf32, #tpu.memory_space<vmem>>, vector<1x8x64xf32>,
    return
  }
  func.func @transform_0(%arg0: i32) -> (i32, i32, i32) {
    %c0_i32 = arith.constant 0 : i32
    %c0_i32_0 = arith.constant 0 : i32
    %c0_i32_1 = arith.constant 0 : i32
    return %arg0, %c0_i32, %c0_i32_0 : i32, i32, i32
  }
  func.func @transform_1(%arg0: i32) -> (i32, i32, i32) {
    %c0_i32 = arith.constant 0 : i32
    %c0_i32_0 = arith.constant 0 : i32
    %c0_i32_1 = arith.constant 0 : i32
    %c0_i32_2 = arith.constant 0 : i32
    return %c0_i32, %c0_i32_0, %c0_i32_1 : i32, i32, i32
  }
  func.func @transform_2(%arg0: i32) -> (i32, i32, i32) {
    %c0_i32 = arith.constant 0 : i32
    %c0_i32_0 = arith.constant 0 : i32
    %c0_i32_1 = arith.constant 0 : i32
    %c0_i32_2 = arith.constant 0 : i32
    return %c0_i32, %c0_i32_0, %c0_i32_1 : i32, i32, i32
  }
  func.func @transform_3(%arg0: i32) -> (i32, i32) {
    %c0_i32 = arith.constant 0 : i32
    %c0_i32_0 = arith.constant 0 : i32
    %c0_i32_1 = arith.constant 0 : i32
    return %c0_i32, %c0_i32_0 : i32, i32
  }
  func.func @transform_4(%arg0: i32) -> (i32, i32) {
    %c0_i32 = arith.constant 0 : i32
    %c0_i32_0 = arith.constant 0 : i32
    %c0_i32_1 = arith.constant 0 : i32
    return %c0_i32, %c0_i32_0 : i32, i32
  }
  func.func @transform_5(%arg0: i32) -> (i32, i32) {
    %c0_i32 = arith.constant 0 : i32
    %c0_i32_0 = arith.constant 0 : i32
    %c0_i32_1 = arith.constant 0 : i32
    return %c0_i32, %c0_i32_0 : i32, i32
  }
  func.func @transform_6(%arg0: i32) -> (i32, i32) {
    %c0_i32 = arith.constant 0 : i32
    %c0_i32_0 = arith.constant 0 : i32
    %c0_i32_1 = arith.constant 0 : i32
    return %c0_i32, %c0_i32_0 : i32, i32
  }
  func.func @transform_7(%arg0: i32) -> (i32, i32) {
    %c0_i32 = arith.constant 0 : i32
    %c0_i32_0 = arith.constant 0 : i32
    %c0_i32_1 = arith.constant 0 : i32
    return %c0_i32, %c0_i32_0 : i32, i32
  }
  func.func @transform_8(%arg0: i32) -> (i32, i32) {
    %c0_i32 = arith.constant 0 : i32
    %c0_i32_0 = arith.constant 0 : i32
    %c0_i32_1 = arith.constant 0 : i32
    return %c0_i32, %c0_i32_0 : i32, i32
  }
  func.func @transform_9(%arg0: i32) -> (i32, i32, i32) {
    %c0_i32 = arith.constant 0 : i32
    %c0_i32_0 = arith.constant 0 : i32
    %c0_i32_1 = arith.constant 0 : i32
    return %arg0, %c0_i32, %c0_i32_0 : i32, i32, i32
  }
  func.func @transform_10(%arg0: i32) -> (i32, i32, i32) {
    %c0_i32 = arith.constant 0 : i32
    %c0_i32_0 = arith.constant 0 : i32
    %c0_i32_1 = arith.constant 0 : i32
    return %arg0, %c0_i32, %c0_i32_0 : i32, i32, i32
  }
}

</mosaic_0001>

<bundles_post_ra>
// kernel: downblock_forward.1
= control target key start
LH: loop header
LB: loop body
LE: loop exit
PB: predicated region body
PF: predicated region fallthrough
CT: control target
= control target key end

     0   :  { %s9093_s13 = smov 0   ;;  %s11862_s0 = inlined_call_operand.vmem [shape: f32[2,18,64], index: 0, kind: input, shape index: {}]   ;;  %s11863_s1 = inlined_call_operand.vmem [shape: f32[3,64,128], index: 1, kind: input, shape index: {}]   ;;  %s11864_s2 = inlined_call_operand.vmem [shape: f32[3,128,128], index: 2, kind: input, shape index: {}]   ;;  %s11865_s3 = inlined_call_operand.vmem [shape: f32[1,128], index: 3, kind: input, shape index: {}]   ;;  %s11866_s4 = inlined_call_operand.vmem [shape: f32[1,128], index: 4, kind: input, shape index: {}]   ;;  %s11867_s5 = inlined_call_operand.vmem [shape: f32[128,64], index: 5, kind: input, shape index: {}]   ;;  %s11868_s6 = inlined_call_operand.vmem [shape: f32[128,64], index: 6, kind: input, shape index: {}]   ;;  %s11869_s7 = inlined_call_operand.vmem [shape: f32[8,16], index: 7, kind: input, shape index: {}]   ;;  %s11870_s8 = inlined_call_operand.vmem [shape: f32[8,16], index: 8, kind: input, shape index: {}]   ;;  %s11871_s9 = inlined_call_operand.vmem [shape: f32[2,16,128], index: 9, kind: output, shape index: {0}]   ;;  %s11872_s10 = inlined_call_operand.vmem [shape: f32[2,8,64], index: 10, kind: output, shape index: {1}]  }
   0x1 LB: > { %s6723_s14 = sadd.s32 4294967295, %s9034_s13   ;;  %p6727_p0 = scmp.ge.s32.totalorder %s9034_s13, 1  ;;  %s9034_s13 = sphi %s9093_s13, %s21_s13  }
   0x2   : > { %p315_p1 = scmp.lt.s32.totalorder %s9034_s13, 3 }
   0x4   : > { %p316_p2 = pnand %p6727_p0, %p315_p1 }
   0x6   : > { %319 = sbr.rel (%p316_p2) target bundleno = 1484 (0x5cc), region = 56 }
   0xb   : > { %v6739_v0 = vld [vmem:[%s11863_s1 + $0x78] sm:$0xff]  ;;  %v6738_v1 = vld [vmem:[%s11863_s1 + $0x70] sm:$0xff]  ;;  %v6737_v2 = vld [vmem:[%s11863_s1 + $0x68] sm:$0xff]  ;;  %p357_p3 = scmp.lt.s32.totalorder %s6723_s14, 1  ;;  %vm394_vm0 = vcmask 1046528   ;;  %vm400_vm1 = vcmask 523264  }
   0xc   : > { %v9110_v3 = vand.u32 4294901760, %v6739_v0  ;;  %v9112_v4 = vand.u32 4294901760, %v6738_v1  ;;  %v9114_v5 = vand.u32 4294901760, %v6737_v2  ;;  %v6736_v6 = vld [vmem:[%s11863_s1 + $0x60] sm:$0xff]  ;;  %v6735_v7 = vld [vmem:[%s11863_s1 + $0x58] sm:$0xff]  ;;  %v6734_v8 = vld [vmem:[%s11863_s1 + $0x50] sm:$0xff] }
   0xd   : > { %v9125_v9 = vand.u32 4294901760, %v6736_v6  ;;  %v9127_v10 = vand.u32 4294901760, %v6735_v7  ;;  %v9129_v11 = vand.u32 4294901760, %v6734_v8  ;;  %v6733_v12 = vld [vmem:[%s11863_s1 + $0x48] sm:$0xff]  ;;  %v6732_v13 = vld [vmem:[%s11863_s1 + $0x40] sm:$0xff]  ;;  %s12061_s14 = smov (!%p357_p3, %s6723_s14), 1 }
   0xe   : > { %7541 = vmatprep.subr.mxu0 %v9110_v3  ;;  %v9141_v14 = vsub.f32 %v6739_v0, %v9110_v3  ;;  %v9144_v15 = vsub.f32 %v6738_v1, %v9112_v4  ;;  %v9147_v16 = vsub.f32 %v6737_v2, %v9114_v5  ;;  %v9149_v17 = vand.u32 4294901760, %v6733_v12  ;;  %s9017_s11 = smul.u32 24, %s12061_s14  ;;  %s6784_s17 = sshll.u32 %s12061_s14, 4 }
   0xf   : > { %7542 = vmatpush3.msra.mxu0 %v9110_v3  ;;  %v9153_v18 = vsub.f32 %v6736_v6, %v9125_v9  ;;  %v9156_v19 = vsub.f32 %v6735_v7, %v9127_v10  ;;  %v9158_v20 = vand.u32 4294901760, %v6732_v13  ;;  %v9161_v21 = vsub.f32 %v6734_v8, %v9129_v11  ;;  %s366_s22 = scalar_lea.vmem %s11871_s9, %s6784_s17  ;;  %s6731_s23 = sshll.u32 %s12061_s14, 3 }
  0x10   : > { %7543 = vmatprep.subr.mxu0 %v9112_v4  ;;  %v9166_v22 = vand.u32 4294901760, %v9141_v14  ;;  %v9169_v23 = vand.u32 4294901760, %v9144_v15  ;;  %v9172_v24 = vand.u32 4294901760, %v9147_v16  ;;  %s361_s16 = scalar_lea.vmem %s11862_s0, %s9017_s11  ;;  %v9182_v26 = vsub.f32 %v6733_v12, %v9149_v17  ;;  %s370_s26 = scalar_lea.vmem %s11872_s10, %s6731_s23 }
  0x11   : > { %7544 = vmatpush3.msra.mxu0 %v9112_v4  ;;  %v9176_v25 = vand.u32 4294901760, %v9153_v18  ;;  %v9192_v30 = vand.u32 4294901760, %v9156_v19  ;;  %v9194_v31 = vld [vmem:[%s361_s16] sm:$0xff]  ;;  %v9196_v32 = vld [vmem:[%s361_s16 + $0x8] sm:$0xff]  ;;  %v9198_v33 = vld [vmem:[%s361_s16 + $0x10] sm:$0x3]  ;;  %v9206_v36 = vsub.f32 %v6732_v13, %v9158_v20 }
  0x12   : > { %7545 = vmatprep.subr.mxu0 %v9114_v5  ;;  %v518_v27 = vsub.f32 %v9141_v14, %v9166_v22  ;;  %v525_v28 = vsub.f32 %v9144_v15, %v9169_v23  ;;  %v532_v29 = vsub.f32 %v9147_v16, %v9172_v24  ;;  %v9202_v34 = vand.u32 4294901760, %v9161_v21 }
  0x13   : > { %7546 = vmatpush3.msra.mxu0 %v9114_v5  ;;  %v395_v35 = vrot.slane %v9194_v31, 1  ;;  %v539_v39 = vsub.f32 %v9153_v18, %v9176_v25  ;;  %v396_v40 = vrot.slane %v9196_v32, 1  ;;  %v398_v41 = vrot.slane %v9198_v33, 1 }
  0x14   : > { %v519_v37 = vand.u32 4294901760, %v518_v27  ;;  %7547 = vmatprep.subr.mxu0 %v9125_v9  ;;  %v526_v38 = vand.u32 4294901760, %v525_v28  ;;  %v533_v42 = vand.u32 4294901760, %v532_v29  ;;  %v546_v43 = vsub.f32 %v9156_v19, %v9192_v30 }
  0x15   : > { %7548 = vmatpush3.msra.mxu0 %v9125_v9  ;;  %v397_v44 = vsel %vm394_vm0, %v395_v35, %v396_v40  ;;  %v9219_v45 = vand.u32 4294901760, %v9182_v26  ;;  %v553_v46 = vsub.f32 %v9161_v21, %v9202_v34  ;;  %v399_v48 = vsel %vm394_vm0, %v396_v40, %v398_v41 }
  0x16   : > { %7560 = vmatprep.subr.mxu1 %v519_v37  ;;  %7549 = vmatprep.subr.mxu0 %v9127_v10  ;;  %v401_v47 = vsel %vm400_vm1, %v397_v44, 0  ;;  %v540_v49 = vand.u32 4294901760, %v539_v39  ;;  %v403_v51 = vsel %vm400_vm1, %v399_v48, 0  ;;  %v9231_v52 = vand.u32 4294901760, %v9206_v36 }
  0x17   : > { %7561 = vmatpush3.msra.mxu1 %v519_v37  ;;  %7550 = vmatpush3.msra.mxu0 %v9127_v10  ;;  %v9227_v50 = vand.u32 4294901760, %v401_v47  ;;  %v9234_v53 = vand.u32 4294901760, %v403_v51  ;;  %v547_v54 = vand.u32 4294901760, %v546_v43  ;;  %v560_v56 = vsub.f32 %v9182_v26, %v9219_v45 }
  0x18   : > { %7562 = vmatprep.subr.mxu1 %v526_v38  ;;  %7551 = vmatprep.subr.mxu0 %v9129_v11  ;;  %v554_v58 = vand.u32 4294901760, %v553_v46  ;;  %v567_v60 = vsub.f32 %v9206_v36, %v9231_v52  ;;  %v1582_v7 = vrot.slane %v9198_v33, 2  ;;  %vm1578_vm2 = vcmask 1045504   ;;  %v375_v33 = vld [vmem:[%s11863_s1 + $0x8] sm:$0xff] }
  0x19   : > { %7563 = vmatpush3.msra.mxu1 %v526_v38  ;;  %7552 = vmatpush3.msra.mxu0 %v9129_v11  ;;  %v9238_v55 = vsub.f32 %v401_v47, %v9227_v50  ;;  %v9244_v57 = vsub.f32 %v403_v51, %v9234_v53  ;;  %v561_v63 = vand.u32 4294901760, %v560_v56  ;;  %v1579_v8 = vrot.slane %v9194_v31, 2 }
  0x1a   : > { %7564 = vmatprep.subr.mxu1 %v533_v42  ;;  %7553 = vmatprep.subr.mxu0 %v9149_v17  ;;  %v568_v2 = vand.u32 4294901760, %v567_v60  ;;  %v1580_v12 = vrot.slane %v9196_v32, 2  ;;  %v985_v27 = vsel %vm400_vm1, %v9194_v31, 0  ;;  %v9400_v39 = vand.u32 4294901760, %v375_v33 }
  0x1b   : > { %7565 = vmatpush3.msra.mxu1 %v533_v42  ;;  %7554 = vmatpush3.msra.mxu0 %v9149_v17  ;;  %v480_v59 = vand.u32 4294901760, %v9238_v55  ;;  %v490_v61 = vand.u32 4294901760, %v9244_v57  ;;  %vm9037_vm3 = vmmov 0   ;;  %vm5709_vm4 = vcmask 130048  }
  0x1c   : > { %7566 = vmatprep.subr.mxu1 %v540_v49  ;;  %7555 = vmatprep.subr.mxu0 %v9158_v20  ;;  %v9287_v13 = vsel %vm1578_vm2, %v1579_v8, %v1580_v12  ;;  %v9435_v48 = vsub.f32 %v375_v33, %v9400_v39  ;;  %v6747_v8 = vld [vmem:[%s11863_s1 + $0xb8] sm:$0xff] }
  0x1d   : > { %7567 = vmatpush3.msra.mxu1 %v540_v49  ;;  %7556 = vmatpush3.msra.mxu0 %v9158_v20  ;;  %v481_v62 = vsub.f32 %v9238_v55, %v480_v59  ;;  %v491_v0 = vsub.f32 %v9244_v57, %v490_v61 }
  0x1e   : > { %7568 = vmatprep.subr.mxu1 %v547_v54  ;;  %7579 = vmatprep.subr.mxu0 %v9141_v14  ;;  %v9457_v56 = vand.u32 4294901760, %v9435_v48 }
  0x1f   : > { %7569 = vmatpush3.msra.mxu1 %v547_v54  ;;  %7576 = vmatprep.mubr.f32.mxu1 %v9227_v50  ;;  %v482_v1 = vand.u32 4294901760, %v481_v62  ;;  %v492_v6 = vand.u32 4294901760, %v491_v0 }
  0x20   : > { %7570 = vmatprep.subr.mxu1 %v554_v58  ;;  %v1144_v62 = vsub.f32 %v9435_v48, %v9457_v56 }
  0x21   : > { %7571 = vmatpush3.msra.mxu1 %v554_v58  ;;  %7557 = vmatprep.mubr.f32.mxu0 %v482_v1 }
  0x22   : > { %7572 = vmatprep.subr.mxu1 %v561_v63  ;;  %7558 = vmatmul.mubr.f32.vlgmr.msra.gmra.mxu0 %v492_v6  ;;  %v1145_v6 = vand.u32 4294901760, %v1144_v62 }
  0x23   : > { %7573 = vmatpush3.msra.mxu1 %v561_v63  ;;  %7580 = vmatpush3.msra.mxu0 %v9141_v14  ;;  %v9289_v14 = vsel %vm1578_vm2, %v1580_v12, %v1582_v7  ;;  %v6746_v12 = vld [vmem:[%s11863_s1 + $0xb0] sm:$0xff] }
  0x24   : > { %7574 = vmatprep.subr.mxu1 %v568_v2  ;;  %7581 = vmatprep.subr.mxu0 %v9144_v15 }
  0x25   : > { %7575 = vmatpush3.msra.mxu1 %v568_v2  ;;  %7582 = vmatpush3.msra.mxu0 %v9144_v15  ;;  %v381_v15 = vld [vmem:[%s11863_s1 + $0x38] sm:$0xff] }
  0x26   : > { %7577 = vmatmul.mubr.f32.vlgmr.msra.gmra.mxu1 %v9234_v53  ;;  %7583 = vmatprep.subr.mxu0 %v9147_v16 }
  0x27   : > { %7598 = vmatprep.subr.mxu1 %v9110_v3  ;;  %7584 = vmatpush3.msra.mxu0 %v9147_v16  ;;  %v380_v16 = vld [vmem:[%s11863_s1 + $0x30] sm:$0xff] }
  0x28   : > { %7599 = vmatpush3.msra.mxu1 %v9110_v3  ;;  %7585 = vmatprep.subr.mxu0 %v9153_v18 }
  0x29   : > { %7600 = vmatprep.subr.mxu1 %v9112_v4  ;;  %7586 = vmatpush3.msra.mxu0 %v9153_v18  ;;  %v9314_v18 = vand.u32 4294901760, %v381_v15 }
  0x2a   : > { %7601 = vmatpush3.msra.mxu1 %v9112_v4  ;;  %7587 = vmatprep.subr.mxu0 %v9156_v19 }
  0x2b   : > { %7602 = vmatprep.subr.mxu1 %v9114_v5  ;;  %7588 = vmatpush3.msra.mxu0 %v9156_v19  ;;  %v9319_v19 = vand.u32 4294901760, %v380_v16 }
  0x2c   : > { %7603 = vmatpush3.msra.mxu1 %v9114_v5  ;;  %7589 = vmatprep.subr.mxu0 %v9161_v21 }
  0x2d   : > { %7604 = vmatprep.subr.mxu1 %v9125_v9  ;;  %7590 = vmatpush3.msra.mxu0 %v9161_v21  ;;  %v379_v21 = vld [vmem:[%s11863_s1 + $0x28] sm:$0xff] }
  0x2e   : > { %7605 = vmatpush3.msra.mxu1 %v9125_v9  ;;  %7591 = vmatprep.subr.mxu0 %v9182_v26 }
  0x2f   : > { %7606 = vmatprep.subr.mxu1 %v9127_v10  ;;  %7592 = vmatpush3.msra.mxu0 %v9182_v26 }
  0x30   : > { %7607 = vmatpush3.msra.mxu1 %v9127_v10  ;;  %7593 = vmatprep.subr.mxu0 %v9206_v36 }
  0x31   : > { %7595 = vmatprep.mubr.f32.mxu0 %v9238_v55  ;;  %7594 = vmatpush3.msra.mxu0 %v9206_v36 }
  0x32   : > { %7608 = vmatprep.subr.mxu1 %v9129_v11  ;;  %7596 = vmatmul.mubr.f32.vlgmr.msra.gmra.mxu0 %v9244_v57 }
  0x33   : > { %7609 = vmatpush3.msra.mxu1 %v9129_v11  ;;  %7617 = vmatprep.subr.mxu0 %v9166_v22 }
  0x34   : > { %7610 = vmatprep.subr.mxu1 %v9149_v17  ;;  %7618 = vmatpush3.msra.mxu0 %v9166_v22  ;;  %v378_v22 = vld [vmem:[%s11863_s1 + $0x20] sm:$0xff] }
  0x35   : > { %7611 = vmatpush3.msra.mxu1 %v9149_v17  ;;  %7619 = vmatprep.subr.mxu0 %v9169_v23  ;;  %v9348_v26 = vand.u32 4294901760, %v378_v22 }
  0x36   : > { %7612 = vmatprep.subr.mxu1 %v9158_v20  ;;  %7620 = vmatpush3.msra.mxu0 %v9169_v23  ;;  %v9333_v23 = vand.u32 4294901760, %v379_v21 }
  0x37   : > { %7613 = vmatpush3.msra.mxu1 %v9158_v20  ;;  %7614 = vmatprep.mubr.f32.mxu1 %v480_v59  ;;  %v9382_v35 = vsub.f32 %v378_v22, %v9348_v26 }
  0x38   : > { %7621 = vmatprep.subr.mxu0 %v9172_v24  ;;  %7615 = vmatmul.mubr.f32.vlgmr.msra.gmra.mxu1 %v490_v61 }
  0x39   : > { %7622 = vmatpush3.msra.mxu0 %v9172_v24  ;;  %7636 = vmatprep.subr.mxu1 %v9110_v3  ;;  %v9336_v24 = vsub.f32 %v381_v15, %v9314_v18  ;;  %v9412_v41 = vand.u32 4294901760, %v9382_v35  ;;  %v9529_v15 = vand.u32 4294901760, %v6747_v8 }
  0x3a   : > { %7623 = vmatprep.subr.mxu0 %v9176_v25  ;;  %7637 = vmatpush3.msra.mxu1 %v9110_v3  ;;  %v9341_v3 = vsub.f32 %v380_v16, %v9319_v19  ;;  %v9537_v16 = vand.u32 4294901760, %v6746_v12 }
  0x3b   : > { %7624 = vmatpush3.msra.mxu0 %v9176_v25  ;;  %7638 = vmatprep.subr.mxu1 %v9112_v4  ;;  %v377_v25 = vld [vmem:[%s11863_s1 + $0x18] sm:$0xff]  ;;  %v9360_v28 = vand.u32 4294901760, %v9336_v24  ;;  %v1123_v49 = vsub.f32 %v9382_v35, %v9412_v41  ;;  %v9547_v22 = vsub.f32 %v6747_v8, %v9529_v15 }
  0x3c   : > { %7625 = vmatprep.subr.mxu0 %v9192_v30  ;;  %7639 = vmatpush3.msra.mxu1 %v9112_v4  ;;  %v376_v4 = vld [vmem:[%s11863_s1 + $0x10] sm:$0xff]  ;;  %v9362_v29 = vand.u32 4294901760, %v377_v25  ;;  %v9372_v31 = vand.u32 4294901760, %v9341_v3 }
  0x3d   : > { %7626 = vmatpush3.msra.mxu0 %v9192_v30  ;;  %7640 = vmatprep.subr.mxu1 %v9114_v5  ;;  %v987_v30 = vsel %vm400_vm1, %v9196_v32, 0  ;;  %v9384_v32 = vand.u32 4294901760, %v985_v27  ;;  %v1102_v37 = vsub.f32 %v9336_v24, %v9360_v28 }
  0x3e   : > { %7627 = vmatprep.subr.mxu0 %v9202_v34  ;;  %7641 = vmatpush3.msra.mxu1 %v9114_v5  ;;  %v9365_v5 = vsub.f32 %v379_v21, %v9333_v23  ;;  %v9391_v36 = vand.u32 4294901760, %v987_v30  ;;  %v1109_v40 = vsub.f32 %v9341_v3, %v9372_v31  ;;  %v6745_v21 = vld [vmem:[%s11863_s1 + $0xa8] sm:$0xff] }
  0x3f   : > { %7628 = vmatpush3.msra.mxu0 %v9202_v34  ;;  %7642 = vmatprep.subr.mxu1 %v9125_v9  ;;  %v9379_v34 = vand.u32 4294901760, %v376_v4  ;;  %v9417_v43 = vsub.f32 %v985_v27, %v9384_v32  ;;  %v6742_v27 = vld [vmem:[%s11863_s1 + $0x90] sm:$0xff] }
  0x40   : > { %7629 = vmatprep.subr.mxu0 %v9219_v45  ;;  %7643 = vmatpush3.msra.mxu1 %v9125_v9  ;;  %v374_v9 = vld [vmem:[%s11863_s1] sm:$0xff]  ;;  %v9398_v38 = vand.u32 4294901760, %v9365_v5  ;;  %v9597_v33 = vand.u32 4294901760, %v6742_v27 }
  0x41   : > { %7630 = vmatpush3.msra.mxu0 %v9219_v45  ;;  %7644 = vmatprep.subr.mxu1 %v9127_v10  ;;  %v9414_v42 = vand.u32 4294901760, %v374_v9  ;;  %v9420_v44 = vsub.f32 %v376_v4, %v9379_v34  ;;  %v1103_v45 = vand.u32 4294901760, %v1102_v37  ;;  %v1064_v51 = vand.u32 4294901760, %v9417_v43 }
  0x42   : > { %7631 = vmatprep.subr.mxu0 %v9231_v52  ;;  %7645 = vmatpush3.msra.mxu1 %v9127_v10  ;;  %v9403_v10 = vsub.f32 %v377_v25, %v9362_v29  ;;  %v1116_v46 = vsub.f32 %v9365_v5, %v9398_v38  ;;  %v6743_v25 = vld [vmem:[%s11863_s1 + $0x98] sm:$0xff] }
  0x43   : > { %7632 = vmatpush3.msra.mxu0 %v9231_v52  ;;  %7633 = vmatprep.mubr.f32.mxu0 %v9227_v50  ;;  %v9445_v52 = vand.u32 4294901760, %v9420_v44  ;;  %v9448_v54 = vsub.f32 %v374_v9, %v9414_v42  ;;  %v1065_v57 = vsub.f32 %v9417_v43, %v1064_v51 }
  0x44   : > { %7646 = vmatprep.subr.mxu1 %v9129_v11  ;;  %7634 = vmatmul.mubr.f32.vlgmr.msra.gmra.mxu0 %v9234_v53  ;;  %v9432_v47 = vand.u32 4294901760, %v9403_v10 }
  0x45   : > { %7647 = vmatpush3.msra.mxu1 %v9129_v11  ;;  %7655 = vmatprep.subr.mxu0 %v9314_v18  ;;  %v9425_v11 = vsub.f32 %v987_v30, %v9391_v36  ;;  %v1137_v58 = vsub.f32 %v9420_v44, %v9445_v52  ;;  %v9467_v59 = vand.u32 4294901760, %v9448_v54  ;;  %v1066_v63 = vand.u32 4294901760, %v1065_v57 }
  0x46   : > { %7648 = vmatprep.subr.mxu1 %v9149_v17  ;;  %7656 = vmatpush3.msra.mxu0 %v9314_v18  ;;  %v1130_v55 = vsub.f32 %v9403_v10, %v9432_v47 }
  0x47   : > { %7649 = vmatpush3.msra.mxu1 %v9149_v17  ;;  %7657 = vmatprep.subr.mxu0 %v9319_v19  ;;  %v1110_v17 = vand.u32 4294901760, %v1109_v40  ;;  %v1138_v0 = vand.u32 4294901760, %v1137_v58  ;;  %v1151_v1 = vsub.f32 %v9448_v54, %v9467_v59 }
  0x48   : > { %7650 = vmatprep.subr.mxu1 %v9158_v20  ;;  %7658 = vmatpush3.msra.mxu0 %v9319_v19  ;;  %v1131_v61 = vand.u32 4294901760, %v1130_v55 }
  0x49   : > { %7651 = vmatpush3.msra.mxu1 %v9158_v20  ;;  %7652 = vmatprep.mubr.f32.mxu1 %v9227_v50  ;;  %v1074_v20 = vand.u32 4294901760, %v9425_v11  ;;  %v1117_v50 = vand.u32 4294901760, %v1116_v46  ;;  %v1152_v7 = vand.u32 4294901760, %v1151_v1  ;;  %v6764_v1 = vld [vmem:[%s11864_s2 + $0xf8] sm:$0xff] }
  0x4a   : > { %7659 = vmatprep.subr.mxu0 %v9333_v23  ;;  %7653 = vmatmul.mubr.f32.vlgmr.msra.gmra.mxu1 %v9234_v53  ;;  %v1124_v53 = vand.u32 4294901760, %v1123_v49 }
  0x4b   : > { %7660 = vmatpush3.msra.mxu0 %v9333_v23  ;;  %7674 = vmatprep.subr.mxu1 %v1103_v45  ;;  %v1075_v60 = vsub.f32 %v9425_v11, %v1074_v20 }
  0x4c   : > { %7661 = vmatprep.subr.mxu0 %v9348_v26  ;;  %7675 = vmatpush3.msra.mxu1 %v1103_v45 }
  0x4d   : > { %7662 = vmatpush3.msra.mxu0 %v9348_v26  ;;  %7676 = vmatprep.subr.mxu1 %v1110_v17  ;;  %v1076_v2 = vand.u32 4294901760, %v1075_v60 }
  0x4e   : > { %7663 = vmatprep.subr.mxu0 %v9362_v29  ;;  %7677 = vmatpush3.msra.mxu1 %v1110_v17 }
  0x4f   : > { %7664 = vmatpush3.msra.mxu0 %v9362_v29  ;;  %7678 = vmatprep.subr.mxu1 %v1117_v50 }
  0x50   : > { %7665 = vmatprep.subr.mxu0 %v9379_v34  ;;  %7679 = vmatpush3.msra.mxu1 %v1117_v50 }
  0x51   : > { %7666 = vmatpush3.msra.mxu0 %v9379_v34  ;;  %7680 = vmatprep.subr.mxu1 %v1124_v53 }
  0x52   : > { %7667 = vmatprep.subr.mxu0 %v9400_v39  ;;  %7681 = vmatpush3.msra.mxu1 %v1124_v53 }
  0x53   : > { %7668 = vmatpush3.msra.mxu0 %v9400_v39  ;;  %7682 = vmatprep.subr.mxu1 %v1131_v61 }
  0x54   : > { %7669 = vmatprep.subr.mxu0 %v9414_v42  ;;  %7683 = vmatpush3.msra.mxu1 %v1131_v61 }
  0x55   : > { %7670 = vmatpush3.msra.mxu0 %v9414_v42  ;;  %7671 = vmatprep.mubr.f32.mxu0 %v1066_v63 }
  0x56   : > { %7684 = vmatprep.subr.mxu1 %v1138_v0  ;;  %7672 = vmatmul.mubr.f32.vlgmr.msra.gmra.mxu0 %v1076_v2  ;;  %v9780_v2 = vand.u32 4294901760, %v6764_v1 }
  0x57   : > { %7685 = vmatpush3.msra.mxu1 %v1138_v0  ;;  %7693 = vmatprep.subr.mxu0 %v9336_v24 }
  0x58   : > { %7686 = vmatprep.subr.mxu1 %v1145_v6  ;;  %7694 = vmatpush3.msra.mxu0 %v9336_v24  ;;  %v6744_v24 = vld [vmem:[%s11863_s1 + $0xa0] sm:$0xff] }
  0x59   : > { %7687 = vmatpush3.msra.mxu1 %v1145_v6  ;;  %7695 = vmatprep.subr.mxu0 %v9341_v3  ;;  %v9566_v4 = vand.u32 4294901760, %v6744_v24  ;;  %v6763_v6 = vld [vmem:[%s11864_s2 + $0xf0] sm:$0xff] }
  0x5a   : > { %7688 = vmatprep.subr.mxu1 %v1152_v7  ;;  %7696 = vmatpush3.msra.mxu0 %v9341_v3  ;;  %v9554_v3 = vand.u32 4294901760, %v6745_v21  ;;  %v9788_v8 = vand.u32 4294901760, %v6763_v6 }
  0x5b   : > { %7689 = vmatpush3.msra.mxu1 %v1152_v7  ;;  %7690 = vmatprep.mubr.f32.mxu1 %v9384_v32  ;;  %v9786_v7 = vsub.f32 %v6764_v1, %v9780_v2 }
  0x5c   : > { %7697 = vmatprep.subr.mxu0 %v9365_v5  ;;  %7691 = vmatmul.mubr.f32.vlgmr.msra.gmra.mxu1 %v9391_v36 }
  0x5d   : > { %7698 = vmatpush3.msra.mxu0 %v9365_v5  ;;  %7712 = vmatprep.subr.mxu1 %v9314_v18  ;;  %v9580_v5 = vand.u32 4294901760, %v6743_v25 }
  0x5e   : > { %7699 = vmatprep.subr.mxu0 %v9382_v35  ;;  %7713 = vmatpush3.msra.mxu1 %v9314_v18 }
  0x5f   : > { %7700 = vmatpush3.msra.mxu0 %v9382_v35  ;;  %7714 = vmatprep.subr.mxu1 %v9319_v19 }
  0x60   : > { %7701 = vmatprep.subr.mxu0 %v9403_v10  ;;  %7715 = vmatpush3.msra.mxu1 %v9319_v19 }
  0x61   : > { %7702 = vmatpush3.msra.mxu0 %v9403_v10  ;;  %7716 = vmatprep.subr.mxu1 %v9333_v23 }
  0x62   : > { %7703 = vmatprep.subr.mxu0 %v9420_v44  ;;  %7717 = vmatpush3.msra.mxu1 %v9333_v23 }
  0x63   : > { %7704 = vmatpush3.msra.mxu0 %v9420_v44  ;;  %7718 = vmatprep.subr.mxu1 %v9348_v26  ;;  %v9635_v44 = vsub.f32 %v6742_v27, %v9597_v33 }
  0x64   : > { %7705 = vmatprep.subr.mxu0 %v9435_v48  ;;  %7719 = vmatpush3.msra.mxu1 %v9348_v26 }
  0x65   : > { %7706 = vmatpush3.msra.mxu0 %v9435_v48  ;;  %7720 = vmatprep.subr.mxu1 %v9362_v29  ;;  %v9662_v49 = vand.u32 4294901760, %v9635_v44 }
  0x66   : > { %7707 = vmatprep.subr.mxu0 %v9448_v54  ;;  %7721 = vmatpush3.msra.mxu1 %v9362_v29 }
  0x67   : > { %7708 = vmatpush3.msra.mxu0 %v9448_v54  ;;  %7709 = vmatprep.mubr.f32.mxu0 %v9417_v43  ;;  %v1736_v50 = vsub.f32 %v9635_v44, %v9662_v49 }
  0x68   : > { %7722 = vmatprep.subr.mxu1 %v9379_v34  ;;  %7710 = vmatmul.mubr.f32.vlgmr.msra.gmra.mxu0 %v9425_v11 }
  0x69   : > { %7723 = vmatpush3.msra.mxu1 %v9379_v34  ;;  %7731 = vmatprep.subr.mxu0 %v9360_v28 }
  0x6a   : > { %7724 = vmatprep.subr.mxu1 %v9400_v39  ;;  %7732 = vmatpush3.msra.mxu0 %v9360_v28  ;;  %v1584_v28 = vsel %vm400_vm1, %v9287_v13, 0  ;;  %v6741_v13 = vld [vmem:[%s11863_s1 + $0x88] sm:$0xff] }
  0x6b   : > { %7725 = vmatpush3.msra.mxu1 %v9400_v39  ;;  %7733 = vmatprep.subr.mxu0 %v9372_v31  ;;  %v9602_v35 = vand.u32 4294901760, %v1584_v28 }
  0x6c   : > { %7726 = vmatprep.subr.mxu1 %v9414_v42  ;;  %7734 = vmatpush3.msra.mxu0 %v9372_v31  ;;  %v1586_v31 = vsel %vm400_vm1, %v9289_v14, 0  ;;  %v6740_v14 = vld [vmem:[%s11863_s1 + $0x80] sm:$0xff] }
  0x6d   : > { %7727 = vmatpush3.msra.mxu1 %v9414_v42  ;;  %7728 = vmatprep.mubr.f32.mxu1 %v1064_v51  ;;  %v9621_v10 = vand.u32 4294901760, %v1586_v31  ;;  %v9632_v43 = vand.u32 4294901760, %v6740_v14  ;;  %v9638_v11 = vsub.f32 %v1584_v28, %v9602_v35 }
  0x6e   : > { %7735 = vmatprep.subr.mxu0 %v9398_v38  ;;  %7729 = vmatmul.mubr.f32.vlgmr.msra.gmra.mxu1 %v1074_v20 }
  0x6f   : > { %7736 = vmatpush3.msra.mxu0 %v9398_v38  ;;  %7750 = vmatprep.subr.mxu1 %v9314_v18  ;;  %v9616_v38 = vand.u32 4294901760, %v6741_v13  ;;  %v1663_v51 = vand.u32 4294901760, %v9638_v11 }
  0x70   : > { %7737 = vmatprep.subr.mxu0 %v9412_v41  ;;  %7751 = vmatpush3.msra.mxu1 %v9314_v18  ;;  %v9559_v18 = vsub.f32 %v6746_v12, %v9537_v16  ;;  %v6762_v12 = vld [vmem:[%s11864_s2 + $0xe8] sm:$0xff] }
  0x71   : > { %7738 = vmatpush3.msra.mxu0 %v9412_v41  ;;  %7752 = vmatprep.subr.mxu1 %v9319_v19  ;;  %v9653_v48 = vsub.f32 %v6741_v13, %v9616_v38  ;;  %v1664_v55 = vsub.f32 %v9638_v11, %v1663_v51 }
  0x72   : > { %7739 = vmatprep.subr.mxu0 %v9432_v47  ;;  %7753 = vmatpush3.msra.mxu1 %v9319_v19  ;;  %v9571_v19 = vand.u32 4294901760, %v9547_v22  ;;  %v9588_v30 = vand.u32 4294901760, %v9559_v18 }
  0x73   : > { %7740 = vmatpush3.msra.mxu0 %v9432_v47  ;;  %7754 = vmatprep.subr.mxu1 %v9333_v23  ;;  %v9650_v47 = vsub.f32 %v1586_v31, %v9621_v10  ;;  %v9675_v20 = vand.u32 4294901760, %v9653_v48  ;;  %v1665_v60 = vand.u32 4294901760, %v1664_v55 }
  0x74   : > { %7741 = vmatprep.subr.mxu0 %v9445_v52  ;;  %7755 = vmatpush3.msra.mxu1 %v9333_v23  ;;  %v9583_v23 = vsub.f32 %v6745_v21, %v9554_v3  ;;  %v1701_v9 = vsub.f32 %v9547_v22, %v9571_v19  ;;  %v1708_v40 = vsub.f32 %v9559_v18, %v9588_v30  ;;  %v9801_v21 = vand.u32 4294901760, %v6762_v12 }
  0x75   : > { %7742 = vmatpush3.msra.mxu0 %v9445_v52  ;;  %7756 = vmatprep.subr.mxu1 %v9348_v26  ;;  %v9666_v52 = vsub.f32 %v6740_v14, %v9632_v43  ;;  %v1673_v54 = vand.u32 4294901760, %v9650_v47  ;;  %v1743_v58 = vsub.f32 %v9653_v48, %v9675_v20 }
  0x76   : > { %7743 = vmatprep.subr.mxu0 %v9457_v56  ;;  %7757 = vmatpush3.msra.mxu1 %v9348_v26  ;;  %v9600_v26 = vsub.f32 %v6744_v24, %v9566_v4  ;;  %v9614_v37 = vand.u32 4294901760, %v9583_v23 }
  0x77   : > { %7744 = vmatpush3.msra.mxu0 %v9457_v56  ;;  %7758 = vmatprep.subr.mxu1 %v9362_v29  ;;  %v9685_v56 = vand.u32 4294901760, %v9666_v52  ;;  %v1674_v57 = vsub.f32 %v9650_v47, %v1673_v54  ;;  %v1744_v63 = vand.u32 4294901760, %v1743_v58 }
  0x78   : > { %7745 = vmatprep.subr.mxu0 %v9467_v59  ;;  %7759 = vmatpush3.msra.mxu1 %v9362_v29  ;;  %v9619_v29 = vsub.f32 %v6743_v25, %v9580_v5  ;;  %v9630_v41 = vand.u32 4294901760, %v9600_v26  ;;  %v1715_v45 = vsub.f32 %v9583_v23, %v9614_v37 }
  0x79   : > { %7746 = vmatpush3.msra.mxu0 %v9467_v59  ;;  %7747 = vmatprep.mubr.f32.mxu0 %v9384_v32  ;;  %v1737_v59 = vand.u32 4294901760, %v1736_v50  ;;  %v1750_v61 = vsub.f32 %v9666_v52, %v9685_v56  ;;  %v1675_v62 = vand.u32 4294901760, %v1674_v57  ;;  %v6753_v57 = vld [vmem:[%s11864_s2 + $0xa0] sm:$0xff] }
  0x7a   : > { %7760 = vmatprep.subr.mxu1 %v9379_v34  ;;  %7748 = vmatmul.mubr.f32.vlgmr.msra.gmra.mxu0 %v9391_v36  ;;  %v9647_v46 = vand.u32 4294901760, %v9619_v29  ;;  %v1722_v17 = vsub.f32 %v9600_v26, %v9630_v41 }
  0x7b   : > { %7761 = vmatpush3.msra.mxu1 %v9379_v34  ;;  %7769 = vmatprep.subr.mxu0 %v9529_v15  ;;  %v1702_v34 = vand.u32 4294901760, %v1701_v9  ;;  %v1751_v0 = vand.u32 4294901760, %v1750_v61  ;;  %v6758_v9 = vld [vmem:[%s11864_s2 + $0xc8] sm:$0xff]  ;;  %v9935_v61 = vand.u32 4294901760, %v6753_v57 }
  0x7c   : > { %7762 = vmatprep.subr.mxu1 %v9400_v39  ;;  %7770 = vmatpush3.msra.mxu0 %v9529_v15 }
  0x7d   : > { %7763 = vmatpush3.msra.mxu1 %v9400_v39  ;;  %7771 = vmatprep.subr.mxu0 %v9537_v16  ;;  %v1709_v39 = vand.u32 4294901760, %v1708_v40  ;;  %v6757_v40 = vld [vmem:[%s11864_s2 + $0xc0] sm:$0xff] }
  0x7e   : > { %7764 = vmatprep.subr.mxu1 %v9414_v42  ;;  %7772 = vmatpush3.msra.mxu0 %v9537_v16 }
  0x7f   : > { %7765 = vmatpush3.msra.mxu1 %v9414_v42  ;;  %7766 = vmatprep.mubr.f32.mxu1 %v9384_v32  ;;  %v1716_v32 = vand.u32 4294901760, %v1715_v45  ;;  %v1729_v42 = vsub.f32 %v9619_v29, %v9647_v46  ;;  %v6756_v45 = vld [vmem:[%s11864_s2 + $0xb8] sm:$0xff] }
  0x80   : > { %7773 = vmatprep.subr.mxu0 %v9554_v3  ;;  %7767 = vmatmul.mubr.f32.vlgmr.msra.gmra.mxu1 %v9391_v36  ;;  %v1723_v36 = vand.u32 4294901760, %v1722_v17 }
  0x81   : > { %7774 = vmatpush3.msra.mxu0 %v9554_v3  ;;  %7788 = vmatprep.subr.mxu1 %v1702_v34  ;;  %v1730_v53 = vand.u32 4294901760, %v1729_v42 }
  0x82   : > { %7775 = vmatprep.subr.mxu0 %v9566_v4  ;;  %7789 = vmatpush3.msra.mxu1 %v1702_v34  ;;  %v9876_v34 = vand.u32 4294901760, %v6757_v40 }
  0x83   : > { %7776 = vmatpush3.msra.mxu0 %v9566_v4  ;;  %7790 = vmatprep.subr.mxu1 %v1709_v39 }
  0x84   : > { %7777 = vmatprep.subr.mxu0 %v9580_v5  ;;  %7791 = vmatpush3.msra.mxu1 %v1709_v39  ;;  %v9891_v17 = vsub.f32 %v6757_v40, %v9876_v34 }
  0x85   : > { %7778 = vmatpush3.msra.mxu0 %v9580_v5  ;;  %7792 = vmatprep.subr.mxu1 %v1716_v32 }
  0x86   : > { %7779 = vmatprep.subr.mxu0 %v9597_v33  ;;  %7793 = vmatpush3.msra.mxu1 %v1716_v32 }
  0x87   : > { %7780 = vmatpush3.msra.mxu0 %v9597_v33  ;;  %7794 = vmatprep.subr.mxu1 %v1723_v36 }
  0x88   : > { %7781 = vmatprep.subr.mxu0 %v9616_v38  ;;  %7795 = vmatpush3.msra.mxu1 %v1723_v36 }
  0x89   : > { %7782 = vmatpush3.msra.mxu0 %v9616_v38  ;;  %7796 = vmatprep.subr.mxu1 %v1730_v53 }
  0x8a   : > { %7783 = vmatprep.subr.mxu0 %v9632_v43  ;;  %7797 = vmatpush3.msra.mxu1 %v1730_v53 }
  0x8b   : > { %7784 = vmatpush3.msra.mxu0 %v9632_v43  ;;  %7798 = vmatprep.subr.mxu1 %v1737_v59 }
  0x8c   : > { %7785 = vmatprep.mubr.f32.mxu0 %v1665_v60  ;;  %7799 = vmatpush3.msra.mxu1 %v1737_v59 }
  0x8d   : > { %7807 = vmatprep.subr.mxu0 %v9547_v22  ;;  %7786 = vmatmul.mubr.f32.vlgmr.msra.gmra.mxu0 %v1675_v62 }
  0x8e   : > { %7800 = vmatprep.subr.mxu1 %v1744_v63  ;;  %7808 = vmatpush3.msra.mxu0 %v9547_v22  ;;  %v6761_v22 = vld [vmem:[%s11864_s2 + $0xe0] sm:$0xff] }
  0x8f   : > { %7801 = vmatpush3.msra.mxu1 %v1744_v63  ;;  %7809 = vmatprep.subr.mxu0 %v9559_v18  ;;  %v9816_v25 = vand.u32 4294901760, %v6761_v22  ;;  %v6752_v63 = vld [vmem:[%s11864_s2 + $0x98] sm:$0xff] }
  0x90   : > { %7802 = vmatprep.subr.mxu1 %v1751_v0  ;;  %7810 = vmatpush3.msra.mxu0 %v9559_v18  ;;  %v9814_v18 = vsub.f32 %v6762_v12, %v9801_v21  ;;  %v9948_v12 = vsub.f32 %v6753_v57, %v9935_v61 }
  0x91   : > { %7803 = vmatpush3.msra.mxu1 %v1751_v0  ;;  %7804 = vmatprep.mubr.f32.mxu1 %v9602_v35 }
  0x92   : > { %7811 = vmatprep.subr.mxu0 %v9583_v23  ;;  %7805 = vmatmul.mubr.f32.vlgmr.msra.gmra.mxu1 %v9621_v10  ;;  %v9826_v28 = vand.u32 4294901760, %v9814_v18  ;;  %11980 = vst [vmem:[#allocation16_spill] sm:$0xff] %v9948_v12 }
  0x93   : > { %7812 = vmatpush3.msra.mxu0 %v9583_v23  ;;  %7826 = vmatprep.subr.mxu1 %v9529_v15 }
  0x94   : > { %7813 = vmatprep.subr.mxu0 %v9600_v26  ;;  %7827 = vmatpush3.msra.mxu1 %v9529_v15  ;;  %11969 = vst [vmem:[#allocation5_spill] sm:$0xff] %v9826_v28  ;;  %v2341_v31 = vsub.f32 %v9814_v18, %v9826_v28 }
  0x95   : > { %7814 = vmatpush3.msra.mxu0 %v9600_v26  ;;  %7828 = vmatprep.subr.mxu1 %v9537_v16 }
  0x96   : > { %7815 = vmatprep.subr.mxu0 %v9619_v29  ;;  %7829 = vmatpush3.msra.mxu1 %v9537_v16  ;;  %v2342_v14 = vand.u32 4294901760, %v2341_v31  ;;  %v6750_v31 = vld [vmem:[%s11864_s2 + $0x88] sm:$0xff] }
  0x97   : > { %7816 = vmatpush3.msra.mxu0 %v9619_v29  ;;  %7830 = vmatprep.subr.mxu1 %v9554_v3  ;;  %v9857_v29 = vand.u32 4294901760, %v6758_v9  ;;  %v9977_v40 = vand.u32 4294901760, %v6750_v31 }
  0x98   : > { %7817 = vmatprep.subr.mxu0 %v9635_v44  ;;  %7831 = vmatpush3.msra.mxu1 %v9554_v3 }
  0x99   : > { %7818 = vmatpush3.msra.mxu0 %v9635_v44  ;;  %7832 = vmatprep.subr.mxu1 %v9566_v4  ;;  %v9871_v44 = vsub.f32 %v6758_v9, %v9857_v29  ;;  %11985 = vst [vmem:[#allocation21_spill] sm:$0xff] %v9977_v40 }
  0x9a   : > { %7819 = vmatprep.subr.mxu0 %v9653_v48  ;;  %7833 = vmatpush3.msra.mxu1 %v9566_v4 }
  0x9b   : > { %7820 = vmatpush3.msra.mxu0 %v9653_v48  ;;  %7834 = vmatprep.subr.mxu1 %v9580_v5  ;;  %v9887_v48 = vand.u32 4294901760, %v6756_v45 }
  0x9c   : > { %7821 = vmatprep.subr.mxu0 %v9666_v52  ;;  %7835 = vmatpush3.msra.mxu1 %v9580_v5 }
  0x9d   : > { %7822 = vmatpush3.msra.mxu0 %v9666_v52  ;;  %7823 = vmatprep.mubr.f32.mxu0 %v9638_v11  ;;  %v9900_v32 = vsub.f32 %v6756_v45, %v9887_v48 }
  0x9e   : > { %7836 = vmatprep.subr.mxu1 %v9597_v33  ;;  %7824 = vmatmul.mubr.f32.vlgmr.msra.gmra.mxu0 %v9650_v47  ;;  %v9885_v47 = vand.u32 4294901760, %v9871_v44 }
  0x9f   : > { %7837 = vmatpush3.msra.mxu1 %v9597_v33  ;;  %7845 = vmatprep.subr.mxu0 %v9571_v19  ;;  %v9913_v50 = vand.u32 4294901760, %v9900_v32 }
  0xa0   : > { %7838 = vmatprep.subr.mxu1 %v9616_v38  ;;  %7846 = vmatpush3.msra.mxu0 %v9571_v19  ;;  %11973 = vst [vmem:[#allocation9_spill] sm:$0xff] %v9885_v47  ;;  %v2369_v52 = vsub.f32 %v9871_v44, %v9885_v47 }
  0xa1   : > { %7839 = vmatpush3.msra.mxu1 %v9616_v38  ;;  %7847 = vmatprep.subr.mxu0 %v9588_v30  ;;  %11975 = vst [vmem:[#allocation11_spill] sm:$0xff] %v9913_v50  ;;  %v2383_v58 = vsub.f32 %v9900_v32, %v9913_v50 }
  0xa2   : > { %7840 = vmatprep.subr.mxu1 %v9632_v43  ;;  %7848 = vmatpush3.msra.mxu0 %v9588_v30  ;;  %v6759_v30 = vld [vmem:[%s11864_s2 + $0xd0] sm:$0xff]  ;;  %v2370_v36 = vand.u32 4294901760, %v2369_v52 }
  0xa3   : > { %7841 = vmatpush3.msra.mxu1 %v9632_v43  ;;  %7842 = vmatprep.mubr.f32.mxu1 %v1663_v51  ;;  %v9843_v26 = vand.u32 4294901760, %v6759_v30  ;;  %v2384_v0 = vand.u32 4294901760, %v2383_v58 }
  0xa4   : > { %7849 = vmatprep.subr.mxu0 %v9614_v37  ;;  %7843 = vmatmul.mubr.f32.vlgmr.msra.gmra.mxu1 %v1673_v54  ;;  %v9906_v54 = vand.u32 4294901760, %v9891_v17 }
  0xa5   : > { %7850 = vmatpush3.msra.mxu0 %v9614_v37  ;;  %7864 = vmatprep.subr.mxu1 %v9529_v15 }
  0xa6   : > { %7851 = vmatprep.subr.mxu0 %v9630_v41  ;;  %7865 = vmatpush3.msra.mxu1 %v9529_v15  ;;  %v9796_v15 = vand.u32 4294901760, %v9786_v7  ;;  %11974 = vst [vmem:[#allocation10_spill] sm:$0xff] %v9906_v54  ;;  %v2376_v53 = vsub.f32 %v9891_v17, %v9906_v54 }
  0xa7   : > { %7852 = vmatpush3.msra.mxu0 %v9630_v41  ;;  %7866 = vmatprep.subr.mxu1 %v9537_v16 }
  0xa8   : > { %7853 = vmatprep.subr.mxu0 %v9647_v46  ;;  %7867 = vmatpush3.msra.mxu1 %v9537_v16  ;;  %11967 = vst [vmem:[#allocation3_spill] sm:$0xff] %v9796_v15  ;;  %v9799_v16 = vsub.f32 %v6763_v6, %v9788_v8  ;;  %v2327_v24 = vsub.f32 %v9786_v7, %v9796_v15  ;;  %v2377_v62 = vand.u32 4294901760, %v2376_v53 }
  0xa9   : > { %7854 = vmatpush3.msra.mxu0 %v9647_v46  ;;  %7868 = vmatprep.subr.mxu1 %v9554_v3 }
  0xaa   : > { %7855 = vmatprep.subr.mxu0 %v9662_v49  ;;  %7869 = vmatpush3.msra.mxu1 %v9554_v3  ;;  %v9811_v3 = vand.u32 4294901760, %v9799_v16  ;;  %v2328_v19 = vand.u32 4294901760, %v2327_v24  ;;  %v6751_v24 = vld [vmem:[%s11864_s2 + $0x90] sm:$0xff] }
  0xab   : > { %7856 = vmatpush3.msra.mxu0 %v9662_v49  ;;  %7870 = vmatprep.subr.mxu1 %v9566_v4  ;;  %v6755_v49 = vld [vmem:[%s11864_s2 + $0xb0] sm:$0xff] }
  0xac   : > { %7857 = vmatprep.subr.mxu0 %v9675_v20  ;;  %7871 = vmatpush3.msra.mxu1 %v9566_v4  ;;  %11968 = vst [vmem:[#allocation4_spill] sm:$0xff] %v9811_v3  ;;  %v6760_v4 = vld [vmem:[%s11864_s2 + $0xd8] sm:$0xff]  ;;  %v2334_v27 = vsub.f32 %v9799_v16, %v9811_v3  ;;  %v9902_v42 = vand.u32 4294901760, %v6755_v49 }
  0xad   : > { %7858 = vmatpush3.msra.mxu0 %v9675_v20  ;;  %7872 = vmatprep.subr.mxu1 %v9580_v5  ;;  %v9832_v23 = vand.u32 4294901760, %v6760_v4  ;;  %v6754_v20 = vld [vmem:[%s11864_s2 + $0xa8] sm:$0xff] }
  0xae   : > { %7859 = vmatprep.subr.mxu0 %v9685_v56  ;;  %7873 = vmatpush3.msra.mxu1 %v9580_v5  ;;  %v9829_v5 = vsub.f32 %v6761_v22, %v9816_v25  ;;  %v2335_v13 = vand.u32 4294901760, %v2334_v27  ;;  %v9916_v55 = vsub.f32 %v6755_v49, %v9902_v42  ;;  %v9951_v22 = vand.u32 4294901760, %v6752_v63 }
  0xaf   : > { %7860 = vmatpush3.msra.mxu0 %v9685_v56  ;;  %7861 = vmatprep.mubr.f32.mxu0 %v9602_v35  ;;  %v9918_v56 = vand.u32 4294901760, %v6754_v20  ;;  %v9960_v27 = vand.u32 4294901760, %v9948_v12 }
  0xb0   : > { %7874 = vmatprep.subr.mxu1 %v9597_v33  ;;  %7862 = vmatmul.mubr.f32.vlgmr.msra.gmra.mxu0 %v9621_v10  ;;  %11976 = vst [vmem:[#allocation12_spill] sm:$0xff] %v9916_v55  ;;  %v9930_v59 = vand.u32 4294901760, %v9916_v55 }
  0xb1   : > { %7875 = vmatpush3.msra.mxu1 %v9597_v33  ;;  %7880 = vmatprep.mubr.f32.mxu1 %v9602_v35  ;;  %v9841_v33 = vand.u32 4294901760, %v9829_v5  ;;  %v9846_v35 = vsub.f32 %v6760_v4, %v9832_v23  ;;  %v9933_v60 = vsub.f32 %v6754_v20, %v9918_v56  ;;  %11981 = vst [vmem:[#allocation17_spill] sm:$0xff] %v9960_v27 }
  0xb2   : > { %7876 = vmatprep.subr.mxu1 %v9616_v38  ;;  %7883 = vmatprep.subr.mxu0 %v9780_v2  ;;  %11977 = vst [vmem:[#allocation13_spill] sm:$0xff] %v9930_v59  ;;  %v2390_v1 = vsub.f32 %v9916_v55, %v9930_v59 }
  0xb3   : > { %7877 = vmatpush3.msra.mxu1 %v9616_v38  ;;  %7884 = vmatpush3.msra.mxu0 %v9780_v2  ;;  %11970 = vst [vmem:[#allocation6_spill] sm:$0xff] %v9841_v33  ;;  %v2348_v37 = vsub.f32 %v9829_v5, %v9841_v33  ;;  %v9855_v38 = vsub.f32 %v6759_v30, %v9843_v26  ;;  %11978 = vst [vmem:[#allocation14_spill] sm:$0xff] %v9933_v60  ;;  %v9945_v6 = vand.u32 4294901760, %v9933_v60 }
  0xb4   : > { %7878 = vmatprep.subr.mxu1 %v9632_v43  ;;  %7885 = vmatprep.subr.mxu0 %v9788_v8  ;;  %v2391_v4 = vand.u32 4294901760, %v2390_v1  ;;  %v9962_v30 = vand.u32 4294901760, %v6751_v24 }
  0xb5   : > { %7879 = vmatpush3.msra.mxu1 %v9632_v43  ;;  %7886 = vmatpush3.msra.mxu0 %v9788_v8  ;;  %v2349_v41 = vand.u32 4294901760, %v2348_v37  ;;  %v9868_v43 = vand.u32 4294901760, %v9855_v38  ;;  %11979 = vst [vmem:[#allocation15_spill] sm:$0xff] %v9945_v6 }
  0xb6   : > { %7881 = vmatmul.mubr.f32.vlgmr.msra.gmra.mxu1 %v9621_v10  ;;  %7887 = vmatprep.subr.mxu0 %v9801_v21  ;;  %v9861_v10 = vand.u32 4294901760, %v9846_v35  ;;  %11982 = vst [vmem:[#allocation18_spill] sm:$0xff] %v9962_v30  ;;  %v9975_v37 = vsub.f32 %v6751_v24, %v9962_v30  ;;  %v11877_v24 = vmov 0.0  }
  0xb7   : > { %7888 = vmatpush3.msra.mxu0 %v9801_v21  ;;  %7918 = vmatprep.subr.mxu1 %v2328_v19  ;;  %11972 = vst [vmem:[#allocation8_spill] sm:$0xff] %v9868_v43  ;;  %v2362_v46 = vsub.f32 %v9855_v38, %v9868_v43  ;;  %2181 = vst [vmem:[#allocation2] sm:$0x1] %v11877_v24 }
  0xb8   : > { %7889 = vmatprep.subr.mxu0 %v9816_v25  ;;  %7919 = vmatpush3.msra.mxu1 %v2328_v19  ;;  %11971 = vst [vmem:[#allocation7_spill] sm:$0xff] %v9861_v10  ;;  %v2355_v11 = vsub.f32 %v9846_v35, %v9861_v10  ;;  %v2397_v19 = vsub.f32 %v9933_v60, %v9945_v6  ;;  %11984 = vst [vmem:[#allocation20_spill] sm:$0xff] %v9975_v37 }
  0xb9   : > { %7890 = vmatpush3.msra.mxu0 %v9816_v25  ;;  %7920 = vmatprep.subr.mxu1 %v2335_v13  ;;  %v2363_v51 = vand.u32 4294901760, %v2362_v46  ;;  %v9988_v46 = vand.u32 4294901760, %v9975_v37  ;;  %2184 = vst [vmem:[#allocation2 + $0x11] sm:$0x1] %v11877_v24 }
  0xba   : > { %7891 = vmatprep.subr.mxu0 %v9832_v23  ;;  %7921 = vmatpush3.msra.mxu1 %v2335_v13  ;;  %v2356_v39 = vand.u32 4294901760, %v2355_v11  ;;  %v9966_v13 = vsub.f32 %v6752_v63, %v9951_v22  ;;  %v2398_v9 = vand.u32 4294901760, %v2397_v19  ;;  %v6749_v11 = vld [vmem:[%s11864_s2 + $0x80] sm:$0xff] }
  0xbb   : > { %7892 = vmatpush3.msra.mxu0 %v9832_v23  ;;  %7922 = vmatprep.subr.mxu1 %v2342_v14  ;;  %11987 = vst [vmem:[#allocation23_spill] sm:$0xff] %v9988_v46  ;;  %v9993_v49 = vand.u32 4294901760, %v6749_v11  ;;  %v2418_v52 = vsub.f32 %v9975_v37, %v9988_v46 }
  0xbc   : > { %7893 = vmatprep.subr.mxu0 %v9843_v26  ;;  %7923 = vmatpush3.msra.mxu1 %v2342_v14  ;;  %11983 = vst [vmem:[#allocation19_spill] sm:$0xff] %v9966_v13  ;;  %v2404_v14 = vsub.f32 %v9948_v12, %v9960_v27 }
  0xbd   : > { %7894 = vmatpush3.msra.mxu0 %v9843_v26  ;;  %7924 = vmatprep.subr.mxu1 %v2349_v41  ;;  %11989 = vst [vmem:[#allocation25_spill] sm:$0xff] %v9993_v49  ;;  %v2419_v57 = vand.u32 4294901760, %v2418_v52 }
  0xbe   : > { %7895 = vmatprep.subr.mxu0 %v9857_v29  ;;  %7925 = vmatpush3.msra.mxu1 %v2349_v41  ;;  %v9981_v41 = vand.u32 4294901760, %v9966_v13  ;;  %v2405_v45 = vand.u32 4294901760, %v2404_v14 }
  0xbf   : > { %7896 = vmatpush3.msra.mxu0 %v9857_v29  ;;  %7926 = vmatprep.subr.mxu1 %v2356_v39 }
  0xc0   : > { %7897 = vmatprep.subr.mxu0 %v9876_v34  ;;  %7927 = vmatpush3.msra.mxu1 %v2356_v39  ;;  %11986 = vst [vmem:[#allocation22_spill] sm:$0xff] %v9981_v41  ;;  %v9991_v39 = vsub.f32 %v6750_v31, %v9977_v40 }
  0xc1   : > { %7898 = vmatpush3.msra.mxu0 %v9876_v34  ;;  %7928 = vmatprep.subr.mxu1 %v2363_v51 }
  0xc2   : > { %7899 = vmatprep.subr.mxu0 %v9887_v48  ;;  %7929 = vmatpush3.msra.mxu1 %v2363_v51  ;;  %11988 = vst [vmem:[#allocation24_spill] sm:$0xff] %v9991_v39  ;;  %v2411_v51 = vsub.f32 %v9966_v13, %v9981_v41  ;;  %v10002_v20 = vand.u32 4294901760, %v9991_v39 }
  0xc3   : > { %7900 = vmatpush3.msra.mxu0 %v9887_v48  ;;  %7930 = vmatprep.subr.mxu1 %v2370_v36 }
  0xc4   : > { %7901 = vmatprep.subr.mxu0 %v9902_v42  ;;  %7931 = vmatpush3.msra.mxu1 %v2370_v36  ;;  %11990 = vst [vmem:[#allocation26_spill] sm:$0xff] %v10002_v20  ;;  %v10005_v36 = vsub.f32 %v6749_v11, %v9993_v49  ;;  %v2412_v53 = vand.u32 4294901760, %v2411_v51  ;;  %v2425_v58 = vsub.f32 %v9991_v39, %v10002_v20 }
  0xc5   : > { %7902 = vmatpush3.msra.mxu0 %v9902_v42  ;;  %7932 = vmatprep.subr.mxu1 %v2377_v62 }
  0xc6   : > { %7903 = vmatprep.subr.mxu0 %v9918_v56  ;;  %7933 = vmatpush3.msra.mxu1 %v2377_v62  ;;  %11991 = vst [vmem:[#allocation27_spill] sm:$0xff] %v10005_v36  ;;  %v10012_v62 = vand.u32 4294901760, %v10005_v36  ;;  %v2426_v63 = vand.u32 4294901760, %v2425_v58 }
  0xc7   : > { %7904 = vmatpush3.msra.mxu0 %v9918_v56  ;;  %7934 = vmatprep.subr.mxu1 %v2384_v0 }
  0xc8   : > { %7905 = vmatprep.subr.mxu0 %v9935_v61  ;;  %7935 = vmatpush3.msra.mxu1 %v2384_v0  ;;  %11992 = vst [vmem:[#allocation28_spill] sm:$0xff] %v10012_v62  ;;  %v2432_v0 = vsub.f32 %v10005_v36, %v10012_v62 }
  0xc9   : > { %7906 = vmatpush3.msra.mxu0 %v9935_v61  ;;  %7936 = vmatprep.subr.mxu1 %v2391_v4 }
  0xca   : > { %7907 = vmatprep.subr.mxu0 %v9951_v22  ;;  %7937 = vmatpush3.msra.mxu1 %v2391_v4  ;;  %v2433_v1 = vand.u32 4294901760, %v2432_v0 }
  0xcb   : > { %7908 = vmatpush3.msra.mxu0 %v9951_v22  ;;  %7938 = vmatprep.subr.mxu1 %v2398_v9 }
  0xcc   : > { %7909 = vmatprep.subr.mxu0 %v9962_v30  ;;  %7939 = vmatpush3.msra.mxu1 %v2398_v9 }
  0xcd   : > { %7910 = vmatpush3.msra.mxu0 %v9962_v30  ;;  %7940 = vmatprep.subr.mxu1 %v2405_v45 }
  0xce   : > { %7911 = vmatprep.subr.mxu0 %v9977_v40  ;;  %7941 = vmatpush3.msra.mxu1 %v2405_v45 }
  0xcf   : > { %7912 = vmatpush3.msra.mxu0 %v9977_v40  ;;  %7942 = vmatprep.subr.mxu1 %v2412_v53 }
  0xd0   : > { %7913 = vmatprep.subr.mxu0 %v9993_v49  ;;  %7943 = vmatpush3.msra.mxu1 %v2412_v53 }
  0xd1   : > { %7914 = vmatpush3.msra.mxu0 %v9993_v49  ;;  %7944 = vmatprep.subr.mxu1 %v2419_v57 }
  0xd2   : > { %7953 = vmatprep.subr.mxu0 %v9786_v7  ;;  %7945 = vmatpush3.msra.mxu1 %v2419_v57 }
  0xd3   : > { %7946 = vmatprep.subr.mxu1 %v2426_v63 }
  0xd4   : > { %7947 = vmatpush3.msra.mxu1 %v2426_v63 }
  0xd5   : > { %7948 = vmatprep.subr.mxu1 %v2433_v1 }
  0xd6   : > { %7949 = vmatpush3.msra.mxu1 %v2433_v1 }
  0xd7   : > { %7988 = vmatprep.subr.mxu1 %v9780_v2 }
  0xe2   : > { %v7559_v4 = vpop.f32.mrf.mxu0 }
  0xe4   : > { %v484_v31 = vpop.f32.mrf.mxu0 }
  0xe6   : > { %v7578_v19 = vpop.f32.mrf.mxu1 }
  0xe7   : > { %v612_v59 = vadd.f32 %v7578_v19, %v7559_v4 }
  0xe8   : > { %v605_v14 = vpop.f32.mrf.mxu1 }
  0xe9   : > { %v606_v54 = vadd.f32 %v605_v14, %v484_v31 }
  0xf2   : > { %v7597_v9 = vpop.f32.mrf.mxu0 }
  0xf3   : > { %v707_v47 = vadd.f32 %v7597_v9, %v612_v59 }
  0xf4   : > { %v699_v45 = vpop.f32.mrf.mxu0 }
  0xf5   : > { %v700_v33 = vadd.f32 %v699_v45, %v606_v54 }
  0xf8   : > { %v7616_v11 = vpop.f32.mrf.mxu1 }
  0xf9   : > { %v796_v28 = vadd.f32 %v7616_v11, %v707_v47 }
  0xfa   : > { %v787_v52 = vpop.f32.mrf.mxu1 }
  0xfb   : > { %v788_v15 = vadd.f32 %v787_v52, %v700_v33 }
 0x104   : > { %v7635_v51 = vpop.f32.mrf.mxu0 }
 0x105   : > { %v897_v36 = vadd.f32 %v7635_v51, %v796_v28 }
 0x106   : > { %v890_v57 = vpop.f32.mrf.mxu0 }
 0x107   : > { %v891_v37 = vadd.f32 %v890_v57, %v788_v15 }
 0x10a   : > { %v7654_v53 = vpop.f32.mrf.mxu1 }
 0x10b   : > { %v982_v13 = vadd.f32 %v7654_v53, %v897_v36 }
 0x10c   : > { %v975_v63 = vpop.f32.mrf.mxu1 }
 0x10d   : > { %v976_v40 = vadd.f32 %v975_v63, %v891_v37 }
 0x116   : > { %v7673_v58 = vpop.f32.mrf.mxu0 }
 0x117   : > { %v1079_v60 = vadd.f32 %v7673_v58, %v982_v13 }
 0x118   : > { %v1068_v1 = vpop.f32.mrf.mxu0 }
 0x119   : > { %v1069_v55 = vadd.f32 %v1068_v1, %v976_v40 }
 0x11c   : > { %v7692_v0 = vpop.f32.mrf.mxu1 }
 0x11d   : > { %v1196_v4 = vadd.f32 %v7692_v0, %v1079_v60 }
 0x11e   : > { %v1189_v20 = vpop.f32.mrf.mxu1 }
 0x11f   : > { %v1190_v59 = vadd.f32 %v1189_v20, %v1069_v55  ;;  %v6748_v55 = vld [vmem:[%s11865_s3] ss:$0 sm:$0xff] }
 0x128   : > { %v7711_v62 = vpop.f32.mrf.mxu0 }
 0x129   : > { %v1291_v9 = vadd.f32 %v7711_v62, %v1196_v4 }
 0x12a   : > { %v1283_v46 = vpop.f32.mrf.mxu0 }
 0x12b   : > { %v1284_v33 = vadd.f32 %v1283_v46, %v1190_v59  ;;  %v12006_v59 = vld [vmem:[#allocation6_spill] sm:$0xff] }
 0x12e   : > { %v7730_v24 = vpop.f32.mrf.mxu1 }
 0x12f   : > { %v1380_v28 = vadd.f32 %v7730_v24, %v1291_v9  ;;  %v12007_v9 = vld [vmem:[#allocation7_spill] sm:$0xff] }
 0x130   : > { %v1371_v27 = vpop.f32.mrf.mxu1 }
 0x131   : > { %v1372_v51 = vadd.f32 %v1371_v27, %v1284_v33  ;;  %v12009_v33 = vld [vmem:[#allocation9_spill] sm:$0xff] }
 0x13a   : > { %v7749_v41 = vpop.f32.mrf.mxu0 }
 0x13b   : > { %v1481_v52 = vadd.f32 %v7749_v41, %v1380_v28 }
 0x13c   : > { %v1474_v50 = vpop.f32.mrf.mxu0 }
 0x13d   : > { %v1475_v40 = vadd.f32 %v1474_v50, %v1372_v51 }
 0x140   : > { %v7768_v6 = vpop.f32.mrf.mxu1 }
 0x141   : > { %v1566_v60 = vadd.f32 %v7768_v6, %v1481_v52 }
 0x142   : > { %v1559_v10 = vpop.f32.mrf.mxu1 }
 0x14d   : > { %v7787_v43 = vpop.f32.mrf.mxu0 }
 0x14f   : > { %v1667_v39 = vpop.f32.mrf.mxu0 }
 0x152   : > { %v7806_v3 = vpop.f32.mrf.mxu1 }
 0x153   : > { %v1795_v19 = vadd.f32 %v7806_v3, %v7787_v43 }
 0x154   : > { %v1788_v12 = vpop.f32.mrf.mxu1 }
 0x155   : > { %v1789_v14 = vadd.f32 %v1788_v12, %v1667_v39  ;;  %v1560_v39 = vadd.f32 %v1559_v10, %v1475_v40 }
 0x15e   : > { %v7825_v49 = vpop.f32.mrf.mxu0 }
 0x15f   : > { %v1890_v54 = vadd.f32 %v7825_v49, %v1795_v19  ;;  %v12002_v19 = vld [vmem:[#allocation27_spill] sm:$0xff] }
 0x160   : > { %v1882_v31 = vpop.f32.mrf.mxu0 }
 0x161   : > { %v1883_v45 = vadd.f32 %v1882_v31, %v1789_v14 }
 0x164   : > { %v7844_v30 = vpop.f32.mrf.mxu1 }
 0x165   : > { %v1979_v15 = vadd.f32 %v7844_v30, %v1890_v54  ;;  %v2199_v54 = vld [vmem:[%s11864_s2 + $0x60] sm:$0xff] }
 0x166   : > { %v1970_v11 = vpop.f32.mrf.mxu1 }
 0x167   : > { %v1971_v37 = vadd.f32 %v1970_v11, %v1883_v45  ;;  %v2198_v11 = vld [vmem:[%s11864_s2 + $0x58] sm:$0xff] }
 0x168   : > { %v10180_v52 = vand.u32 4294901760, %v2198_v11 }
 0x170   : > { %v7863_v47 = vpop.f32.mrf.mxu0 }
 0x171   : > { %v2080_v13 = vadd.f32 %v7863_v47, %v1979_v15  ;;  %v12008_v47 = vld [vmem:[#allocation8_spill] sm:$0xff]  ;;  %v2197_v15 = vld [vmem:[%s11864_s2 + $0x50] sm:$0xff] }
 0x172   : > { %v2073_v36 = vpop.f32.mrf.mxu0  ;;  %v10195_v40 = vand.u32 4294901760, %v2197_v15 }
 0x173   : > { %v2074_v3 = vadd.f32 %v2073_v36, %v1971_v37  ;;  %v2196_v37 = vld [vmem:[%s11864_s2 + $0x48] sm:$0xff] }
 0x176   : > { %v7882_v53 = vpop.f32.mrf.mxu1 }
 0x177   : > { %v2165_v43 = vadd.f32 %v7882_v53, %v2080_v13  ;;  %v12011_v13 = vld [vmem:[#allocation11_spill] sm:$0xff] }
 0x178   : > { %v2158_v12 = vpop.f32.mrf.mxu1 }
 0x179   : > { %v2169_v46 = vadd.f32 %v2165_v43, %v1566_v60  ;;  %v2159_v49 = vadd.f32 %v2158_v12, %v2074_v3  ;;  %v12012_v43 = vld [vmem:[#allocation13_spill] sm:$0xff]  ;;  %v10212_v12 = vsub.f32 %v2198_v11, %v10180_v52 }
 0x17b   : > { %v2178_v20 = vadd.f32 %v6748_v55, %v2169_v46  ;;  %v2168_v30 = vadd.f32 %v2159_v49, %v1560_v39  ;;  %v10214_v39 = vand.u32 4294901760, %v2196_v37  ;;  %v12013_v46 = vld [vmem:[#allocation15_spill] sm:$0xff] }
 0x17d   : > { %v2180_v62 = vmax.f32 %v2178_v20, 0.0  ;;  %v2177_v27 = vadd.f32 %v6748_v55, %v2168_v30  ;;  %v10226_v20 = vsub.f32 %v2197_v15, %v10195_v40  ;;  %v2189_v15 = vld [vmem:[%s11864_s2 + $0x10] sm:$0xff] }
 0x17f   : > { %2183 = vst [vmem:[#allocation2 + $0x9] sm:$0xff] %v2180_v62  ;;  %v2179_v41 = vmax.f32 %v2177_v27, 0.0  ;;  %v10024_v24 = vand.u32 4294901760, %v2180_v62 }
 0x181   : > { %2182 = vst [vmem:[#allocation2 + $0x1] sm:$0xff] %v2179_v41  ;;  %v10026_v50 = vand.u32 4294901760, %v2179_v41  ;;  %v10029_v6 = vsub.f32 %v2180_v62, %v10024_v24  ;;  %v2194_v62 = vld [vmem:[%s11864_s2 + $0x38] sm:$0xff] }
 0x183   : > { %7950 = vmatprep.mubr.f32.mxu1 %v10026_v50  ;;  %v2304_v10 = vsub.f32 %v2179_v41, %v10026_v50  ;;  %v2315_v57 = vand.u32 4294901760, %v10029_v6 }
 0x184   : > { %7951 = vmatmul.mubr.f32.vlgmr.msra.gmra.mxu1 %v10024_v24 }
 0x185   : > { %7989 = vmatpush3.msra.mxu1 %v9780_v2  ;;  %v2305_v58 = vand.u32 4294901760, %v2304_v10  ;;  %v2316_v63 = vsub.f32 %v10029_v6, %v2315_v57 }
 0x186   : > { %7990 = vmatprep.subr.mxu1 %v9788_v8 }
 0x187   : > { %7991 = vmatpush3.msra.mxu1 %v9788_v8  ;;  %8020 = vmatprep.mubr.f32.mxu1 %v2305_v58  ;;  %v2306_v0 = vsub.f32 %v2304_v10, %v2305_v58  ;;  %v2317_v4 = vand.u32 4294901760, %v2316_v63  ;;  %v2193_v58 = vld [vmem:[%s11864_s2 + $0x30] sm:$0xff]  ;;  %v10253_v63 = vand.u32 4294901760, %v2194_v62 }
 0x188   : > { %7992 = vmatprep.subr.mxu1 %v9801_v21  ;;  %v2185_v36 = vld [vmem:[#allocation2] sm:$0xff] }
 0x189   : > { %7993 = vmatpush3.msra.mxu1 %v9801_v21  ;;  %v2307_v1 = vand.u32 4294901760, %v2306_v0  ;;  %v10201_v3 = vand.u32 4294901760, %v2185_v36  ;;  %v12015_v0 = vld [vmem:[#allocation22_spill] sm:$0xff] }
 0x18a   : > { %7994 = vmatprep.subr.mxu1 %v9816_v25 }
 0x18b   : > { %7995 = vmatpush3.msra.mxu1 %v9816_v25  ;;  %7915 = vmatprep.mubr.f32.mxu0 %v2307_v1  ;;  %v10236_v41 = vsub.f32 %v2185_v36, %v10201_v3 }
 0x18c   : > { %7996 = vmatprep.subr.mxu1 %v9832_v23  ;;  %7916 = vmatmul.mubr.f32.vlgmr.msra.gmra.mxu0 %v2317_v4 }
 0x18d   : > { %7954 = vmatpush3.msra.mxu0 %v9786_v7  ;;  %7997 = vmatpush3.msra.mxu1 %v9832_v23  ;;  %v11993_v7 = vld [vmem:[#allocation12_spill] sm:$0xff] }
 0x18e   : > { %7955 = vmatprep.subr.mxu0 %v9799_v16  ;;  %7985 = vmatprep.mubr.f32.mxu0 %v2304_v10  ;;  %v10243_v10 = vand.u32 4294901760, %v10212_v12 }
 0x18f   : > { %7998 = vmatprep.subr.mxu1 %v9843_v26  ;;  %7956 = vmatpush3.msra.mxu0 %v9799_v16  ;;  %v11994_v16 = vld [vmem:[#allocation18_spill] sm:$0xff] }
 0x190   : > { %7999 = vmatpush3.msra.mxu1 %v9843_v26  ;;  %7957 = vmatprep.subr.mxu0 %v9814_v18 }
 0x191   : > { %8000 = vmatprep.subr.mxu1 %v9857_v29  ;;  %7958 = vmatpush3.msra.mxu0 %v9814_v18  ;;  %v11995_v18 = vld [vmem:[#allocation14_spill] sm:$0xff] }
 0x192   : > { %8001 = vmatpush3.msra.mxu1 %v9857_v29  ;;  %7959 = vmatprep.subr.mxu0 %v9829_v5 }
 0x193   : > { %8002 = vmatprep.subr.mxu1 %v9876_v34  ;;  %7960 = vmatpush3.msra.mxu0 %v9829_v5  ;;  %v11996_v5 = vld [vmem:[#allocation21_spill] sm:$0xff] }
 0x194   : > { %8003 = vmatpush3.msra.mxu1 %v9876_v34  ;;  %7961 = vmatprep.subr.mxu0 %v9846_v35 }
 0x195   : > { %8004 = vmatprep.subr.mxu1 %v9887_v48  ;;  %7962 = vmatpush3.msra.mxu0 %v9846_v35  ;;  %v11997_v35 = vld [vmem:[#allocation16_spill] sm:$0xff] }
 0x196   : > { %8005 = vmatpush3.msra.mxu1 %v9887_v48  ;;  %7963 = vmatprep.subr.mxu0 %v9855_v38 }
 0x197   : > { %8006 = vmatprep.subr.mxu1 %v9902_v42  ;;  %7964 = vmatpush3.msra.mxu0 %v9855_v38  ;;  %v11998_v38 = vld [vmem:[#allocation25_spill] sm:$0xff] }
 0x198   : > { %8007 = vmatpush3.msra.mxu1 %v9902_v42  ;;  %7965 = vmatprep.subr.mxu0 %v9871_v44 }
 0x199   : > { %8008 = vmatprep.subr.mxu1 %v9918_v56  ;;  %7966 = vmatpush3.msra.mxu0 %v9871_v44  ;;  %v11999_v44 = vld [vmem:[#allocation19_spill] sm:$0xff] }
 0x19a   : > { %8009 = vmatpush3.msra.mxu1 %v9918_v56  ;;  %7967 = vmatprep.subr.mxu0 %v9891_v17 }
 0x19b   : > { %8010 = vmatprep.subr.mxu1 %v9935_v61  ;;  %7968 = vmatpush3.msra.mxu0 %v9891_v17  ;;  %v12000_v17 = vld [vmem:[#allocation20_spill] sm:$0xff] }
 0x19c   : > { %8011 = vmatpush3.msra.mxu1 %v9935_v61  ;;  %7969 = vmatprep.subr.mxu0 %v9900_v32 }
 0x19d   : > { %8012 = vmatprep.subr.mxu1 %v9951_v22  ;;  %7970 = vmatpush3.msra.mxu0 %v9900_v32  ;;  %v12001_v32 = vld [vmem:[#allocation24_spill] sm:$0xff] }
 0x19e   : > { %8013 = vmatpush3.msra.mxu1 %v9951_v22  ;;  %7971 = vmatprep.subr.mxu0 %v11993_v7 }
 0x19f   : > { %8014 = vmatprep.subr.mxu1 %v11994_v16  ;;  %7972 = vmatpush3.msra.mxu0 %v11993_v7  ;;  %v10260_v7 = vand.u32 4294901760, %v10226_v20 }
 0x1a0   : > { %8015 = vmatpush3.msra.mxu1 %v11994_v16  ;;  %7973 = vmatprep.subr.mxu0 %v11995_v18 }
 0x1a1   : > { %8016 = vmatprep.subr.mxu1 %v11996_v5  ;;  %7974 = vmatpush3.msra.mxu0 %v11995_v18  ;;  %v2192_v18 = vld [vmem:[%s11864_s2 + $0x28] sm:$0xff] }
 0x1a2   : > { %8017 = vmatpush3.msra.mxu1 %v11996_v5  ;;  %7975 = vmatprep.subr.mxu0 %v11997_v35 }
 0x1a3   : > { %8018 = vmatprep.subr.mxu1 %v11998_v38  ;;  %7976 = vmatpush3.msra.mxu0 %v11997_v35  ;;  %v10270_v35 = vand.u32 4294901760, %v2193_v58 }
 0x1a4   : > { %8019 = vmatpush3.msra.mxu1 %v11998_v38  ;;  %7977 = vmatprep.subr.mxu0 %v11999_v44 }
 0x1a5   : > { %8021 = vmatmul.mubr.f32.vlgmr.msra.gmra.mxu1 %v2315_v57  ;;  %8058 = vmatprep.subr.mxu1 %v9780_v2  ;;  %v10246_v57 = vsub.f32 %v2196_v37, %v10214_v39 }
 0x1a6   : > { %7978 = vmatpush3.msra.mxu0 %v11999_v44  ;;  %8059 = vmatpush3.msra.mxu1 %v9780_v2  ;;  %v12003_v2 = vld [vmem:[#allocation3_spill] sm:$0xff]  ;;  %v3039_v44 = vsub.f32 %v10212_v12, %v10243_v10 }
 0x1a7   : > { %8090 = vmatprep.mubr.f32.mxu1 %v10026_v50  ;;  %7979 = vmatprep.subr.mxu0 %v12000_v17 }
 0x1a8   : > { %8060 = vmatprep.subr.mxu1 %v9788_v8  ;;  %7980 = vmatpush3.msra.mxu0 %v12000_v17  ;;  %v10276_v17 = vand.u32 4294901760, %v10246_v57  ;;  %v3040_v11 = vand.u32 4294901760, %v3039_v44 }
 0x1a9   : > { %8061 = vmatpush3.msra.mxu1 %v9788_v8  ;;  %7981 = vmatprep.subr.mxu0 %v12001_v32  ;;  %v12004_v8 = vld [vmem:[#allocation4_spill] sm:$0xff] }
 0x1aa   : > { %8062 = vmatprep.subr.mxu1 %v9801_v21  ;;  %7982 = vmatpush3.msra.mxu0 %v12001_v32  ;;  %v2191_v32 = vld [vmem:[%s11864_s2 + $0x20] sm:$0xff] }
 0x1ab   : > { %8063 = vmatpush3.msra.mxu1 %v9801_v21  ;;  %7983 = vmatprep.subr.mxu0 %v12002_v19  ;;  %v2202_v21 = vld [vmem:[%s11864_s2 + $0x78] sm:$0xff] }
 0x1ac   : > { %8064 = vmatprep.subr.mxu1 %v9816_v25  ;;  %7984 = vmatpush3.msra.mxu0 %v12002_v19  ;;  %v10127_v31 = vand.u32 4294901760, %v2202_v21  ;;  %v12016_v19 = vld [vmem:[#allocation23_spill] sm:$0xff] }
 0x1ad   : > { %8065 = vmatpush3.msra.mxu1 %v9816_v25  ;;  %7986 = vmatmul.mubr.f32.vlgmr.msra.gmra.mxu0 %v10029_v6  ;;  %v12005_v25 = vld [vmem:[#allocation5_spill] sm:$0xff] }
 0x1ae   : > { %8023 = vmatprep.subr.mxu0 %v12003_v2  ;;  %8066 = vmatprep.subr.mxu1 %v9832_v23 }
 0x1af   : > { %8024 = vmatpush3.msra.mxu0 %v12003_v2  ;;  %8055 = vmatprep.mubr.f32.mxu0 %v10026_v50  ;;  %v12014_v50 = vld [vmem:[#allocation17_spill] sm:$0xff]  ;;  %v10284_v2 = vsub.f32 %v2194_v62, %v10253_v63 }
 0x1b0   : > { %8067 = vmatpush3.msra.mxu1 %v9832_v23  ;;  %8025 = vmatprep.subr.mxu0 %v12004_v8  ;;  %v2201_v23 = vld [vmem:[%s11864_s2 + $0x70] sm:$0xff] }
 0x1b1   : > { %8068 = vmatprep.subr.mxu1 %v9843_v26  ;;  %8026 = vmatpush3.msra.mxu0 %v12004_v8  ;;  %v10141_v14 = vand.u32 4294901760, %v2201_v23  ;;  %v10286_v8 = vand.u32 4294901760, %v2192_v18  ;;  %v10314_v36 = vand.u32 4294901760, %v10284_v2 }
 0x1b2   : > { %8069 = vmatpush3.msra.mxu1 %v9843_v26  ;;  %8027 = vmatprep.subr.mxu0 %v12005_v25  ;;  %v2200_v26 = vld [vmem:[%s11864_s2 + $0x68] sm:$0xff] }
 0x1b3   : > { %8070 = vmatprep.subr.mxu1 %v9857_v29  ;;  %8028 = vmatpush3.msra.mxu0 %v12005_v25  ;;  %v10163_v28 = vsub.f32 %v2201_v23, %v10141_v14  ;;  %v3046_v25 = vsub.f32 %v10226_v20, %v10260_v7  ;;  %v10317_v37 = vsub.f32 %v2192_v18, %v10286_v8 }
 0x1b4   : > { %8071 = vmatpush3.msra.mxu1 %v9857_v29  ;;  %8029 = vmatprep.subr.mxu0 %v12006_v59  ;;  %v10146_v29 = vsub.f32 %v2202_v21, %v10127_v31 }
 0x1b5   : > { %8072 = vmatprep.subr.mxu1 %v9876_v34  ;;  %8030 = vmatpush3.msra.mxu0 %v12006_v59  ;;  %v2190_v59 = vld [vmem:[%s11864_s2 + $0x18] sm:$0xff] }
 0x1b6   : > { %8073 = vmatpush3.msra.mxu1 %v9876_v34  ;;  %8031 = vmatprep.subr.mxu0 %v12007_v9  ;;  %v10153_v34 = vand.u32 4294901760, %v2200_v26  ;;  %v10170_v45 = vand.u32 4294901760, %v10146_v29 }
 0x1b7   : > { %8074 = vmatprep.subr.mxu1 %v9887_v48  ;;  %8032 = vmatpush3.msra.mxu0 %v12007_v9 }
 0x1b8   : > { %8075 = vmatpush3.msra.mxu1 %v9887_v48  ;;  %8033 = vmatprep.subr.mxu0 %v12008_v47  ;;  %v10165_v48 = vand.u32 4294901760, %v2199_v54  ;;  %v10178_v51 = vsub.f32 %v2200_v26, %v10153_v34  ;;  %v3011_v60 = vsub.f32 %v10146_v29, %v10170_v45  ;;  %v12017_v26 = vld [vmem:[#allocation26_spill] sm:$0xff] }
 0x1b9   : > { %8076 = vmatprep.subr.mxu1 %v9902_v42  ;;  %8034 = vmatpush3.msra.mxu0 %v12008_v47  ;;  %v10304_v47 = vand.u32 4294901760, %v2191_v32 }
 0x1ba   : > { %8077 = vmatpush3.msra.mxu1 %v9902_v42  ;;  %8035 = vmatprep.subr.mxu0 %v12009_v33  ;;  %v12010_v42 = vld [vmem:[#allocation10_spill] sm:$0xff]  ;;  %v10193_v53 = vsub.f32 %v2199_v54, %v10165_v48  ;;  %v10209_v55 = vand.u32 4294901760, %v10178_v51  ;;  %v3012_v27 = vand.u32 4294901760, %v3011_v60  ;;  %v10302_v54 = vsub.f32 %v2193_v58, %v10270_v35 }
 0x1bb   : > { %8078 = vmatprep.subr.mxu1 %v9918_v56  ;;  %8036 = vmatpush3.msra.mxu0 %v12009_v33  ;;  %v3053_v33 = vsub.f32 %v10246_v57, %v10276_v17  ;;  %v3047_v60 = vand.u32 4294901760, %v3046_v25  ;;  %v10332_v62 = vsub.f32 %v2191_v32, %v10304_v47  ;;  %v10344_v58 = vand.u32 4294901760, %v10317_v37 }
 0x1bc   : > { %8079 = vmatpush3.msra.mxu1 %v9918_v56  ;;  %8037 = vmatprep.subr.mxu0 %v12010_v42  ;;  %v10190_v56 = vand.u32 4294901760, %v10163_v28  ;;  %v10223_v49 = vand.u32 4294901760, %v10193_v53  ;;  %v3025_v6 = vsub.f32 %v10178_v51, %v10209_v55 }
 0x1bd   : > { %8080 = vmatprep.subr.mxu1 %v9935_v61  ;;  %8038 = vmatpush3.msra.mxu0 %v12010_v42  ;;  %v12018_v42 = vld [vmem:[#allocation28_spill] sm:$0xff] }
 0x1be   : > { %8081 = vmatpush3.msra.mxu1 %v9935_v61  ;;  %8039 = vmatprep.subr.mxu0 %v12011_v13  ;;  %v2195_v61 = vld [vmem:[%s11864_s2 + $0x40] sm:$0xff]  ;;  %v3032_v4 = vsub.f32 %v10193_v53, %v10223_v49 }
 0x1bf   : > { %8082 = vmatprep.subr.mxu1 %v9951_v22  ;;  %8040 = vmatpush3.msra.mxu0 %v12011_v13  ;;  %v10228_v30 = vand.u32 4294901760, %v2195_v61  ;;  %v10319_v13 = vand.u32 4294901760, %v2190_v59 }
 0x1c0   : > { %8083 = vmatpush3.msra.mxu1 %v9951_v22  ;;  %8041 = vmatprep.subr.mxu0 %v12012_v43  ;;  %v3018_v22 = vsub.f32 %v10163_v28, %v10190_v56  ;;  %v3033_v21 = vand.u32 4294901760, %v3032_v4 }
 0x1c1   : > { %8084 = vmatprep.subr.mxu1 %v11994_v16  ;;  %8042 = vmatpush3.msra.mxu0 %v12012_v43  ;;  %v2188_v43 = vld [vmem:[%s11864_s2 + $0x8] sm:$0xff] }
 0x1c2   : > { %8085 = vmatpush3.msra.mxu1 %v11994_v16  ;;  %8043 = vmatprep.subr.mxu0 %v12013_v46  ;;  %v3019_v1 = vand.u32 4294901760, %v3018_v22  ;;  %v10263_v16 = vsub.f32 %v2195_v61, %v10228_v30  ;;  %v10329_v22 = vand.u32 4294901760, %v10302_v54 }
 0x1c3   : > { %8086 = vmatprep.subr.mxu1 %v11996_v5  ;;  %8044 = vmatpush3.msra.mxu0 %v12013_v46 }
 0x1c4   : > { %8087 = vmatpush3.msra.mxu1 %v11996_v5  ;;  %8045 = vmatprep.subr.mxu0 %v12014_v50  ;;  %v2989_v5 = vand.u32 4294901760, %v10236_v41  ;;  %v10292_v23 = vand.u32 4294901760, %v10263_v16  ;;  %v3074_v18 = vsub.f32 %v10302_v54, %v10329_v22 }
 0x1c5   : > { %8088 = vmatprep.subr.mxu1 %v11998_v38  ;;  %8046 = vmatpush3.msra.mxu0 %v12014_v50  ;;  %v3054_v50 = vand.u32 4294901760, %v3053_v33 }
 0x1c6   : > { %8089 = vmatpush3.msra.mxu1 %v11998_v38  ;;  %8047 = vmatprep.subr.mxu0 %v12015_v0  ;;  %v3026_v38 = vand.u32 4294901760, %v3025_v6  ;;  %v2990_v9 = vsub.f32 %v10236_v41, %v2989_v5  ;;  %v3060_v61 = vsub.f32 %v10263_v16, %v10292_v23  ;;  %v2187_v6 = vld [vmem:[%s11864_s2] sm:$0xff] }
 0x1c7   : > { %8091 = vmatmul.mubr.f32.vlgmr.msra.gmra.mxu1 %v10024_v24  ;;  %8128 = vmatprep.subr.mxu1 %v3012_v27  ;;  %v10361_v32 = vand.u32 4294901760, %v2187_v6 }
 0x1c8   : > { %8048 = vmatpush3.msra.mxu0 %v12015_v0  ;;  %8129 = vmatpush3.msra.mxu1 %v3012_v27  ;;  %v2991_v46 = vand.u32 4294901760, %v2990_v9  ;;  %v10334_v27 = vand.u32 4294901760, %v2189_v15  ;;  %v10347_v0 = vsub.f32 %v2190_v59, %v10319_v13  ;;  %v3061_v4 = vand.u32 4294901760, %v3060_v61 }
 0x1c9   : > { %8160 = vmatprep.mubr.f32.mxu1 %v10201_v3  ;;  %8049 = vmatprep.subr.mxu0 %v12016_v19  ;;  %v10381_v33 = vsub.f32 %v2187_v6, %v10361_v32 }
 0x1ca   : > { %8130 = vmatprep.subr.mxu1 %v3019_v1  ;;  %8050 = vmatpush3.msra.mxu0 %v12016_v19  ;;  %v10359_v44 = vsub.f32 %v2189_v15, %v10334_v27  ;;  %v10368_v25 = vand.u32 4294901760, %v10347_v0 }
 0x1cb   : > { %8131 = vmatpush3.msra.mxu1 %v3019_v1  ;;  %8051 = vmatprep.subr.mxu0 %v12017_v26  ;;  %v10349_v1 = vand.u32 4294901760, %v2188_v43 }
 0x1cc   : > { %8132 = vmatprep.subr.mxu1 %v3026_v38  ;;  %8052 = vmatpush3.msra.mxu0 %v12017_v26  ;;  %v3075_v26 = vand.u32 4294901760, %v3074_v18 }
 0x1cd   : > { %8133 = vmatpush3.msra.mxu1 %v3026_v38  ;;  %8053 = vmatprep.subr.mxu0 %v12018_v42  ;;  %v10356_v38 = vand.u32 4294901760, %v10332_v62  ;;  %v10371_v59 = vsub.f32 %v2188_v43, %v10349_v1 }
 0x1ce   : > { %8134 = vmatprep.subr.mxu1 %v3033_v21  ;;  %8054 = vmatpush3.msra.mxu0 %v12018_v42  ;;  %v3095_v42 = vsub.f32 %v10347_v0, %v10368_v25 }
 0x1cf   : > { %8135 = vmatpush3.msra.mxu1 %v3033_v21  ;;  %8056 = vmatmul.mubr.f32.vlgmr.msra.gmra.mxu0 %v10024_v24  ;;  %v3067_v24 = vsub.f32 %v10284_v2, %v10314_v36  ;;  %v3081_v21 = vsub.f32 %v10317_v37, %v10344_v58  ;;  %v3088_v9 = vsub.f32 %v10332_v62, %v10356_v38 }
 0x1d0   : > { %8093 = vmatprep.subr.mxu0 %v10127_v31  ;;  %8136 = vmatprep.subr.mxu1 %v3040_v11  ;;  %v3096_v6 = vand.u32 4294901760, %v3095_v42 }
 0x1d1   : > { %8094 = vmatpush3.msra.mxu0 %v10127_v31  ;;  %8125 = vmatprep.mubr.f32.mxu0 %v2991_v46  ;;  %v3068_v19 = vand.u32 4294901760, %v3067_v24  ;;  %v3082_v15 = vand.u32 4294901760, %v3081_v21  ;;  %v3089_v61 = vand.u32 4294901760, %v3088_v9  ;;  %v10395_v46 = vand.u32 4294901760, %v10381_v33 }
 0x1d2   : > { %8137 = vmatpush3.msra.mxu1 %v3040_v11  ;;  %8095 = vmatprep.subr.mxu0 %v10141_v14  ;;  %v10378_v11 = vand.u32 4294901760, %v10359_v44 }
 0x1d3   : > { %8138 = vmatprep.subr.mxu1 %v3047_v60  ;;  %8096 = vmatpush3.msra.mxu0 %v10141_v14  ;;  %v3116_v18 = vsub.f32 %v10381_v33, %v10395_v46 }
 0x1d4   : > { %8139 = vmatpush3.msra.mxu1 %v3047_v60  ;;  %8097 = vmatprep.subr.mxu0 %v10153_v34  ;;  %v10388_v60 = vand.u32 4294901760, %v10371_v59  ;;  %v3102_v43 = vsub.f32 %v10359_v44, %v10378_v11 }
 0x1d5   : > { %8140 = vmatprep.subr.mxu1 %v3054_v50  ;;  %8098 = vmatpush3.msra.mxu0 %v10153_v34 }
 0x1d6   : > { %8141 = vmatpush3.msra.mxu1 %v3054_v50  ;;  %8099 = vmatprep.subr.mxu0 %v10165_v48  ;;  %v2186_v50 = vld [vmem:[#allocation2 + $0x8] sm:$0xff]  ;;  %v3109_v24 = vsub.f32 %v10371_v59, %v10388_v60 }
 0x1d7   : > { %8142 = vmatprep.subr.mxu1 %v3061_v4  ;;  %8100 = vmatpush3.msra.mxu0 %v10165_v48 }
 0x1d8   : > { %8143 = vmatpush3.msra.mxu1 %v3061_v4  ;;  %8101 = vmatprep.subr.mxu0 %v10180_v52  ;;  %v3103_v4 = vand.u32 4294901760, %v3102_v43  ;;  %v3110_v21 = vand.u32 4294901760, %v3109_v24 }
 0x1d9   : > { %8144 = vmatprep.subr.mxu1 %v3068_v19  ;;  %8102 = vmatpush3.msra.mxu0 %v10180_v52 }
 0x1da   : > { %8145 = vmatpush3.msra.mxu1 %v3068_v19  ;;  %8103 = vmatprep.subr.mxu0 %v10195_v40  ;;  %v10405_v19 = vand.u32 4294901760, %v2186_v50 }
 0x1db   : > { %8146 = vmatprep.subr.mxu1 %v3075_v26  ;;  %8104 = vmatpush3.msra.mxu0 %v10195_v40 }
 0x1dc   : > { %8147 = vmatpush3.msra.mxu1 %v3075_v26  ;;  %8105 = vmatprep.subr.mxu0 %v10214_v39  ;;  %v3117_v26 = vand.u32 4294901760, %v3116_v18  ;;  %v10412_v9 = vsub.f32 %v2186_v50, %v10405_v19  ;;  %v6769_v50 = vld [vmem:[%s11864_s2 + $0x120] sm:$0xff] }
 0x1dd   : > { %8148 = vmatprep.subr.mxu1 %v3082_v15  ;;  %8106 = vmatpush3.msra.mxu0 %v10214_v39 }
 0x1de   : > { %8149 = vmatpush3.msra.mxu1 %v3082_v15  ;;  %8107 = vmatprep.subr.mxu0 %v10228_v30  ;;  %v2999_v15 = vand.u32 4294901760, %v10412_v9 }
 0x1df   : > { %8150 = vmatprep.subr.mxu1 %v3089_v61  ;;  %8108 = vmatpush3.msra.mxu0 %v10228_v30 }
 0x1e0   : > { %8151 = vmatpush3.msra.mxu1 %v3089_v61  ;;  %8109 = vmatprep.subr.mxu0 %v10253_v63  ;;  %v3000_v42 = vsub.f32 %v10412_v9, %v2999_v15 }
 0x1e1   : > { %8152 = vmatprep.subr.mxu1 %v3096_v6  ;;  %8110 = vmatpush3.msra.mxu0 %v10253_v63 }
 0x1e2   : > { %8153 = vmatpush3.msra.mxu1 %v3096_v6  ;;  %8111 = vmatprep.subr.mxu0 %v10270_v35 }
 0x1e3   : > { %8154 = vmatprep.subr.mxu1 %v3103_v4  ;;  %8112 = vmatpush3.msra.mxu0 %v10270_v35 }
 0x1e4   : > { %8155 = vmatpush3.msra.mxu1 %v3103_v4  ;;  %8113 = vmatprep.subr.mxu0 %v10286_v8 }
 0x1e5   : > { %8156 = vmatprep.subr.mxu1 %v3110_v21  ;;  %8114 = vmatpush3.msra.mxu0 %v10286_v8 }
 0x1e6   : > { %8157 = vmatpush3.msra.mxu1 %v3110_v21  ;;  %8115 = vmatprep.subr.mxu0 %v10304_v47  ;;  %v6768_v21 = vld [vmem:[%s11864_s2 + $0x118] sm:$0xff] }
 0x1e7   : > { %8158 = vmatprep.subr.mxu1 %v3117_v26  ;;  %8116 = vmatpush3.msra.mxu0 %v10304_v47 }
 0x1e8   : > { %8159 = vmatpush3.msra.mxu1 %v3117_v26  ;;  %8117 = vmatprep.subr.mxu0 %v10319_v13 }
 0x1e9   : > { %8161 = vmatmul.mubr.f32.vlgmr.msra.gmra.mxu1 %v10405_v19  ;;  %8198 = vmatprep.subr.mxu1 %v10127_v31 }
 0x1ea   : > { %8118 = vmatpush3.msra.mxu0 %v10319_v13  ;;  %8199 = vmatpush3.msra.mxu1 %v10127_v31 }
 0x1eb   : > { %8230 = vmatprep.mubr.f32.mxu1 %v2989_v5  ;;  %8119 = vmatprep.subr.mxu0 %v10334_v27  ;;  %v3001_v5 = vand.u32 4294901760, %v3000_v42 }
 0x1ec   : > { %8200 = vmatprep.subr.mxu1 %v10141_v14  ;;  %8120 = vmatpush3.msra.mxu0 %v10334_v27 }
 0x1ed   : > { %8201 = vmatpush3.msra.mxu1 %v10141_v14  ;;  %8121 = vmatprep.subr.mxu0 %v10349_v1 }
 0x1ee   : > { %8202 = vmatprep.subr.mxu1 %v10153_v34  ;;  %8122 = vmatpush3.msra.mxu0 %v10349_v1 }
 0x1ef   : > { %8203 = vmatpush3.msra.mxu1 %v10153_v34  ;;  %8123 = vmatprep.subr.mxu0 %v10361_v32 }
 0x1f0   : > { %8204 = vmatprep.subr.mxu1 %v10165_v48  ;;  %8124 = vmatpush3.msra.mxu0 %v10361_v32 }
 0x1f1   : > { %8205 = vmatpush3.msra.mxu1 %v10165_v48  ;;  %8126 = vmatmul.mubr.f32.vlgmr.msra.gmra.mxu0 %v3001_v5  ;;  %v6767_v5 = vld [vmem:[%s11864_s2 + $0x110] sm:$0xff] }
 0x1f2   : > { %8163 = vmatprep.subr.mxu0 %v10146_v29  ;;  %8206 = vmatprep.subr.mxu1 %v10180_v52 }
 0x1f3   : > { %8164 = vmatpush3.msra.mxu0 %v10146_v29  ;;  %8195 = vmatprep.mubr.f32.mxu0 %v10236_v41  ;;  %v6779_v29 = vld [vmem:[%s11864_s2 + $0x170] sm:$0xff] }
 0x1f4   : > { %8207 = vmatpush3.msra.mxu1 %v10180_v52  ;;  %8165 = vmatprep.subr.mxu0 %v10163_v28 }
 0x1f5   : > { %8208 = vmatprep.subr.mxu1 %v10195_v40  ;;  %8166 = vmatpush3.msra.mxu0 %v10163_v28  ;;  %v10539_v28 = vand.u32 4294901760, %v6779_v29 }
 0x1f6   : > { %8209 = vmatpush3.msra.mxu1 %v10195_v40  ;;  %8167 = vmatprep.subr.mxu0 %v10178_v51 }
 0x1f7   : > { %8210 = vmatprep.subr.mxu1 %v10214_v39  ;;  %8168 = vmatpush3.msra.mxu0 %v10178_v51 }
 0x1f8   : > { %8211 = vmatpush3.msra.mxu1 %v10214_v39  ;;  %8169 = vmatprep.subr.mxu0 %v10193_v53 }
 0x1f9   : > { %8212 = vmatprep.subr.mxu1 %v10228_v30  ;;  %8170 = vmatpush3.msra.mxu0 %v10193_v53 }
 0x1fa   : > { %8213 = vmatpush3.msra.mxu1 %v10228_v30  ;;  %8171 = vmatprep.subr.mxu0 %v10212_v12 }
 0x1fb   : > { %8214 = vmatprep.subr.mxu1 %v10253_v63  ;;  %8172 = vmatpush3.msra.mxu0 %v10212_v12 }
 0x1fc   : > { %8215 = vmatpush3.msra.mxu1 %v10253_v63  ;;  %8173 = vmatprep.subr.mxu0 %v10226_v20 }
 0x1fd   : > { %8216 = vmatprep.subr.mxu1 %v10270_v35  ;;  %8174 = vmatpush3.msra.mxu0 %v10226_v20 }
 0x1fe   : > { %8217 = vmatpush3.msra.mxu1 %v10270_v35  ;;  %8175 = vmatprep.subr.mxu0 %v10246_v57 }
 0x1ff   : > { %8218 = vmatprep.subr.mxu1 %v10286_v8  ;;  %8176 = vmatpush3.msra.mxu0 %v10246_v57 }
 0x200   : > { %8219 = vmatpush3.msra.mxu1 %v10286_v8  ;;  %8177 = vmatprep.subr.mxu0 %v10263_v16 }
 0x201   : > { %8220 = vmatprep.subr.mxu1 %v10304_v47  ;;  %8178 = vmatpush3.msra.mxu0 %v10263_v16 }
 0x202   : > { %8221 = vmatpush3.msra.mxu1 %v10304_v47  ;;  %8179 = vmatprep.subr.mxu0 %v10284_v2 }
 0x203   : > { %8222 = vmatprep.subr.mxu1 %v10319_v13  ;;  %8180 = vmatpush3.msra.mxu0 %v10284_v2 }
 0x204   : > { %8223 = vmatpush3.msra.mxu1 %v10319_v13  ;;  %8181 = vmatprep.subr.mxu0 %v10302_v54 }
 0x205   : > { %8224 = vmatprep.subr.mxu1 %v10334_v27  ;;  %8182 = vmatpush3.msra.mxu0 %v10302_v54  ;;  %v6772_v54 = vld [vmem:[%s11864_s2 + $0x138] sm:$0xff] }
 0x206   : > { %8225 = vmatpush3.msra.mxu1 %v10334_v27  ;;  %8183 = vmatprep.subr.mxu0 %v10317_v37 }
 0x207   : > { %8226 = vmatprep.subr.mxu1 %v10349_v1  ;;  %8184 = vmatpush3.msra.mxu0 %v10317_v37 }
 0x208   : > { %8227 = vmatpush3.msra.mxu1 %v10349_v1  ;;  %8185 = vmatprep.subr.mxu0 %v10332_v62 }
 0x209   : > { %8228 = vmatprep.subr.mxu1 %v10361_v32  ;;  %8186 = vmatpush3.msra.mxu0 %v10332_v62  ;;  %v6771_v62 = vld [vmem:[%s11864_s2 + $0x130] sm:$0xff] }
 0x20a   : > { %8229 = vmatpush3.msra.mxu1 %v10361_v32  ;;  %8187 = vmatprep.subr.mxu0 %v10347_v0 }
 0x20b   : > { %8231 = vmatmul.mubr.f32.vlgmr.msra.gmra.mxu1 %v2999_v15  ;;  %8268 = vmatprep.subr.mxu1 %v10127_v31 }
 0x20c   : > { %8188 = vmatpush3.msra.mxu0 %v10347_v0  ;;  %8269 = vmatpush3.msra.mxu1 %v10127_v31  ;;  %v6780_v31 = vld [vmem:[%s11864_s2 + $0x178] sm:$0xff] }
 0x20d   : > { %8300 = vmatprep.mubr.f32.mxu1 %v10201_v3  ;;  %8189 = vmatprep.subr.mxu0 %v10359_v44 }
 0x20e   : > { %8270 = vmatprep.subr.mxu1 %v10141_v14  ;;  %8190 = vmatpush3.msra.mxu0 %v10359_v44 }
 0x20f   : > { %8271 = vmatpush3.msra.mxu1 %v10141_v14  ;;  %8191 = vmatprep.subr.mxu0 %v10371_v59  ;;  %v10525_v14 = vand.u32 4294901760, %v6780_v31 }
 0x210   : > { %8272 = vmatprep.subr.mxu1 %v10153_v34  ;;  %8192 = vmatpush3.msra.mxu0 %v10371_v59  ;;  %v6770_v59 = vld [vmem:[%s11864_s2 + $0x128] sm:$0xff] }
 0x211   : > { %8273 = vmatpush3.msra.mxu1 %v10153_v34  ;;  %8193 = vmatprep.subr.mxu0 %v10381_v33  ;;  %v6778_v34 = vld [vmem:[%s11864_s2 + $0x168] sm:$0xff] }
 0x212   : > { %8274 = vmatprep.subr.mxu1 %v10165_v48  ;;  %8194 = vmatpush3.msra.mxu0 %v10381_v33  ;;  %v10551_v51 = vand.u32 4294901760, %v6778_v34 }
 0x213   : > { %8275 = vmatpush3.msra.mxu1 %v10165_v48  ;;  %8196 = vmatmul.mubr.f32.vlgmr.msra.gmra.mxu0 %v10412_v9  ;;  %v10544_v48 = vsub.f32 %v6780_v31, %v10525_v14  ;;  %v10702_v9 = vand.u32 4294901760, %v6769_v50 }
 0x214   : > { %8233 = vmatprep.subr.mxu0 %v10170_v45  ;;  %8276 = vmatprep.subr.mxu1 %v10180_v52 }
 0x215   : > { %8234 = vmatpush3.msra.mxu0 %v10170_v45  ;;  %8265 = vmatprep.mubr.f32.mxu0 %v10201_v3  ;;  %v6777_v45 = vld [vmem:[%s11864_s2 + $0x160] sm:$0xff] }
 0x216   : > { %8277 = vmatpush3.msra.mxu1 %v10180_v52  ;;  %8235 = vmatprep.subr.mxu0 %v10190_v56  ;;  %v6776_v52 = vld [vmem:[%s11864_s2 + $0x158] sm:$0xff]  ;;  %v10563_v53 = vand.u32 4294901760, %v6777_v45  ;;  %v3590_v3 = vld [vmem:[#allocation2 + $0x2] sm:$0xff] }
 0x217   : > { %8278 = vmatprep.subr.mxu1 %v10195_v40  ;;  %8236 = vmatpush3.msra.mxu0 %v10190_v56  ;;  %v10561_v56 = vsub.f32 %v6779_v29, %v10539_v28  ;;  %v10575_v12 = vand.u32 4294901760, %v6776_v52  ;;  %v10587_v20 = vand.u32 4294901760, %v3590_v3 }
 0x218   : > { %8279 = vmatpush3.msra.mxu1 %v10195_v40  ;;  %8237 = vmatprep.subr.mxu0 %v10209_v55  ;;  %v10568_v40 = vand.u32 4294901760, %v10544_v48  ;;  %v10593_v41 = vsub.f32 %v6777_v45, %v10563_v53 }
 0x219   : > { %8280 = vmatprep.subr.mxu1 %v10214_v39  ;;  %8238 = vmatpush3.msra.mxu0 %v10209_v55  ;;  %v10573_v55 = vsub.f32 %v6778_v34, %v10551_v51  ;;  %v10610_v16 = vsub.f32 %v6776_v52, %v10575_v12  ;;  %v10717_v34 = vand.u32 4294901760, %v6768_v21  ;;  %v6766_v52 = vld [vmem:[%s11864_s2 + $0x108] sm:$0xff] }
 0x21a   : > { %8281 = vmatpush3.msra.mxu1 %v10214_v39  ;;  %8239 = vmatprep.subr.mxu0 %v10223_v49  ;;  %v6775_v39 = vld [vmem:[%s11864_s2 + $0x150] sm:$0xff]  ;;  %v10621_v2 = vand.u32 4294901760, %v10593_v41 }
 0x21b   : > { %8282 = vmatprep.subr.mxu1 %v10228_v30  ;;  %8240 = vmatpush3.msra.mxu0 %v10223_v49  ;;  %v6774_v49 = vld [vmem:[%s11864_s2 + $0x148] sm:$0xff]  ;;  %v10599_v57 = vand.u32 4294901760, %v6775_v39 }
 0x21c   : > { %8283 = vmatpush3.msra.mxu1 %v10228_v30  ;;  %8241 = vmatprep.subr.mxu0 %v10243_v10  ;;  %v10590_v30 = vand.u32 4294901760, %v10561_v56  ;;  %v3735_v0 = vsub.f32 %v10593_v41, %v10621_v2 }
 0x21d   : > { %8284 = vmatprep.subr.mxu1 %v10253_v63  ;;  %8242 = vmatpush3.msra.mxu0 %v10243_v10  ;;  %v3714_v10 = vsub.f32 %v10544_v48, %v10568_v40 }
 0x21e   : > { %8285 = vmatpush3.msra.mxu1 %v10253_v63  ;;  %8243 = vmatprep.subr.mxu0 %v10260_v7  ;;  %v6773_v63 = vld [vmem:[%s11864_s2 + $0x140] sm:$0xff]  ;;  %v3736_v24 = vand.u32 4294901760, %v3735_v0 }
 0x21f   : > { %8286 = vmatprep.subr.mxu1 %v10270_v35  ;;  %8244 = vmatpush3.msra.mxu0 %v10260_v7  ;;  %v10607_v7 = vand.u32 4294901760, %v10573_v55 }
 0x220   : > { %8287 = vmatpush3.msra.mxu1 %v10270_v35  ;;  %8245 = vmatprep.subr.mxu0 %v10276_v17  ;;  %v10612_v35 = vand.u32 4294901760, %v6774_v49 }
 0x221   : > { %8288 = vmatprep.subr.mxu1 %v10286_v8  ;;  %8246 = vmatpush3.msra.mxu0 %v10276_v17  ;;  %v3721_v17 = vsub.f32 %v10561_v56, %v10590_v30  ;;  %v3728_v37 = vsub.f32 %v10573_v55, %v10607_v7 }
 0x222   : > { %8289 = vmatpush3.msra.mxu1 %v10286_v8  ;;  %8247 = vmatprep.subr.mxu0 %v10292_v23  ;;  %v10624_v8 = vsub.f32 %v3590_v3, %v10587_v20 }
 0x223   : > { %8290 = vmatprep.subr.mxu1 %v10304_v47  ;;  %8248 = vmatpush3.msra.mxu0 %v10292_v23  ;;  %v10626_v23 = vand.u32 4294901760, %v6773_v63  ;;  %v3729_v33 = vand.u32 4294901760, %v3728_v37 }
 0x224   : > { %8291 = vmatpush3.msra.mxu1 %v10304_v47  ;;  %8249 = vmatprep.subr.mxu0 %v10314_v36  ;;  %v3715_v47 = vand.u32 4294901760, %v3714_v10  ;;  %v10732_v10 = vand.u32 4294901760, %v6767_v5 }
 0x225   : > { %8292 = vmatprep.subr.mxu1 %v10319_v13  ;;  %8250 = vmatpush3.msra.mxu0 %v10314_v36  ;;  %v10634_v36 = vsub.f32 %v6775_v39, %v10599_v57  ;;  %v10659_v44 = vsub.f32 %v6773_v63, %v10626_v23  ;;  %v6765_v63 = vld [vmem:[%s11864_s2 + $0x100] sm:$0xff] }
 0x226   : > { %8293 = vmatpush3.msra.mxu1 %v10319_v13  ;;  %8251 = vmatprep.subr.mxu0 %v10329_v22  ;;  %v10641_v13 = vand.u32 4294901760, %v10610_v16  ;;  %v10757_v0 = vsub.f32 %v6767_v5, %v10732_v10 }
 0x227   : > { %8294 = vmatprep.subr.mxu1 %v10334_v27  ;;  %8252 = vmatpush3.msra.mxu0 %v10329_v22  ;;  %v10644_v22 = vsub.f32 %v6774_v49, %v10612_v35  ;;  %v10691_v18 = vand.u32 4294901760, %v10659_v44  ;;  %v10730_v49 = vsub.f32 %v6769_v50, %v10702_v9 }
 0x228   : > { %8295 = vmatpush3.msra.mxu1 %v10334_v27  ;;  %8253 = vmatprep.subr.mxu0 %v10344_v58  ;;  %v10651_v27 = vand.u32 4294901760, %v6772_v54  ;;  %v3742_v61 = vsub.f32 %v10610_v16, %v10641_v13 }
 0x229   : > { %8296 = vmatprep.subr.mxu1 %v10349_v1  ;;  %8254 = vmatpush3.msra.mxu0 %v10344_v58  ;;  %v3722_v58 = vand.u32 4294901760, %v3721_v17  ;;  %v10674_v43 = vand.u32 4294901760, %v10644_v22  ;;  %v3763_v45 = vsub.f32 %v10659_v44, %v10691_v18 }
 0x22a   : > { %8297 = vmatpush3.msra.mxu1 %v10349_v1  ;;  %8255 = vmatprep.subr.mxu0 %v10356_v38  ;;  %v3692_v1 = vand.u32 4294901760, %v10624_v8  ;;  %v10682_v6 = vsub.f32 %v6772_v54, %v10651_v27  ;;  %v3743_v15 = vand.u32 4294901760, %v3742_v61  ;;  %v10745_v54 = vsub.f32 %v6768_v21, %v10717_v34 }
 0x22b   : > { %8298 = vmatprep.subr.mxu1 %v10361_v32  ;;  %8256 = vmatpush3.msra.mxu0 %v10356_v38  ;;  %v10666_v38 = vand.u32 4294901760, %v10634_v36  ;;  %v3756_v42 = vsub.f32 %v10644_v22, %v10674_v43  ;;  %v3764_v37 = vand.u32 4294901760, %v3763_v45 }
 0x22c   : > { %8299 = vmatpush3.msra.mxu1 %v10361_v32  ;;  %8257 = vmatprep.subr.mxu0 %v10368_v25  ;;  %v10668_v32 = vand.u32 4294901760, %v6771_v62  ;;  %v3693_v4 = vsub.f32 %v10624_v8, %v3692_v1  ;;  %v10712_v31 = vand.u32 4294901760, %v10682_v6  ;;  %v10766_v50 = vand.u32 4294901760, %v10745_v54 }
 0x22d   : > { %8301 = vmatmul.mubr.f32.vlgmr.msra.gmra.mxu1 %v10405_v19  ;;  %8338 = vmatprep.subr.mxu1 %v3715_v47  ;;  %v3749_v26 = vsub.f32 %v10634_v36, %v10666_v38 }
 0x22e   : > { %8258 = vmatpush3.msra.mxu0 %v10368_v25  ;;  %8339 = vmatpush3.msra.mxu1 %v3715_v47  ;;  %v10684_v25 = vand.u32 4294901760, %v6770_v59  ;;  %v10747_v47 = vand.u32 4294901760, %v6766_v52  ;;  %v3798_v5 = vsub.f32 %v10745_v54, %v10766_v50 }
 0x22f   : > { %8370 = vmatprep.mubr.f32.mxu1 %v10587_v20  ;;  %8259 = vmatprep.subr.mxu0 %v10378_v11  ;;  %v3750_v3 = vand.u32 4294901760, %v3749_v26  ;;  %v10776_v26 = vand.u32 4294901760, %v10757_v0 }
 0x230   : > { %8340 = vmatprep.subr.mxu1 %v3722_v58  ;;  %8260 = vmatpush3.msra.mxu0 %v10378_v11  ;;  %v10700_v11 = vsub.f32 %v6771_v62, %v10668_v32  ;;  %v10715_v29 = vsub.f32 %v6770_v59, %v10684_v25  ;;  %v10759_v59 = vand.u32 4294901760, %v6765_v63 }
 0x231   : > { %8341 = vmatpush3.msra.mxu1 %v3722_v58  ;;  %8261 = vmatprep.subr.mxu0 %v10388_v60  ;;  %v10754_v58 = vand.u32 4294901760, %v10730_v49 }
 0x232   : > { %8342 = vmatprep.subr.mxu1 %v3729_v33  ;;  %8262 = vmatpush3.msra.mxu0 %v10388_v60  ;;  %v3694_v60 = vand.u32 4294901760, %v3693_v4  ;;  %v10727_v39 = vand.u32 4294901760, %v10700_v11  ;;  %v10742_v17 = vand.u32 4294901760, %v10715_v29 }
 0x233   : > { %8343 = vmatpush3.msra.mxu1 %v3729_v33  ;;  %8263 = vmatprep.subr.mxu0 %v10395_v46  ;;  %v3791_v21 = vsub.f32 %v10730_v49, %v10754_v58 }
 0x234   : > { %8344 = vmatprep.subr.mxu1 %v3736_v24  ;;  %8264 = vmatpush3.msra.mxu0 %v10395_v46  ;;  %v3757_v46 = vand.u32 4294901760, %v3756_v42  ;;  %v3777_v62 = vsub.f32 %v10700_v11, %v10727_v39  ;;  %v3784_v61 = vsub.f32 %v10715_v29, %v10742_v17 }
 0x235   : > { %8345 = vmatpush3.msra.mxu1 %v3736_v24  ;;  %8266 = vmatmul.mubr.f32.vlgmr.msra.gmra.mxu0 %v10405_v19  ;;  %v3770_v19 = vsub.f32 %v10682_v6, %v10712_v31  ;;  %v10769_v24 = vsub.f32 %v6766_v52, %v10747_v47  ;;  %v3792_v45 = vand.u32 4294901760, %v3791_v21  ;;  %v3805_v52 = vsub.f32 %v10757_v0, %v10776_v26 }
 0x236   : > { %8303 = vmatprep.subr.mxu0 %v10525_v14  ;;  %8346 = vmatprep.subr.mxu1 %v3743_v15  ;;  %v3778_v4 = vand.u32 4294901760, %v3777_v62  ;;  %v3785_v42 = vand.u32 4294901760, %v3784_v61 }
 0x237   : > { %8304 = vmatpush3.msra.mxu0 %v10525_v14  ;;  %8335 = vmatprep.mubr.f32.mxu0 %v3694_v60  ;;  %v3771_v33 = vand.u32 4294901760, %v3770_v19  ;;  %v10786_v60 = vand.u32 4294901760, %v10769_v24 }
 0x238   : > { %8347 = vmatpush3.msra.mxu1 %v3743_v15  ;;  %8305 = vmatprep.subr.mxu0 %v10539_v28  ;;  %v10779_v15 = vsub.f32 %v6765_v63, %v10759_v59  ;;  %v3799_v63 = vand.u32 4294901760, %v3798_v5 }
 0x239   : > { %8348 = vmatprep.subr.mxu1 %v3750_v3  ;;  %8306 = vmatpush3.msra.mxu0 %v10539_v28  ;;  %v3812_v19 = vsub.f32 %v10769_v24, %v10786_v60 }
 0x23a   : > { %8349 = vmatpush3.msra.mxu1 %v3750_v3  ;;  %8307 = vmatprep.subr.mxu0 %v10551_v51  ;;  %v10793_v3 = vand.u32 4294901760, %v10779_v15 }
 0x23b   : > { %8350 = vmatprep.subr.mxu1 %v3757_v46  ;;  %8308 = vmatpush3.msra.mxu0 %v10551_v51  ;;  %v3813_v61 = vand.u32 4294901760, %v3812_v19 }
 0x23c   : > { %8351 = vmatpush3.msra.mxu1 %v3757_v46  ;;  %8309 = vmatprep.subr.mxu0 %v10563_v53  ;;  %v3591_v46 = vld [vmem:[#allocation2 + $0xa] sm:$0xff]  ;;  %v3819_v62 = vsub.f32 %v10779_v15, %v10793_v3 }
 0x23d   : > { %8352 = vmatprep.subr.mxu1 %v3764_v37  ;;  %8310 = vmatpush3.msra.mxu0 %v10563_v53 }
 0x23e   : > { %8353 = vmatpush3.msra.mxu1 %v3764_v37  ;;  %8311 = vmatprep.subr.mxu0 %v10575_v12  ;;  %v3806_v37 = vand.u32 4294901760, %v3805_v52  ;;  %v4311_v52 = vld [vmem:[%s11867_s5 + $0x28] sm:$0xff] }
 0x23f   : > { %8354 = vmatprep.subr.mxu1 %v3771_v33  ;;  %8312 = vmatpush3.msra.mxu0 %v10575_v12 }
 0x240   : > { %8355 = vmatpush3.msra.mxu1 %v3771_v33  ;;  %8313 = vmatprep.subr.mxu0 %v10599_v57  ;;  %v10803_v33 = vand.u32 4294901760, %v3591_v46 }
 0x241   : > { %8356 = vmatprep.subr.mxu1 %v3778_v4  ;;  %8314 = vmatpush3.msra.mxu0 %v10599_v57 }
 0x242   : > { %8357 = vmatpush3.msra.mxu1 %v3778_v4  ;;  %8315 = vmatprep.subr.mxu0 %v10612_v35  ;;  %v3820_v4 = vand.u32 4294901760, %v3819_v62  ;;  %v10810_v21 = vsub.f32 %v3591_v46, %v10803_v33  ;;  %v4310_v62 = vld [vmem:[%s11867_s5 + $0x20] sm:$0xff] }
 0x243   : > { %8358 = vmatprep.subr.mxu1 %v3785_v42  ;;  %8316 = vmatpush3.msra.mxu0 %v10612_v35 }
 0x244   : > { %8359 = vmatpush3.msra.mxu1 %v3785_v42  ;;  %8317 = vmatprep.subr.mxu0 %v10626_v23  ;;  %v3702_v42 = vand.u32 4294901760, %v10810_v21 }
 0x245   : > { %8360 = vmatprep.subr.mxu1 %v3792_v45  ;;  %8318 = vmatpush3.msra.mxu0 %v10626_v23 }
 0x246   : > { %8361 = vmatpush3.msra.mxu1 %v3792_v45  ;;  %8319 = vmatprep.subr.mxu0 %v10651_v27  ;;  %v3703_v5 = vsub.f32 %v10810_v21, %v3702_v42 }
 0x247   : > { %8362 = vmatprep.subr.mxu1 %v3799_v63  ;;  %8320 = vmatpush3.msra.mxu0 %v10651_v27 }
 0x248   : > { %8363 = vmatpush3.msra.mxu1 %v3799_v63  ;;  %8321 = vmatprep.subr.mxu0 %v10668_v32 }
 0x249   : > { %8364 = vmatprep.subr.mxu1 %v3806_v37  ;;  %8322 = vmatpush3.msra.mxu0 %v10668_v32 }
 0x24a   : > { %8365 = vmatpush3.msra.mxu1 %v3806_v37  ;;  %8323 = vmatprep.subr.mxu0 %v10684_v25  ;;  %v11112_v37 = vand.u32 4294901760, %v4311_v52 }
 0x24b   : > { %8366 = vmatprep.subr.mxu1 %v3813_v61  ;;  %8324 = vmatpush3.msra.mxu0 %v10684_v25 }
 0x24c   : > { %8367 = vmatpush3.msra.mxu1 %v3813_v61  ;;  %8325 = vmatprep.subr.mxu0 %v10702_v9 }
 0x24d   : > { %8368 = vmatprep.subr.mxu1 %v3820_v4  ;;  %8326 = vmatpush3.msra.mxu0 %v10702_v9 }
 0x24e   : > { %8369 = vmatpush3.msra.mxu1 %v3820_v4  ;;  %8327 = vmatprep.subr.mxu0 %v10717_v34 }
 0x24f   : > { %8371 = vmatmul.mubr.f32.vlgmr.msra.gmra.mxu1 %v10803_v33  ;;  %8408 = vmatprep.subr.mxu1 %v10525_v14 }
 0x250   : > { %8328 = vmatpush3.msra.mxu0 %v10717_v34  ;;  %8409 = vmatpush3.msra.mxu1 %v10525_v14 }
 0x251   : > { %8440 = vmatprep.mubr.f32.mxu1 %v3692_v1  ;;  %8329 = vmatprep.subr.mxu0 %v10732_v10  ;;  %v3704_v1 = vand.u32 4294901760, %v3703_v5  ;;  %v4309_v5 = vld [vmem:[%s11867_s5 + $0x18] sm:$0xff] }
 0x252   : > { %8410 = vmatprep.subr.mxu1 %v10539_v28  ;;  %8330 = vmatpush3.msra.mxu0 %v10732_v10 }
 0x253   : > { %8411 = vmatpush3.msra.mxu1 %v10539_v28  ;;  %8331 = vmatprep.subr.mxu0 %v10747_v47 }
 0x254   : > { %8412 = vmatprep.subr.mxu1 %v10551_v51  ;;  %8332 = vmatpush3.msra.mxu0 %v10747_v47 }
 0x255   : > { %8413 = vmatpush3.msra.mxu1 %v10551_v51  ;;  %8333 = vmatprep.subr.mxu0 %v10759_v59 }
 0x256   : > { %8414 = vmatprep.subr.mxu1 %v10563_v53  ;;  %8334 = vmatpush3.msra.mxu0 %v10759_v59 }
 0x257   : > { %8415 = vmatpush3.msra.mxu1 %v10563_v53  ;;  %8336 = vmatmul.mubr.f32.vlgmr.msra.gmra.mxu0 %v3704_v1 }
 0x258   : > { %8373 = vmatprep.subr.mxu0 %v10544_v48  ;;  %8416 = vmatprep.subr.mxu1 %v10575_v12 }
 0x259   : > { %8374 = vmatpush3.msra.mxu0 %v10544_v48  ;;  %8405 = vmatprep.mubr.f32.mxu0 %v10624_v8  ;;  %v4319_v48 = vld [vmem:[%s11867_s5 + $0x68] sm:$0xff] }
 0x25a   : > { %8417 = vmatpush3.msra.mxu1 %v10575_v12  ;;  %8375 = vmatprep.subr.mxu0 %v10561_v56 }
 0x25b   : > { %8418 = vmatprep.subr.mxu1 %v10599_v57  ;;  %8376 = vmatpush3.msra.mxu0 %v10561_v56 }
 0x25c   : > { %8419 = vmatpush3.msra.mxu1 %v10599_v57  ;;  %8377 = vmatprep.subr.mxu0 %v10573_v55 }
 0x25d   : > { %8420 = vmatprep.subr.mxu1 %v10612_v35  ;;  %8378 = vmatpush3.msra.mxu0 %v10573_v55  ;;  %v4317_v55 = vld [vmem:[%s11867_s5 + $0x58] sm:$0xff] }
 0x25e   : > { %8421 = vmatpush3.msra.mxu1 %v10612_v35  ;;  %8379 = vmatprep.subr.mxu0 %v10593_v41 }
 0x25f   : > { %8422 = vmatprep.subr.mxu1 %v10626_v23  ;;  %8380 = vmatpush3.msra.mxu0 %v10593_v41 }
 0x260   : > { %8423 = vmatpush3.msra.mxu1 %v10626_v23  ;;  %8381 = vmatprep.subr.mxu0 %v10610_v16 }
 0x261   : > { %8424 = vmatprep.subr.mxu1 %v10651_v27  ;;  %8382 = vmatpush3.msra.mxu0 %v10610_v16 }
 0x262   : > { %8425 = vmatpush3.msra.mxu1 %v10651_v27  ;;  %8383 = vmatprep.subr.mxu0 %v10634_v36 }
 0x263   : > { %8426 = vmatprep.subr.mxu1 %v10668_v32  ;;  %8384 = vmatpush3.msra.mxu0 %v10634_v36 }
 0x264   : > { %8427 = vmatpush3.msra.mxu1 %v10668_v32  ;;  %8385 = vmatprep.subr.mxu0 %v10644_v22 }
 0x265   : > { %8428 = vmatprep.subr.mxu1 %v10684_v25  ;;  %8386 = vmatpush3.msra.mxu0 %v10644_v22 }
 0x266   : > { %8429 = vmatpush3.msra.mxu1 %v10684_v25  ;;  %8387 = vmatprep.subr.mxu0 %v10659_v44 }
 0x267   : > { %8430 = vmatprep.subr.mxu1 %v10702_v9  ;;  %8388 = vmatpush3.msra.mxu0 %v10659_v44 }
 0x268   : > { %8431 = vmatpush3.msra.mxu1 %v10702_v9  ;;  %8389 = vmatprep.subr.mxu0 %v10682_v6 }
 0x269   : > { %8432 = vmatprep.subr.mxu1 %v10717_v34  ;;  %8390 = vmatpush3.msra.mxu0 %v10682_v6 }
 0x26a   : > { %8433 = vmatpush3.msra.mxu1 %v10717_v34  ;;  %8391 = vmatprep.subr.mxu0 %v10700_v11 }
 0x26b   : > { %8434 = vmatprep.subr.mxu1 %v10732_v10  ;;  %8392 = vmatpush3.msra.mxu0 %v10700_v11 }
 0x26c   : > { %8435 = vmatpush3.msra.mxu1 %v10732_v10  ;;  %8393 = vmatprep.subr.mxu0 %v10715_v29 }
 0x26d   : > { %8436 = vmatprep.subr.mxu1 %v10747_v47  ;;  %8394 = vmatpush3.msra.mxu0 %v10715_v29 }
 0x26e   : > { %8437 = vmatpush3.msra.mxu1 %v10747_v47  ;;  %8395 = vmatprep.subr.mxu0 %v10730_v49 }
 0x26f   : > { %8438 = vmatprep.subr.mxu1 %v10759_v59  ;;  %8396 = vmatpush3.msra.mxu0 %v10730_v49 }
 0x270   : > { %8439 = vmatpush3.msra.mxu1 %v10759_v59  ;;  %8397 = vmatprep.subr.mxu0 %v10745_v54 }
 0x271   : > { %8441 = vmatmul.mubr.f32.vlgmr.msra.gmra.mxu1 %v3702_v42  ;;  %8478 = vmatprep.subr.mxu1 %v10525_v14  ;;  %v11126_v42 = vand.u32 4294901760, %v4310_v62 }
 0x272   : > { %8398 = vmatpush3.msra.mxu0 %v10745_v54  ;;  %8479 = vmatpush3.msra.mxu1 %v10525_v14  ;;  %v4321_v14 = vld [vmem:[%s11867_s5 + $0x78] sm:$0xff] }
 0x273   : > { %8510 = vmatprep.mubr.f32.mxu1 %v10587_v20  ;;  %8399 = vmatprep.subr.mxu0 %v10757_v0 }
 0x274   : > { %8480 = vmatprep.subr.mxu1 %v10539_v28  ;;  %8400 = vmatpush3.msra.mxu0 %v10757_v0 }
 0x275   : > { %8481 = vmatpush3.msra.mxu1 %v10539_v28  ;;  %8401 = vmatprep.subr.mxu0 %v10769_v24  ;;  %v4320_v28 = vld [vmem:[%s11867_s5 + $0x70] sm:$0xff] }
 0x276   : > { %8482 = vmatprep.subr.mxu1 %v10551_v51  ;;  %8402 = vmatpush3.msra.mxu0 %v10769_v24  ;;  %v10978_v56 = vand.u32 4294901760, %v4320_v28  ;;  %v4312_v24 = vld [vmem:[%s11867_s5 + $0x30] sm:$0xff] }
 0x277   : > { %8483 = vmatpush3.msra.mxu1 %v10551_v51  ;;  %8403 = vmatprep.subr.mxu0 %v10779_v15  ;;  %v10976_v51 = vand.u32 4294901760, %v4321_v14  ;;  %v11096_v45 = vand.u32 4294901760, %v4312_v24 }
 0x278   : > { %8484 = vmatprep.subr.mxu1 %v10563_v53  ;;  %8404 = vmatpush3.msra.mxu0 %v10779_v15 }
 0x279   : > { %8485 = vmatpush3.msra.mxu1 %v10563_v53  ;;  %8406 = vmatmul.mubr.f32.vlgmr.msra.gmra.mxu0 %v10810_v21  ;;  %v10980_v53 = vand.u32 4294901760, %v4319_v48  ;;  %v11109_v19 = vsub.f32 %v4312_v24, %v11096_v45  ;;  %v11124_v21 = vsub.f32 %v4311_v52, %v11112_v37 }
 0x27a   : > { %8443 = vmatprep.subr.mxu0 %v10568_v40  ;;  %8486 = vmatprep.subr.mxu1 %v10575_v12 }
 0x27b   : > { %8444 = vmatpush3.msra.mxu0 %v10568_v40  ;;  %8475 = vmatprep.mubr.f32.mxu0 %v10587_v20  ;;  %v4318_v40 = vld [vmem:[%s11867_s5 + $0x60] sm:$0xff]  ;;  %v11004_v16 = vsub.f32 %v4319_v48, %v10980_v53  ;;  %v11121_v4 = vand.u32 4294901760, %v11109_v19  ;;  %v11139_v48 = vsub.f32 %v4310_v62, %v11126_v42 }
 0x27c   : > { %8487 = vmatpush3.msra.mxu1 %v10575_v12  ;;  %8445 = vmatprep.subr.mxu0 %v10590_v30  ;;  %v4316_v12 = vld [vmem:[%s11867_s5 + $0x50] sm:$0xff]  ;;  %v10991_v20 = vand.u32 4294901760, %v4318_v40 }
 0x27d   : > { %8488 = vmatprep.subr.mxu1 %v10599_v57  ;;  %8446 = vmatpush3.msra.mxu0 %v10590_v30  ;;  %v10993_v30 = vand.u32 4294901760, %v4317_v55  ;;  %v10995_v41 = vand.u32 4294901760, %v4316_v12  ;;  %v11021_v36 = vand.u32 4294901760, %v11004_v16  ;;  %12028 = vst [vmem:[#allocation27_spill] sm:$0xff] %v11121_v4 }
 0x27e   : > { %8489 = vmatpush3.msra.mxu1 %v10599_v57  ;;  %8447 = vmatprep.subr.mxu0 %v10607_v7  ;;  %v10998_v57 = vsub.f32 %v4321_v14, %v10976_v51  ;;  %v4490_v14 = vsub.f32 %v11109_v19, %v11121_v4 }
 0x27f   : > { %8490 = vmatprep.subr.mxu1 %v10612_v35  ;;  %8448 = vmatpush3.msra.mxu0 %v10607_v7  ;;  %v11001_v7 = vsub.f32 %v4320_v28, %v10978_v56  ;;  %12021 = vst [vmem:[#allocation14_spill] sm:$0xff] %v11021_v36  ;;  %v11136_v28 = vand.u32 4294901760, %v11124_v21 }
 0x280   : > { %8491 = vmatpush3.msra.mxu1 %v10612_v35  ;;  %8449 = vmatprep.subr.mxu0 %v10621_v2  ;;  %v11008_v35 = vsub.f32 %v4318_v40, %v10991_v20  ;;  %v11015_v8 = vand.u32 4294901760, %v10998_v57  ;;  %v11141_v40 = vand.u32 4294901760, %v4309_v5 }
 0x281   : > { %8492 = vmatprep.subr.mxu1 %v10626_v23  ;;  %8450 = vmatpush3.msra.mxu0 %v10621_v2  ;;  %v11011_v2 = vsub.f32 %v4317_v55, %v10993_v30  ;;  %12029 = vst [vmem:[#allocation3_spill] sm:$0xff] %v11136_v28  ;;  %v4308_v55 = vld [vmem:[%s11867_s5 + $0x10] sm:$0xff] }
 0x282   : > { %8493 = vmatpush3.msra.mxu1 %v10626_v23  ;;  %8451 = vmatprep.subr.mxu0 %v10641_v13  ;;  %12019 = vst [vmem:[#allocation12_spill] sm:$0xff] %v11015_v8  ;;  %v11018_v23 = vand.u32 4294901760, %v11001_v7  ;;  %v11028_v22 = vand.u32 4294901760, %v11008_v35 }
 0x283   : > { %8494 = vmatprep.subr.mxu1 %v10651_v27  ;;  %8452 = vmatpush3.msra.mxu0 %v10641_v13  ;;  %v11025_v13 = vsub.f32 %v4316_v12, %v10995_v41  ;;  %v4491_v12 = vand.u32 4294901760, %v4490_v14 }
 0x284   : > { %8495 = vmatpush3.msra.mxu1 %v10651_v27  ;;  %8453 = vmatprep.subr.mxu0 %v10666_v38  ;;  %12020 = vst [vmem:[#allocation18_spill] sm:$0xff] %v11018_v23  ;;  %12022 = vst [vmem:[#allocation21_spill] sm:$0xff] %v11028_v22  ;;  %v4427_v27 = vsub.f32 %v10998_v57, %v11015_v8  ;;  %v4434_v44 = vsub.f32 %v11001_v7, %v11018_v23 }
 0x285   : > { %8496 = vmatprep.subr.mxu1 %v10668_v32  ;;  %8454 = vmatpush3.msra.mxu0 %v10666_v38  ;;  %v4441_v38 = vsub.f32 %v11004_v16, %v11021_v36 }
 0x286   : > { %8497 = vmatpush3.msra.mxu1 %v10668_v32  ;;  %8455 = vmatprep.subr.mxu0 %v10674_v43  ;;  %v11038_v32 = vand.u32 4294901760, %v11011_v2  ;;  %v4435_v6 = vand.u32 4294901760, %v4434_v44  ;;  %v4497_v44 = vsub.f32 %v11124_v21, %v11136_v28 }
 0x287   : > { %8498 = vmatprep.subr.mxu1 %v10684_v25  ;;  %8456 = vmatpush3.msra.mxu0 %v10674_v43  ;;  %v4428_v43 = vand.u32 4294901760, %v4427_v27  ;;  %v4442_v11 = vand.u32 4294901760, %v4441_v38  ;;  %v11147_v27 = vand.u32 4294901760, %v4308_v55  ;;  %v11153_v38 = vand.u32 4294901760, %v11139_v48 }
 0x288   : > { %8499 = vmatpush3.msra.mxu1 %v10684_v25  ;;  %8457 = vmatprep.subr.mxu0 %v10691_v18  ;;  %12023 = vst [vmem:[#allocation16_spill] sm:$0xff] %v11038_v32  ;;  %v4448_v25 = vsub.f32 %v11008_v35, %v11028_v22 }
 0x289   : > { %8500 = vmatprep.subr.mxu1 %v10702_v9  ;;  %8458 = vmatpush3.msra.mxu0 %v10691_v18  ;;  %v11045_v18 = vand.u32 4294901760, %v11025_v13  ;;  %12030 = vst [vmem:[#allocation4_spill] sm:$0xff] %v11153_v38 }
 0x28a   : > { %8501 = vmatpush3.msra.mxu1 %v10702_v9  ;;  %8459 = vmatprep.subr.mxu0 %v10712_v31  ;;  %v4455_v9 = vsub.f32 %v11011_v2, %v11038_v32 }
 0x28b   : > { %8502 = vmatprep.subr.mxu1 %v10717_v34  ;;  %8460 = vmatpush3.msra.mxu0 %v10712_v31  ;;  %12024 = vst [vmem:[#allocation25_spill] sm:$0xff] %v11045_v18  ;;  %v4449_v31 = vand.u32 4294901760, %v4448_v25  ;;  %v4462_v29 = vsub.f32 %v11025_v13, %v11045_v18  ;;  %v11163_v25 = vsub.f32 %v4308_v55, %v11147_v27  ;;  %v7917_v55 = vpop.f32.mrf.mxu0 }
 0x28c   : > { %8503 = vmatpush3.msra.mxu1 %v10717_v34  ;;  %8461 = vmatprep.subr.mxu0 %v10727_v39  ;;  %v4315_v34 = vld [vmem:[%s11867_s5 + $0x48] sm:$0xff]  ;;  %v4456_v49 = vand.u32 4294901760, %v4455_v9  ;;  %v4498_v9 = vand.u32 4294901760, %v4497_v44 }
 0x28d   : > { %8504 = vmatprep.subr.mxu1 %v10732_v10  ;;  %8462 = vmatpush3.msra.mxu0 %v10727_v39  ;;  %v11059_v39 = vand.u32 4294901760, %v4315_v34  ;;  %12032 = vst [vmem:[#allocation6_spill] sm:$0xff] %v11163_v25  ;;  %v2309_v44 = vpop.f32.mrf.mxu0 }
 0x28e   : > { %8505 = vmatpush3.msra.mxu1 %v10732_v10  ;;  %8463 = vmatprep.subr.mxu0 %v10742_v17  ;;  %v4314_v10 = vld [vmem:[%s11867_s5 + $0x40] sm:$0xff] }
 0x28f   : > { %8506 = vmatprep.subr.mxu1 %v10747_v47  ;;  %8464 = vmatpush3.msra.mxu0 %v10742_v17  ;;  %v11066_v17 = vsub.f32 %v4315_v34, %v11059_v39  ;;  %v11068_v54 = vand.u32 4294901760, %v4314_v10  ;;  %v4306_v34 = vld [vmem:[%s11867_s5] sm:$0xff] }
 0x290   : > { %8507 = vmatpush3.msra.mxu1 %v10747_v47  ;;  %8465 = vmatprep.subr.mxu0 %v10754_v58  ;;  %v4463_v47 = vand.u32 4294901760, %v4462_v29 }
 0x291   : > { %8508 = vmatprep.subr.mxu1 %v10759_v59  ;;  %8466 = vmatpush3.msra.mxu0 %v10754_v58  ;;  %v4313_v58 = vld [vmem:[%s11867_s5 + $0x38] sm:$0xff]  ;;  %v11076_v0 = vand.u32 4294901760, %v11066_v17 }
 0x292   : > { %8509 = vmatpush3.msra.mxu1 %v10759_v59  ;;  %8467 = vmatprep.subr.mxu0 %v10766_v50  ;;  %v11079_v59 = vsub.f32 %v4314_v10, %v11068_v54 }
 0x293   : > { %8511 = vmatmul.mubr.f32.vlgmr.msra.gmra.mxu1 %v10803_v33  ;;  %8468 = vmatpush3.msra.mxu0 %v10766_v50  ;;  %12025 = vst [vmem:[#allocation19_spill] sm:$0xff] %v11076_v0  ;;  %v11081_v50 = vand.u32 4294901760, %v4313_v58 }
 0x294   : > { %8469 = vmatprep.subr.mxu0 %v10776_v26  ;;  %8548 = vmatprep.subr.mxu1 %v4428_v43  ;;  %v11091_v15 = vand.u32 4294901760, %v11079_v59 }
 0x295   : > { %8470 = vmatpush3.msra.mxu0 %v10776_v26  ;;  %8549 = vmatpush3.msra.mxu1 %v4428_v43  ;;  %v4469_v26 = vsub.f32 %v11066_v17, %v11076_v0  ;;  %v11156_v43 = vsub.f32 %v4309_v5, %v11141_v40 }
 0x296   : > { %8471 = vmatprep.subr.mxu0 %v10786_v60  ;;  %8550 = vmatprep.subr.mxu1 %v4435_v6  ;;  %12026 = vst [vmem:[#allocation20_spill] sm:$0xff] %v11091_v15  ;;  %v4476_v46 = vsub.f32 %v11079_v59, %v11091_v15 }
 0x297   : > { %8472 = vmatpush3.msra.mxu0 %v10786_v60  ;;  %8551 = vmatpush3.msra.mxu1 %v4435_v6  ;;  %v11094_v60 = vsub.f32 %v4313_v58, %v11081_v50  ;;  %12031 = vst [vmem:[#allocation5_spill] sm:$0xff] %v11156_v43  ;;  %v4307_v6 = vld [vmem:[%s11867_s5 + $0x8] sm:$0xff]  ;;  %v11171_v29 = vand.u32 4294901760, %v11156_v43 }
 0x298   : > { %8473 = vmatprep.subr.mxu0 %v10793_v3  ;;  %8552 = vmatprep.subr.mxu1 %v4442_v11 }
 0x299   : > { %8474 = vmatpush3.msra.mxu0 %v10793_v3  ;;  %8553 = vmatpush3.msra.mxu1 %v4442_v11  ;;  %v4470_v3 = vand.u32 4294901760, %v4469_v26  ;;  %v11106_v63 = vand.u32 4294901760, %v11094_v60  ;;  %v11165_v11 = vand.u32 4294901760, %v4307_v6  ;;  %12033 = vst [vmem:[#allocation7_spill] sm:$0xff] %v11171_v29  ;;  %v4511_v24 = vsub.f32 %v11156_v43, %v11171_v29 }
 0x29a   : > { %8476 = vmatmul.mubr.f32.vlgmr.msra.gmra.mxu0 %v10803_v33  ;;  %8513 = vmatprep.subr.mxu0 %v10976_v51  ;;  %v4477_v33 = vand.u32 4294901760, %v4476_v46 }
 0x29b   : > { %8514 = vmatpush3.msra.mxu0 %v10976_v51  ;;  %8554 = vmatprep.subr.mxu1 %v4449_v31  ;;  %12027 = vst [vmem:[#allocation24_spill] sm:$0xff] %v11106_v63  ;;  %v4483_v61 = vsub.f32 %v11094_v60, %v11106_v63  ;;  %v11181_v10 = vsub.f32 %v4307_v6, %v11165_v11  ;;  %v4512_v46 = vand.u32 4294901760, %v4511_v24  ;;  %v7987_v6 = vpop.f32.mrf.mxu0 }
 0x29c   : > { %8515 = vmatprep.subr.mxu0 %v10978_v56  ;;  %8555 = vmatpush3.msra.mxu1 %v4449_v31  ;;  %v4504_v31 = vsub.f32 %v11139_v48, %v11153_v38 }
 0x29d   : > { %8516 = vmatpush3.msra.mxu0 %v10978_v56  ;;  %8556 = vmatprep.subr.mxu1 %v4456_v49  ;;  %v4484_v1 = vand.u32 4294901760, %v4483_v61  ;;  %12035 = vst [vmem:[#allocation9_spill] sm:$0xff] %v11181_v10  ;;  %v11192_v52 = vand.u32 4294901760, %v11181_v10 }
 0x29e   : > { %8517 = vmatprep.subr.mxu0 %v10980_v53  ;;  %8557 = vmatpush3.msra.mxu1 %v4456_v49  ;;  %v11178_v49 = vand.u32 4294901760, %v11163_v25  ;;  %v4505_v58 = vand.u32 4294901760, %v4504_v31 }
 0x29f   : > { %8518 = vmatpush3.msra.mxu0 %v10980_v53  ;;  %8558 = vmatprep.subr.mxu1 %v4463_v47  ;;  %12036 = vst [vmem:[#allocation10_spill] sm:$0xff] %v11192_v52 }
 0x2a0   : > { %8519 = vmatprep.subr.mxu0 %v10991_v20  ;;  %8559 = vmatpush3.msra.mxu1 %v4463_v47  ;;  %12034 = vst [vmem:[#allocation8_spill] sm:$0xff] %v11178_v49  ;;  %v11183_v47 = vand.u32 4294901760, %v4306_v34  ;;  %v4518_v26 = vsub.f32 %v11163_v25, %v11178_v49 }
 0x2a1   : > { %8520 = vmatpush3.msra.mxu0 %v10991_v20  ;;  %8560 = vmatprep.subr.mxu1 %v4470_v3 }
 0x2a2   : > { %8521 = vmatprep.subr.mxu0 %v10993_v30  ;;  %8561 = vmatpush3.msra.mxu1 %v4470_v3  ;;  %v11195_v3 = vsub.f32 %v4306_v34, %v11183_v47  ;;  %v4519_v62 = vand.u32 4294901760, %v4518_v26  ;;  %v2580_v34 = vpop.f32.mrf.mxu0 }
 0x2a3   : > { %8522 = vmatpush3.msra.mxu0 %v10993_v30  ;;  %8562 = vmatprep.subr.mxu1 %v4477_v33 }
 0x2a4   : > { %8523 = vmatprep.subr.mxu0 %v10995_v41  ;;  %8563 = vmatpush3.msra.mxu1 %v4477_v33  ;;  %12037 = vst [vmem:[#allocation11_spill] sm:$0xff] %v11195_v3  ;;  %v4525_v33 = vsub.f32 %v11181_v10, %v11192_v52  ;;  %v11202_v61 = vand.u32 4294901760, %v11195_v3 }
 0x2a5   : > { %8524 = vmatpush3.msra.mxu0 %v10995_v41  ;;  %8564 = vmatprep.subr.mxu1 %v4484_v1 }
 0x2a6   : > { %8525 = vmatprep.subr.mxu0 %v11059_v39  ;;  %8565 = vmatpush3.msra.mxu1 %v4484_v1  ;;  %12038 = vst [vmem:[#allocation13_spill] sm:$0xff] %v11202_v61  ;;  %v4526_v5 = vand.u32 4294901760, %v4525_v33  ;;  %v4532_v1 = vsub.f32 %v11195_v3, %v11202_v61 }
 0x2a7   : > { %8526 = vmatpush3.msra.mxu0 %v11059_v39  ;;  %8566 = vmatprep.subr.mxu1 %v4491_v12 }
 0x2a8   : > { %8527 = vmatprep.subr.mxu0 %v11068_v54  ;;  %8567 = vmatpush3.msra.mxu1 %v4491_v12  ;;  %v4533_v14 = vand.u32 4294901760, %v4532_v1  ;;  %v7952_v12 = vpop.f32.mrf.mxu1 }
 0x2a9   : > { %8528 = vmatpush3.msra.mxu0 %v11068_v54  ;;  %8568 = vmatprep.subr.mxu1 %v4498_v9  ;;  %v2477_v52 = vadd.f32 %v7952_v12, %v7917_v55 }
 0x2aa   : > { %8529 = vmatprep.subr.mxu0 %v11081_v50  ;;  %8569 = vmatpush3.msra.mxu1 %v4498_v9  ;;  %v2470_v9 = vpop.f32.mrf.mxu1 }
 0x2ab   : > { %8530 = vmatpush3.msra.mxu0 %v11081_v50  ;;  %8570 = vmatprep.subr.mxu1 %v4505_v58  ;;  %v2471_v49 = vadd.f32 %v2470_v9, %v2309_v44  ;;  %v2588_v29 = vadd.f32 %v7987_v6, %v2477_v52 }
 0x2ac   : > { %8531 = vmatprep.subr.mxu0 %v11096_v45  ;;  %8571 = vmatpush3.msra.mxu1 %v4505_v58  ;;  %v8022_v31 = vpop.f32.mrf.mxu1  ;;  %v8057_v58 = vpop.f32.mrf.mxu0 }
 0x2ad   : > { %8532 = vmatpush3.msra.mxu0 %v11096_v45  ;;  %8572 = vmatprep.subr.mxu1 %v4512_v46  ;;  %v2581_v4 = vadd.f32 %v2580_v34, %v2471_v49  ;;  %v2685_v15 = vadd.f32 %v8022_v31, %v2588_v29 }
 0x2ae   : > { %8533 = vmatprep.subr.mxu0 %v11112_v37  ;;  %8573 = vmatpush3.msra.mxu1 %v4512_v46  ;;  %v2676_v24 = vpop.f32.mrf.mxu1  ;;  %v2803_v46 = vpop.f32.mrf.mxu0 }
 0x2af   : > { %8534 = vmatpush3.msra.mxu0 %v11112_v37  ;;  %8574 = vmatprep.subr.mxu1 %v4519_v62  ;;  %v2810_v18 = vadd.f32 %v8057_v58, %v2685_v15  ;;  %v2677_v32 = vadd.f32 %v2676_v24, %v2581_v4 }
 0x2b0   : > { %8535 = vmatprep.subr.mxu0 %v11126_v42  ;;  %8575 = vmatpush3.msra.mxu1 %v4519_v62  ;;  %v8092_v26 = vpop.f32.mrf.mxu1 }
 0x2b1   : > { %8536 = vmatpush3.msra.mxu0 %v11126_v42  ;;  %8576 = vmatprep.subr.mxu1 %v4526_v5  ;;  %v8127_v33 = vpop.f32.mrf.mxu0  ;;  %v2804_v23 = vadd.f32 %v2803_v46, %v2677_v32  ;;  %v2903_v3 = vadd.f32 %v8092_v26, %v2810_v18 }
 0x2b2   : > { %8537 = vmatprep.subr.mxu0 %v11141_v40  ;;  %8577 = vmatpush3.msra.mxu1 %v4526_v5  ;;  %v2896_v62 = vpop.f32.mrf.mxu1 }
 0x2b3   : > { %8538 = vmatpush3.msra.mxu0 %v11141_v40  ;;  %8578 = vmatprep.subr.mxu1 %v4533_v14  ;;  %v2993_v61 = vpop.f32.mrf.mxu0  ;;  %v3004_v25 = vadd.f32 %v8127_v33, %v2903_v3  ;;  %v2897_v43 = vadd.f32 %v2896_v62, %v2804_v23 }
 0x2b4   : > { %8539 = vmatprep.subr.mxu0 %v11147_v27  ;;  %8579 = vmatpush3.msra.mxu1 %v4533_v14  ;;  %v8162_v1 = vpop.f32.mrf.mxu1 }
 0x2b5   : > { %8540 = vmatpush3.msra.mxu0 %v11147_v27  ;;  %8618 = vmatprep.subr.mxu1 %v10976_v51  ;;  %v2994_v44 = vadd.f32 %v2993_v61, %v2897_v43  ;;  %v3161_v6 = vadd.f32 %v8162_v1, %v3004_v25 }
 0x2b6   : > { %8541 = vmatprep.subr.mxu0 %v11165_v11  ;;  %v3154_v14 = vpop.f32.mrf.mxu1 }
 0x2b7   : > { %8542 = vmatpush3.msra.mxu0 %v11165_v11  ;;  %v3155_v34 = vadd.f32 %v3154_v14, %v2994_v44 }
 0x2b8   : > { %8543 = vmatprep.subr.mxu0 %v11183_v47 }
 0x2b9   : > { %8544 = vmatpush3.msra.mxu0 %v11183_v47 }
 0x2ba   : > { %8583 = vmatprep.subr.mxu0 %v10998_v57 }
 0x2cb   : > { %v8232_v38 = vpop.f32.mrf.mxu1 }
 0x2cd   : > { %v3360_v0 = vpop.f32.mrf.mxu1 }
 0x2d3   : > { %v8197_v5 = vpop.f32.mrf.mxu0 }
 0x2d4   : > { %v3272_v49 = vadd.f32 %v8197_v5, %v3161_v6 }
 0x2d5   : > { %v3264_v28 = vpop.f32.mrf.mxu0 }
 0x2d6   : > { %v3265_v4 = vadd.f32 %v3264_v28, %v3155_v34  ;;  %v3369_v24 = vadd.f32 %v8232_v38, %v3272_v49  ;;  %v6781_v38 = vld [vmem:[%s11866_s4] ss:$0 sm:$0xff] }
 0x2d8   : > { %v3361_v23 = vadd.f32 %v3360_v0, %v3265_v4 }
 0x2ed   : > { %v8302_v22 = vpop.f32.mrf.mxu1 }
 0x2ef   : > { %v3580_v10 = vpop.f32.mrf.mxu1 }
 0x2f5   : > { %v8267_v63 = vpop.f32.mrf.mxu0 }
 0x2f6   : > { %v3494_v3 = vadd.f32 %v8267_v63, %v3369_v24 }
 0x2f7   : > { %v3487_v36 = vpop.f32.mrf.mxu0 }
 0x2f8   : > { %v3488_v61 = vadd.f32 %v3487_v36, %v3361_v23  ;;  %v3587_v5 = vadd.f32 %v8302_v22, %v3494_v3 }
 0x30f   : > { %v8372_v55 = vpop.f32.mrf.mxu1 }
 0x311   : > { %v3857_v9 = vpop.f32.mrf.mxu1 }
 0x317   : > { %v8337_v8 = vpop.f32.mrf.mxu0 }
 0x318   : > { %v3864_v29 = vadd.f32 %v8372_v55, %v8337_v8  ;;  %v3581_v55 = vadd.f32 %v3580_v10, %v3488_v61 }
 0x319   : > { %v3696_v12 = vpop.f32.mrf.mxu0 }
 0x31a   : > { %v3858_v58 = vadd.f32 %v3857_v9, %v3696_v12 }
 0x331   : > { %v8442_v31 = vpop.f32.mrf.mxu1 }
 0x333   : > { %v4063_v26 = vpop.f32.mrf.mxu1 }
 0x339   : > { %v8407_v52 = vpop.f32.mrf.mxu0 }
 0x33a   : > { %v3975_v32 = vadd.f32 %v8407_v52, %v3864_v29 }
 0x33b   : > { %v3967_v15 = vpop.f32.mrf.mxu0 }
 0x33c   : > { %v3968_v18 = vadd.f32 %v3967_v15, %v3858_v58  ;;  %v4072_v46 = vadd.f32 %v8442_v31, %v3975_v32  ;;  %v12050_v32 = vld [vmem:[#allocation20_spill] sm:$0xff] }
 0x33e   : > { %v4064_v62 = vadd.f32 %v4063_v26, %v3968_v18  ;;  %v5016_v18 = vld [vmem:[%s11868_s6 + $0x50] sm:$0xff]  ;;  %v5015_v26 = vld [vmem:[%s11868_s6 + $0x48] sm:$0xff] }
 0x353   : > { %v8512_v33 = vpop.f32.mrf.mxu1 }
 0x355   : > { %v4283_v28 = vpop.f32.mrf.mxu1 }
 0x35a   : > { %v8477_v43 = vpop.f32.mrf.mxu0 }
 0x35b   : > { %v4197_v25 = vadd.f32 %v8477_v43, %v4072_v46  ;;  %v12052_v43 = vld [vmem:[#allocation27_spill] sm:$0xff] }
 0x35c   : > { %v4190_v1 = vpop.f32.mrf.mxu0 }
 0x35d   : > { %v4290_v8 = vadd.f32 %v8512_v33, %v4197_v25  ;;  %v4191_v14 = vadd.f32 %v4190_v1, %v4064_v62  ;;  %v11406_v33 = vand.u32 4294901760, %v5016_v18  ;;  %v11419_v62 = vand.u32 4294901760, %v5015_v26  ;;  %v12053_v1 = vld [vmem:[#allocation3_spill] sm:$0xff] }
 0x35f   : > { %v4294_v12 = vadd.f32 %v4290_v8, %v3587_v5  ;;  %v4284_v63 = vadd.f32 %v4283_v28, %v4191_v14  ;;  %v5013_v14 = vld [vmem:[%s11868_s6 + $0x38] sm:$0xff] }
 0x361   : > { %v4303_v36 = vadd.f32 %v6781_v38, %v4294_v12  ;;  %v4293_v0 = vadd.f32 %v4284_v63, %v3581_v55  ;;  %v11448_v63 = vsub.f32 %v5015_v26, %v11419_v62  ;;  %v5008_v26 = vld [vmem:[%s11868_s6 + $0x10] sm:$0xff] }
 0x363   : > { %4305 = vst [vmem:[%s366_s22 + $0x8] sm:$0xff] %v4303_v36  ;;  %v11216_v44 = vand.u32 4294901760, %v4303_v36  ;;  %v4302_v22 = vadd.f32 %v6781_v38, %v4293_v0  ;;  %v12054_v38 = vld [vmem:[#allocation4_spill] sm:$0xff]  ;;  %v12055_v0 = vld [vmem:[#allocation7_spill] sm:$0xff] }
 0x365   : > { %v11219_v52 = vsub.f32 %v4303_v36, %v11216_v44  ;;  %4304 = vst [vmem:[%s366_s22] sm:$0xff] %v4302_v22  ;;  %v11221_v6 = vand.u32 4294901760, %v4302_v22  ;;  %v5012_v36 = vld [vmem:[%s11868_s6 + $0x30] sm:$0xff] }
 0x367   : > { %v11224_v10 = vsub.f32 %v4302_v22, %v11221_v6  ;;  %8580 = vmatprep.mubr.f32.mxu1 %v11221_v6  ;;  %v11228_v9 = vand.u32 4294901760, %v11219_v52 }
 0x368   : > { %8581 = vmatmul.mubr.f32.vlgmr.msra.gmra.mxu1 %v11216_v44 }
 0x369   : > { %8619 = vmatpush3.msra.mxu1 %v10976_v51  ;;  %v11233_v49 = vand.u32 4294901760, %v11224_v10  ;;  %v4416_v34 = vsub.f32 %v11219_v52, %v11228_v9 }
 0x36a   : > { %8620 = vmatprep.subr.mxu1 %v10978_v56 }
 0x36b   : > { %8621 = vmatpush3.msra.mxu1 %v10978_v56  ;;  %8650 = vmatprep.mubr.f32.mxu1 %v11233_v49  ;;  %v4406_v29 = vsub.f32 %v11224_v10, %v11233_v49  ;;  %v11247_v15 = vand.u32 4294901760, %v4416_v34 }
 0x36c   : > { %8622 = vmatprep.subr.mxu1 %v10980_v53 }
 0x36d   : > { %8623 = vmatpush3.msra.mxu1 %v10980_v53  ;;  %v11244_v31 = vand.u32 4294901760, %v4406_v29 }
 0x36e   : > { %8624 = vmatprep.subr.mxu1 %v10991_v20 }
 0x36f   : > { %8625 = vmatpush3.msra.mxu1 %v10991_v20  ;;  %8545 = vmatprep.mubr.f32.mxu0 %v11244_v31 }
 0x370   : > { %8626 = vmatprep.subr.mxu1 %v10993_v30  ;;  %8546 = vmatmul.mubr.f32.vlgmr.msra.gmra.mxu0 %v11247_v15 }
 0x371   : > { %8584 = vmatpush3.msra.mxu0 %v10998_v57  ;;  %8627 = vmatpush3.msra.mxu1 %v10993_v30  ;;  %v12039_v57 = vld [vmem:[#allocation5_spill] sm:$0xff] }
 0x372   : > { %8585 = vmatprep.subr.mxu0 %v11001_v7  ;;  %8615 = vmatprep.mubr.f32.mxu0 %v11224_v10 }
 0x373   : > { %8628 = vmatprep.subr.mxu1 %v10995_v41  ;;  %8586 = vmatpush3.msra.mxu0 %v11001_v7  ;;  %v12040_v7 = vld [vmem:[#allocation6_spill] sm:$0xff] }
 0x374   : > { %8629 = vmatpush3.msra.mxu1 %v10995_v41  ;;  %8587 = vmatprep.subr.mxu0 %v11004_v16 }
 0x375   : > { %8630 = vmatprep.subr.mxu1 %v11059_v39  ;;  %8588 = vmatpush3.msra.mxu0 %v11004_v16  ;;  %v12041_v16 = vld [vmem:[#allocation9_spill] sm:$0xff] }
 0x376   : > { %8631 = vmatpush3.msra.mxu1 %v11059_v39  ;;  %8589 = vmatprep.subr.mxu0 %v11008_v35 }
 0x377   : > { %8632 = vmatprep.subr.mxu1 %v11068_v54  ;;  %8590 = vmatpush3.msra.mxu0 %v11008_v35  ;;  %v12042_v35 = vld [vmem:[#allocation11_spill] sm:$0xff] }
 0x378   : > { %8633 = vmatpush3.msra.mxu1 %v11068_v54  ;;  %8591 = vmatprep.subr.mxu0 %v11011_v2 }
 0x379   : > { %8634 = vmatprep.subr.mxu1 %v11081_v50  ;;  %8592 = vmatpush3.msra.mxu0 %v11011_v2 }
 0x37a   : > { %8635 = vmatpush3.msra.mxu1 %v11081_v50  ;;  %8593 = vmatprep.subr.mxu0 %v11025_v13 }
 0x37b   : > { %8636 = vmatprep.subr.mxu1 %v11096_v45  ;;  %8594 = vmatpush3.msra.mxu0 %v11025_v13  ;;  %v12046_v13 = vld [vmem:[#allocation21_spill] sm:$0xff] }
 0x37c   : > { %8637 = vmatpush3.msra.mxu1 %v11096_v45  ;;  %8595 = vmatprep.subr.mxu0 %v11066_v17 }
 0x37d   : > { %8638 = vmatprep.subr.mxu1 %v11112_v37  ;;  %8596 = vmatpush3.msra.mxu0 %v11066_v17  ;;  %v12047_v17 = vld [vmem:[#allocation16_spill] sm:$0xff] }
 0x37e   : > { %8639 = vmatpush3.msra.mxu1 %v11112_v37  ;;  %8597 = vmatprep.subr.mxu0 %v11079_v59 }
 0x37f   : > { %8640 = vmatprep.subr.mxu1 %v11126_v42  ;;  %8598 = vmatpush3.msra.mxu0 %v11079_v59 }
 0x380   : > { %8641 = vmatpush3.msra.mxu1 %v11126_v42  ;;  %8599 = vmatprep.subr.mxu0 %v11094_v60 }
 0x381   : > { %8642 = vmatprep.subr.mxu1 %v11141_v40  ;;  %8600 = vmatpush3.msra.mxu0 %v11094_v60  ;;  %v5018_v60 = vld [vmem:[%s11868_s6 + $0x60] sm:$0xff] }
 0x382   : > { %8643 = vmatpush3.msra.mxu1 %v11141_v40  ;;  %8601 = vmatprep.subr.mxu0 %v11109_v19 }
 0x383   : > { %8644 = vmatprep.subr.mxu1 %v11147_v27  ;;  %8602 = vmatpush3.msra.mxu0 %v11109_v19  ;;  %v12048_v19 = vld [vmem:[#allocation25_spill] sm:$0xff] }
 0x384   : > { %8645 = vmatpush3.msra.mxu1 %v11147_v27  ;;  %8603 = vmatprep.subr.mxu0 %v11124_v21 }
 0x385   : > { %8646 = vmatprep.subr.mxu1 %v11165_v11  ;;  %8604 = vmatpush3.msra.mxu0 %v11124_v21  ;;  %v5017_v21 = vld [vmem:[%s11868_s6 + $0x58] sm:$0xff] }
 0x386   : > { %8647 = vmatpush3.msra.mxu1 %v11165_v11  ;;  %8605 = vmatprep.subr.mxu0 %v11139_v48  ;;  %v11384_v24 = vand.u32 4294901760, %v5017_v21 }
 0x387   : > { %8648 = vmatprep.subr.mxu1 %v11183_v47  ;;  %8606 = vmatpush3.msra.mxu0 %v11139_v48  ;;  %v12049_v48 = vld [vmem:[#allocation19_spill] sm:$0xff] }
 0x388   : > { %8649 = vmatpush3.msra.mxu1 %v11183_v47  ;;  %8607 = vmatprep.subr.mxu0 %v12039_v57  ;;  %v11417_v25 = vsub.f32 %v5017_v21, %v11384_v24 }
 0x389   : > { %8651 = vmatmul.mubr.f32.vlgmr.msra.gmra.mxu1 %v11228_v9  ;;  %8688 = vmatprep.subr.mxu1 %v10976_v51 }
 0x38a   : > { %8608 = vmatpush3.msra.mxu0 %v12039_v57  ;;  %8689 = vmatpush3.msra.mxu1 %v10976_v51  ;;  %v12043_v51 = vld [vmem:[#allocation12_spill] sm:$0xff]  ;;  %v11445_v12 = vand.u32 4294901760, %v11417_v25  ;;  %v5011_v57 = vld [vmem:[%s11868_s6 + $0x28] sm:$0xff] }
 0x38b   : > { %8720 = vmatprep.mubr.f32.mxu1 %v11221_v6  ;;  %8609 = vmatprep.subr.mxu0 %v12040_v7 }
 0x38c   : > { %8690 = vmatprep.subr.mxu1 %v10978_v56  ;;  %8610 = vmatpush3.msra.mxu0 %v12040_v7 }
 0x38d   : > { %8691 = vmatpush3.msra.mxu1 %v10978_v56  ;;  %8611 = vmatprep.subr.mxu0 %v12041_v16  ;;  %v12044_v56 = vld [vmem:[#allocation18_spill] sm:$0xff] }
 0x38e   : > { %8692 = vmatprep.subr.mxu1 %v10980_v53  ;;  %8612 = vmatpush3.msra.mxu0 %v12041_v16 }
 0x38f   : > { %8693 = vmatpush3.msra.mxu1 %v10980_v53  ;;  %8613 = vmatprep.subr.mxu0 %v12042_v35  ;;  %v5021_v53 = vld [vmem:[%s11868_s6 + $0x78] sm:$0xff] }
 0x390   : > { %8694 = vmatprep.subr.mxu1 %v10991_v20  ;;  %8614 = vmatpush3.msra.mxu0 %v12042_v35  ;;  %v11334_v2 = vand.u32 4294901760, %v5021_v53  ;;  %v5155_v35 = vsub.f32 %v11417_v25, %v11445_v12 }
 0x391   : > { %8695 = vmatpush3.msra.mxu1 %v10991_v20  ;;  %8616 = vmatmul.mubr.f32.vlgmr.msra.gmra.mxu0 %v11219_v52  ;;  %v12045_v20 = vld [vmem:[#allocation14_spill] sm:$0xff] }
 0x392   : > { %8653 = vmatprep.subr.mxu0 %v12043_v51  ;;  %8696 = vmatprep.subr.mxu1 %v10993_v30 }
 0x393   : > { %8654 = vmatpush3.msra.mxu0 %v12043_v51  ;;  %8685 = vmatprep.mubr.f32.mxu0 %v11221_v6  ;;  %v11477_v51 = vand.u32 4294901760, %v11448_v63 }
 0x394   : > { %8697 = vmatpush3.msra.mxu1 %v10993_v30  ;;  %8655 = vmatprep.subr.mxu0 %v12044_v56  ;;  %v5020_v30 = vld [vmem:[%s11868_s6 + $0x70] sm:$0xff] }
 0x395   : > { %8698 = vmatprep.subr.mxu1 %v10995_v41  ;;  %8656 = vmatpush3.msra.mxu0 %v12044_v56  ;;  %v11348_v59 = vand.u32 4294901760, %v5020_v30  ;;  %v5010_v56 = vld [vmem:[%s11868_s6 + $0x20] sm:$0xff] }
 0x396   : > { %8699 = vmatpush3.msra.mxu1 %v10995_v41  ;;  %8657 = vmatprep.subr.mxu0 %v12045_v20  ;;  %v5019_v41 = vld [vmem:[%s11868_s6 + $0x68] sm:$0xff] }
 0x397   : > { %8700 = vmatprep.subr.mxu1 %v11059_v39  ;;  %8658 = vmatpush3.msra.mxu0 %v12045_v20  ;;  %v11370_v4 = vsub.f32 %v5020_v30, %v11348_v59  ;;  %v11487_v30 = vand.u32 4294901760, %v5011_v57 }
 0x398   : > { %8701 = vmatpush3.msra.mxu1 %v11059_v39  ;;  %8659 = vmatprep.subr.mxu0 %v12046_v13  ;;  %v11353_v39 = vsub.f32 %v5021_v53, %v11334_v2  ;;  %v12056_v53 = vld [vmem:[#allocation8_spill] sm:$0xff] }
 0x399   : > { %8702 = vmatprep.subr.mxu1 %v11068_v54  ;;  %8660 = vmatpush3.msra.mxu0 %v12046_v13  ;;  %v11397_v3 = vand.u32 4294901760, %v11370_v4 }
 0x39a   : > { %8703 = vmatpush3.msra.mxu1 %v11068_v54  ;;  %8661 = vmatprep.subr.mxu0 %v12047_v17  ;;  %v11360_v54 = vand.u32 4294901760, %v5019_v41  ;;  %v11377_v58 = vand.u32 4294901760, %v11353_v39 }
 0x39b   : > { %8704 = vmatprep.subr.mxu1 %v11081_v50  ;;  %8662 = vmatpush3.msra.mxu0 %v12047_v17  ;;  %v5009_v17 = vld [vmem:[%s11868_s6 + $0x18] sm:$0xff] }
 0x39c   : > { %8705 = vmatpush3.msra.mxu1 %v11081_v50  ;;  %8663 = vmatprep.subr.mxu0 %v12048_v19  ;;  %v11372_v50 = vand.u32 4294901760, %v5018_v60  ;;  %v5127_v46 = vsub.f32 %v11353_v39, %v11377_v58 }
 0x39d   : > { %8706 = vmatprep.subr.mxu1 %v11096_v45  ;;  %8664 = vmatpush3.msra.mxu0 %v12048_v19 }
 0x39e   : > { %8707 = vmatpush3.msra.mxu1 %v11096_v45  ;;  %8665 = vmatprep.subr.mxu0 %v12049_v48  ;;  %v11382_v45 = vsub.f32 %v5019_v41, %v11360_v54  ;;  %v11400_v23 = vsub.f32 %v5018_v60, %v11372_v50  ;;  %v5128_v28 = vand.u32 4294901760, %v5127_v46  ;;  %v12057_v60 = vld [vmem:[#allocation10_spill] sm:$0xff] }
 0x39f   : > { %8708 = vmatprep.subr.mxu1 %v11112_v37  ;;  %8666 = vmatpush3.msra.mxu0 %v12049_v48  ;;  %v11502_v48 = vand.u32 4294901760, %v5010_v56 }
 0x3a0   : > { %8709 = vmatpush3.msra.mxu1 %v11112_v37  ;;  %8667 = vmatprep.subr.mxu0 %v12050_v32  ;;  %v12051_v37 = vld [vmem:[#allocation24_spill] sm:$0xff]  ;;  %v11414_v61 = vand.u32 4294901760, %v11382_v45  ;;  %v11428_v5 = vand.u32 4294901760, %v11400_v23 }
 0x3a1   : > { %8710 = vmatprep.subr.mxu1 %v11126_v42  ;;  %8668 = vmatpush3.msra.mxu0 %v12050_v32  ;;  %v5156_v32 = vand.u32 4294901760, %v5155_v35 }
 0x3a2   : > { %8711 = vmatpush3.msra.mxu1 %v11126_v42  ;;  %8669 = vmatprep.subr.mxu0 %v12051_v37  ;;  %v5014_v42 = vld [vmem:[%s11868_s6 + $0x40] sm:$0xff]  ;;  %v5141_v55 = vsub.f32 %v11382_v45, %v11414_v61  ;;  %v5148_v34 = vsub.f32 %v11400_v23, %v11428_v5 }
 0x3a3   : > { %8712 = vmatprep.subr.mxu1 %v11141_v40  ;;  %8670 = vmatpush3.msra.mxu0 %v12051_v37  ;;  %v11430_v8 = vand.u32 4294901760, %v5014_v42  ;;  %v12058_v37 = vld [vmem:[#allocation13_spill] sm:$0xff] }
 0x3a4   : > { %8713 = vmatpush3.msra.mxu1 %v11141_v40  ;;  %8671 = vmatprep.subr.mxu0 %v12052_v43  ;;  %v5134_v40 = vsub.f32 %v11370_v4, %v11397_v3  ;;  %v5142_v16 = vand.u32 4294901760, %v5141_v55  ;;  %v5149_v13 = vand.u32 4294901760, %v5148_v34  ;;  %v11532_v55 = vand.u32 4294901760, %v5008_v26 }
 0x3a5   : > { %8714 = vmatprep.subr.mxu1 %v11147_v27  ;;  %8672 = vmatpush3.msra.mxu0 %v12052_v43  ;;  %v11462_v29 = vsub.f32 %v5014_v42, %v11430_v8  ;;  %v11515_v42 = vsub.f32 %v5011_v57, %v11487_v30  ;;  %v11517_v43 = vand.u32 4294901760, %v5009_v17 }
 0x3a6   : > { %8715 = vmatpush3.msra.mxu1 %v11147_v27  ;;  %8673 = vmatprep.subr.mxu0 %v12053_v1  ;;  %v11438_v27 = vsub.f32 %v5016_v18, %v11406_v33  ;;  %v5135_v22 = vand.u32 4294901760, %v5134_v40  ;;  %v5169_v18 = vsub.f32 %v11448_v63, %v11477_v51  ;;  %v5007_v40 = vld [vmem:[%s11868_s6 + $0x8] sm:$0xff] }
 0x3a7   : > { %8716 = vmatprep.subr.mxu1 %v11165_v11  ;;  %8674 = vmatpush3.msra.mxu0 %v12053_v1  ;;  %v11491_v41 = vand.u32 4294901760, %v11462_v29  ;;  %v11543_v34 = vand.u32 4294901760, %v11515_v42  ;;  %v11546_v57 = vsub.f32 %v5009_v17, %v11517_v43 }
 0x3a8   : > { %8717 = vmatpush3.msra.mxu1 %v11165_v11  ;;  %8675 = vmatprep.subr.mxu0 %v12054_v38  ;;  %v11455_v11 = vand.u32 4294901760, %v5013_v14  ;;  %v11469_v7 = vand.u32 4294901760, %v11438_v27 }
 0x3a9   : > { %8718 = vmatprep.subr.mxu1 %v11183_v47  ;;  %8676 = vmatpush3.msra.mxu0 %v12054_v38  ;;  %v5176_v1 = vsub.f32 %v11462_v29, %v11491_v41  ;;  %v11530_v38 = vsub.f32 %v5010_v56, %v11502_v48 }
 0x3aa   : > { %8719 = vmatpush3.msra.mxu1 %v11183_v47  ;;  %8677 = vmatprep.subr.mxu0 %v12055_v0  ;;  %v11471_v47 = vand.u32 4294901760, %v5012_v36  ;;  %v11485_v20 = vsub.f32 %v5013_v14, %v11455_v11  ;;  %v5162_v19 = vsub.f32 %v11438_v27, %v11469_v7 }
 0x3ab   : > { %8721 = vmatmul.mubr.f32.vlgmr.msra.gmra.mxu1 %v11216_v44  ;;  %8758 = vmatprep.subr.mxu1 %v5128_v28  ;;  %v5177_v35 = vand.u32 4294901760, %v5176_v1  ;;  %v11555_v56 = vand.u32 4294901760, %v11530_v38 }
 0x3ac   : > { %8678 = vmatpush3.msra.mxu0 %v12055_v0  ;;  %8759 = vmatpush3.msra.mxu1 %v5128_v28  ;;  %v11500_v21 = vsub.f32 %v5012_v36, %v11471_v47  ;;  %v11512_v46 = vand.u32 4294901760, %v11485_v20  ;;  %v5163_v14 = vand.u32 4294901760, %v5162_v19  ;;  %v5170_v36 = vand.u32 4294901760, %v5169_v18  ;;  %v5006_v0 = vld [vmem:[%s11868_s6] sm:$0xff] }
 0x3ad   : > { %8790 = vmatprep.mubr.f32.mxu1 %v11221_v6  ;;  %8679 = vmatprep.subr.mxu0 %v12056_v53  ;;  %v11567_v19 = vand.u32 4294901760, %v11546_v57 }
 0x3ae   : > { %8760 = vmatprep.subr.mxu1 %v5135_v22  ;;  %8680 = vmatpush3.msra.mxu0 %v12056_v53  ;;  %v11527_v28 = vand.u32 4294901760, %v11500_v21  ;;  %v11558_v53 = vsub.f32 %v5008_v26, %v11532_v55  ;;  %v5204_v26 = vsub.f32 %v11530_v38, %v11555_v56 }
 0x3af   : > { %8761 = vmatpush3.msra.mxu1 %v5135_v22  ;;  %8681 = vmatprep.subr.mxu0 %v12057_v60  ;;  %v5183_v22 = vsub.f32 %v11485_v20, %v11512_v46 }
 0x3b0   : > { %8762 = vmatprep.subr.mxu1 %v5142_v16  ;;  %8682 = vmatpush3.msra.mxu0 %v12057_v60  ;;  %v5197_v60 = vsub.f32 %v11515_v42, %v11543_v34 }
 0x3b1   : > { %8763 = vmatpush3.msra.mxu1 %v5142_v16  ;;  %8683 = vmatprep.subr.mxu0 %v12058_v37  ;;  %v11548_v16 = vand.u32 4294901760, %v5007_v40  ;;  %v5184_v17 = vand.u32 4294901760, %v5183_v22 }
 0x3b2   : > { %8764 = vmatprep.subr.mxu1 %v5149_v13  ;;  %8684 = vmatpush3.msra.mxu0 %v12058_v37  ;;  %v11577_v37 = vand.u32 4294901760, %v11558_v53 }
 0x3b3   : > { %8765 = vmatpush3.msra.mxu1 %v5149_v13  ;;  %8686 = vmatmul.mubr.f32.vlgmr.msra.gmra.mxu0 %v11216_v44  ;;  %v11560_v13 = vand.u32 4294901760, %v5006_v0 }
 0x3b4   : > { %8723 = vmatprep.subr.mxu0 %v11334_v2  ;;  %8766 = vmatprep.subr.mxu1 %v5156_v32  ;;  %v5218_v22 = vsub.f32 %v11558_v53, %v11577_v37 }
 0x3b5   : > { %8724 = vmatpush3.msra.mxu0 %v11334_v2  ;;  %8755 = vmatprep.mubr.f32.mxu0 %v11244_v31  ;;  %v5190_v31 = vsub.f32 %v11500_v21, %v11527_v28  ;;  %v11580_v1 = vsub.f32 %v5006_v0, %v11560_v13  ;;  %v5205_v0 = vand.u32 4294901760, %v5204_v26 }
 0x3b6   : > { %8767 = vmatpush3.msra.mxu1 %v5156_v32  ;;  %8725 = vmatprep.subr.mxu0 %v11348_v59  ;;  %v11570_v32 = vsub.f32 %v5007_v40, %v11548_v16  ;;  %v5198_v40 = vand.u32 4294901760, %v5197_v60  ;;  %v5219_v60 = vand.u32 4294901760, %v5218_v22 }
 0x3b7   : > { %8768 = vmatprep.subr.mxu1 %v5163_v14  ;;  %8726 = vmatpush3.msra.mxu0 %v11348_v59  ;;  %v5191_v18 = vand.u32 4294901760, %v5190_v31 }
 0x3b8   : > { %8769 = vmatpush3.msra.mxu1 %v5163_v14  ;;  %8727 = vmatprep.subr.mxu0 %v11360_v54  ;;  %v5211_v14 = vsub.f32 %v11546_v57, %v11567_v19 }
 0x3b9   : > { %8770 = vmatprep.subr.mxu1 %v5170_v36  ;;  %8728 = vmatpush3.msra.mxu0 %v11360_v54 }
 0x3ba   : > { %8771 = vmatpush3.msra.mxu1 %v5170_v36  ;;  %8729 = vmatprep.subr.mxu0 %v11372_v50  ;;  %v11587_v36 = vand.u32 4294901760, %v11570_v32  ;;  %v5212_v31 = vand.u32 4294901760, %v5211_v14 }
 0x3bb   : > { %8772 = vmatprep.subr.mxu1 %v5177_v35  ;;  %8730 = vmatpush3.msra.mxu0 %v11372_v50 }
 0x3bc   : > { %8773 = vmatpush3.msra.mxu1 %v5177_v35  ;;  %8731 = vmatprep.subr.mxu0 %v11384_v24  ;;  %v11594_v35 = vand.u32 4294901760, %v11580_v1 }
 0x3bd   : > { %8774 = vmatprep.subr.mxu1 %v5184_v17  ;;  %8732 = vmatpush3.msra.mxu0 %v11384_v24 }
 0x3be   : > { %8775 = vmatpush3.msra.mxu1 %v5184_v17  ;;  %8733 = vmatprep.subr.mxu0 %v11406_v33  ;;  %v5225_v17 = vsub.f32 %v11570_v32, %v11587_v36  ;;  %v5232_v26 = vsub.f32 %v11580_v1, %v11594_v35 }
 0x3bf   : > { %8776 = vmatprep.subr.mxu1 %v5191_v18  ;;  %8734 = vmatpush3.msra.mxu0 %v11406_v33 }
 0x3c0   : > { %8777 = vmatpush3.msra.mxu1 %v5191_v18  ;;  %8735 = vmatprep.subr.mxu0 %v11419_v62  ;;  %v5226_v18 = vand.u32 4294901760, %v5225_v17 }
 0x3c1   : > { %8778 = vmatprep.subr.mxu1 %v5198_v40  ;;  %8736 = vmatpush3.msra.mxu0 %v11419_v62 }
 0x3c2   : > { %8779 = vmatpush3.msra.mxu1 %v5198_v40  ;;  %8737 = vmatprep.subr.mxu0 %v11430_v8  ;;  %v5233_v40 = vand.u32 4294901760, %v5232_v26 }
 0x3c3   : > { %8780 = vmatprep.subr.mxu1 %v5205_v0  ;;  %8738 = vmatpush3.msra.mxu0 %v11430_v8 }
 0x3c4   : > { %8781 = vmatpush3.msra.mxu1 %v5205_v0  ;;  %8739 = vmatprep.subr.mxu0 %v11455_v11 }
 0x3c5   : > { %8782 = vmatprep.subr.mxu1 %v5212_v31  ;;  %8740 = vmatpush3.msra.mxu0 %v11455_v11 }
 0x3c6   : > { %8783 = vmatpush3.msra.mxu1 %v5212_v31  ;;  %8741 = vmatprep.subr.mxu0 %v11471_v47 }
 0x3c7   : > { %8784 = vmatprep.subr.mxu1 %v5219_v60  ;;  %8742 = vmatpush3.msra.mxu0 %v11471_v47 }
 0x3c8   : > { %8785 = vmatpush3.msra.mxu1 %v5219_v60  ;;  %8743 = vmatprep.subr.mxu0 %v11487_v30 }
 0x3c9   : > { %8786 = vmatprep.subr.mxu1 %v5226_v18  ;;  %8744 = vmatpush3.msra.mxu0 %v11487_v30 }
 0x3ca   : > { %8787 = vmatpush3.msra.mxu1 %v5226_v18  ;;  %8745 = vmatprep.subr.mxu0 %v11502_v48 }
 0x3cb   : > { %8788 = vmatprep.subr.mxu1 %v5233_v40  ;;  %8746 = vmatpush3.msra.mxu0 %v11502_v48 }
 0x3cc   : > { %8789 = vmatpush3.msra.mxu1 %v5233_v40  ;;  %8747 = vmatprep.subr.mxu0 %v11517_v43 }
 0x3cd   : > { %8791 = vmatmul.mubr.f32.vlgmr.msra.gmra.mxu1 %v11216_v44  ;;  %8828 = vmatprep.subr.mxu1 %v11334_v2 }
 0x3ce   : > { %8748 = vmatpush3.msra.mxu0 %v11517_v43  ;;  %8829 = vmatpush3.msra.mxu1 %v11334_v2 }
 0x3cf   : > { %8860 = vmatprep.mubr.f32.mxu1 %v11233_v49  ;;  %8749 = vmatprep.subr.mxu0 %v11532_v55 }
 0x3d0   : > { %8830 = vmatprep.subr.mxu1 %v11348_v59  ;;  %8750 = vmatpush3.msra.mxu0 %v11532_v55 }
 0x3d1   : > { %8831 = vmatpush3.msra.mxu1 %v11348_v59  ;;  %8751 = vmatprep.subr.mxu0 %v11548_v16 }
 0x3d2   : > { %8832 = vmatprep.subr.mxu1 %v11360_v54  ;;  %8752 = vmatpush3.msra.mxu0 %v11548_v16 }
 0x3d3   : > { %8833 = vmatpush3.msra.mxu1 %v11360_v54  ;;  %8753 = vmatprep.subr.mxu0 %v11560_v13 }
 0x3d4   : > { %8834 = vmatprep.subr.mxu1 %v11372_v50  ;;  %8754 = vmatpush3.msra.mxu0 %v11560_v13 }
 0x3d5   : > { %8835 = vmatpush3.msra.mxu1 %v11372_v50  ;;  %8756 = vmatmul.mubr.f32.vlgmr.msra.gmra.mxu0 %v11247_v15 }
 0x3d6   : > { %8793 = vmatprep.subr.mxu0 %v11353_v39  ;;  %8836 = vmatprep.subr.mxu1 %v11384_v24 }
 0x3d7   : > { %8794 = vmatpush3.msra.mxu0 %v11353_v39  ;;  %8825 = vmatprep.mubr.f32.mxu0 %v11224_v10 }
 0x3d8   : > { %8837 = vmatpush3.msra.mxu1 %v11384_v24  ;;  %8795 = vmatprep.subr.mxu0 %v11370_v4 }
 0x3d9   : > { %8838 = vmatprep.subr.mxu1 %v11406_v33  ;;  %8796 = vmatpush3.msra.mxu0 %v11370_v4 }
 0x3da   : > { %8839 = vmatpush3.msra.mxu1 %v11406_v33  ;;  %8797 = vmatprep.subr.mxu0 %v11382_v45 }
 0x3db   : > { %8840 = vmatprep.subr.mxu1 %v11419_v62  ;;  %8798 = vmatpush3.msra.mxu0 %v11382_v45  ;;  %v5708_v45 = vld [vmem:[%s11869_s7] sm:$0xff] }
 0x3dc   : > { %8841 = vmatpush3.msra.mxu1 %v11419_v62  ;;  %8799 = vmatprep.subr.mxu0 %v11400_v23 }
 0x3dd   : > { %8842 = vmatprep.subr.mxu1 %v11430_v8  ;;  %8800 = vmatpush3.msra.mxu0 %v11400_v23  ;;  %v5711_v23 = vsel %vm5709_vm4, %v5708_v45, 0 }
 0x3de   : > { %8843 = vmatpush3.msra.mxu1 %v11430_v8  ;;  %8801 = vmatprep.subr.mxu0 %v11417_v25 }
 0x3df   : > { %8844 = vmatprep.subr.mxu1 %v11455_v11  ;;  %8802 = vmatpush3.msra.mxu0 %v11417_v25 }
 0x3e0   : > { %8845 = vmatpush3.msra.mxu1 %v11455_v11  ;;  %8803 = vmatprep.subr.mxu0 %v11438_v27 }
 0x3e1   : > { %8846 = vmatprep.subr.mxu1 %v11471_v47  ;;  %8804 = vmatpush3.msra.mxu0 %v11438_v27 }
 0x3e2   : > { %8847 = vmatpush3.msra.mxu1 %v11471_v47  ;;  %8805 = vmatprep.subr.mxu0 %v11448_v63 }
 0x3e3   : > { %8848 = vmatprep.subr.mxu1 %v11487_v30  ;;  %8806 = vmatpush3.msra.mxu0 %v11448_v63 }
 0x3e4   : > { %8849 = vmatpush3.msra.mxu1 %v11487_v30  ;;  %8807 = vmatprep.subr.mxu0 %v11462_v29 }
 0x3e5   : > { %8850 = vmatprep.subr.mxu1 %v11502_v48  ;;  %8808 = vmatpush3.msra.mxu0 %v11462_v29 }
 0x3e6   : > { %8851 = vmatpush3.msra.mxu1 %v11502_v48  ;;  %8809 = vmatprep.subr.mxu0 %v11485_v20 }
 0x3e7   : > { %8852 = vmatprep.subr.mxu1 %v11517_v43  ;;  %8810 = vmatpush3.msra.mxu0 %v11485_v20 }
 0x3e8   : > { %8853 = vmatpush3.msra.mxu1 %v11517_v43  ;;  %8811 = vmatprep.subr.mxu0 %v11500_v21 }
 0x3e9   : > { %8854 = vmatprep.subr.mxu1 %v11532_v55  ;;  %8812 = vmatpush3.msra.mxu0 %v11500_v21 }
 0x3ea   : > { %8855 = vmatpush3.msra.mxu1 %v11532_v55  ;;  %8813 = vmatprep.subr.mxu0 %v11515_v42 }
 0x3eb   : > { %8856 = vmatprep.subr.mxu1 %v11548_v16  ;;  %8814 = vmatpush3.msra.mxu0 %v11515_v42 }
 0x3ec   : > { %8857 = vmatpush3.msra.mxu1 %v11548_v16  ;;  %8815 = vmatprep.subr.mxu0 %v11530_v38 }
 0x3ed   : > { %8858 = vmatprep.subr.mxu1 %v11560_v13  ;;  %8816 = vmatpush3.msra.mxu0 %v11530_v38 }
 0x3ee   : > { %8859 = vmatpush3.msra.mxu1 %v11560_v13  ;;  %8817 = vmatprep.subr.mxu0 %v11546_v57 }
 0x3ef   : > { %8861 = vmatmul.mubr.f32.vlgmr.msra.gmra.mxu1 %v11228_v9  ;;  %8898 = vmatprep.subr.mxu1 %v11334_v2 }
 0x3f0   : > { %8818 = vmatpush3.msra.mxu0 %v11546_v57  ;;  %8899 = vmatpush3.msra.mxu1 %v11334_v2  ;;  %v6172_v57 = vld [vmem:[%s11870_s8] sm:$0xff] }
 0x3f1   : > { %8930 = vmatprep.mubr.f32.mxu1 %v11221_v6  ;;  %8819 = vmatprep.subr.mxu0 %v11558_v53  ;;  %v6174_v14 = vsel %vm5709_vm4, %v6172_v57, 0 }
 0x3f2   : > { %8900 = vmatprep.subr.mxu1 %v11348_v59  ;;  %8820 = vmatpush3.msra.mxu0 %v11558_v53 }
 0x3f3   : > { %8901 = vmatpush3.msra.mxu1 %v11348_v59  ;;  %8821 = vmatprep.subr.mxu0 %v11570_v32 }
 0x3f4   : > { %8902 = vmatprep.subr.mxu1 %v11360_v54  ;;  %8822 = vmatpush3.msra.mxu0 %v11570_v32 }
 0x3f5   : > { %8903 = vmatpush3.msra.mxu1 %v11360_v54  ;;  %8823 = vmatprep.subr.mxu0 %v11580_v1 }
 0x3f6   : > { %8904 = vmatprep.subr.mxu1 %v11372_v50  ;;  %8824 = vmatpush3.msra.mxu0 %v11580_v1 }
 0x3f7   : > { %8905 = vmatpush3.msra.mxu1 %v11372_v50  ;;  %8826 = vmatmul.mubr.f32.vlgmr.msra.gmra.mxu0 %v11219_v52  ;;  %v12059_v52 = vmov 0.0  }
 0x3f8   : > { %8863 = vmatprep.subr.mxu0 %v11377_v58  ;;  %8906 = vmatprep.subr.mxu1 %v11384_v24 }
 0x3f9   : > { %8864 = vmatpush3.msra.mxu0 %v11377_v58  ;;  %8895 = vmatprep.mubr.f32.mxu0 %v11221_v6 }
 0x3fa   : > { %8907 = vmatpush3.msra.mxu1 %v11384_v24  ;;  %8865 = vmatprep.subr.mxu0 %v11397_v3 }
 0x3fb   : > { %8908 = vmatprep.subr.mxu1 %v11406_v33  ;;  %8866 = vmatpush3.msra.mxu0 %v11397_v3 }
 0x3fc   : > { %8909 = vmatpush3.msra.mxu1 %v11406_v33  ;;  %8867 = vmatprep.subr.mxu0 %v11414_v61 }
 0x3fd   : > { %8910 = vmatprep.subr.mxu1 %v11419_v62  ;;  %8868 = vmatpush3.msra.mxu0 %v11414_v61 }
 0x3fe   : > { %8911 = vmatpush3.msra.mxu1 %v11419_v62  ;;  %8869 = vmatprep.subr.mxu0 %v11428_v5  ;;  %v11768_v62 = vand.u32 4294901760, %v5711_v23 }
 0x3ff   : > { %8912 = vmatprep.subr.mxu1 %v11430_v8  ;;  %8870 = vmatpush3.msra.mxu0 %v11428_v5 }
 0x400   : > { %8913 = vmatpush3.msra.mxu1 %v11430_v8  ;;  %8871 = vmatprep.subr.mxu0 %v11445_v12 }
 0x401   : > { %8914 = vmatprep.subr.mxu1 %v11455_v11  ;;  %8872 = vmatpush3.msra.mxu0 %v11445_v12 }
 0x402   : > { %8915 = vmatpush3.msra.mxu1 %v11455_v11  ;;  %8873 = vmatprep.subr.mxu0 %v11469_v7 }
 0x403   : > { %8916 = vmatprep.subr.mxu1 %v11471_v47  ;;  %8874 = vmatpush3.msra.mxu0 %v11469_v7 }
 0x404   : > { %8917 = vmatpush3.msra.mxu1 %v11471_v47  ;;  %8875 = vmatprep.subr.mxu0 %v11477_v51  ;;  %v11771_v47 = vsub.f32 %v5711_v23, %v11768_v62 }
 0x405   : > { %8918 = vmatprep.subr.mxu1 %v11487_v30  ;;  %8876 = vmatpush3.msra.mxu0 %v11477_v51 }
 0x406   : > { %8919 = vmatpush3.msra.mxu1 %v11487_v30  ;;  %8877 = vmatprep.subr.mxu0 %v11491_v41 }
 0x407   : > { %8920 = vmatprep.subr.mxu1 %v11502_v48  ;;  %8878 = vmatpush3.msra.mxu0 %v11491_v41 }
 0x408   : > { %8921 = vmatpush3.msra.mxu1 %v11502_v48  ;;  %8879 = vmatprep.subr.mxu0 %v11512_v46 }
 0x409   : > { %8922 = vmatprep.subr.mxu1 %v11517_v43  ;;  %8880 = vmatpush3.msra.mxu0 %v11512_v46 }
 0x40a   : > { %8923 = vmatpush3.msra.mxu1 %v11517_v43  ;;  %8881 = vmatprep.subr.mxu0 %v11527_v28  ;;  %v5782_v43 = vand.u32 4294901760, %v11771_v47 }
 0x40b   : > { %8924 = vmatprep.subr.mxu1 %v11532_v55  ;;  %8882 = vmatpush3.msra.mxu0 %v11527_v28 }
 0x40c   : > { %8925 = vmatpush3.msra.mxu1 %v11532_v55  ;;  %8883 = vmatprep.subr.mxu0 %v11543_v34 }
 0x40d   : > { %8926 = vmatprep.subr.mxu1 %v11548_v16  ;;  %8884 = vmatpush3.msra.mxu0 %v11543_v34 }
 0x40e   : > { %8927 = vmatpush3.msra.mxu1 %v11548_v16  ;;  %8885 = vmatprep.subr.mxu0 %v11555_v56 }
 0x40f   : > { %8928 = vmatprep.subr.mxu1 %v11560_v13  ;;  %8886 = vmatpush3.msra.mxu0 %v11555_v56 }
 0x410   : > { %8929 = vmatpush3.msra.mxu1 %v11560_v13  ;;  %8887 = vmatprep.subr.mxu0 %v11567_v19 }
 0x411   : > { %8931 = vmatmul.mubr.f32.vlgmr.msra.gmra.mxu1 %v11216_v44  ;;  %8888 = vmatpush3.msra.mxu0 %v11567_v19  ;;  %v5783_v19 = vsub.f32 %v11771_v47, %v5782_v43 }
 0x412   : > { %8889 = vmatprep.subr.mxu0 %v11577_v37  ;;  %8940 = vmatprep.subr.mxu1 %v12059_v52 }
 0x413   : > { %8890 = vmatpush3.msra.mxu0 %v11577_v37  ;;  %8944 = vmatprep.mubr.msk.f32.mxu1 %vm9037_vm3, %v12059_v52  ;;  %v5784_v22 = vand.u32 4294901760, %v5783_v19 }
 0x414   : > { %8891 = vmatprep.subr.mxu0 %v11587_v36 }
 0x415   : > { %8892 = vmatpush3.msra.mxu0 %v11587_v36 }
 0x416   : > { %8893 = vmatprep.subr.mxu0 %v11594_v35 }
 0x417   : > { %8894 = vmatpush3.msra.mxu0 %v11594_v35  ;;  %v11781_v35 = vand.u32 4294901760, %v6174_v14 }
 0x418   : > { %8896 = vmatmul.mubr.f32.vlgmr.msra.gmra.mxu0 %v11216_v44  ;;  %8933 = vmatprep.subr.mxu0 %v12059_v52 }
 0x419   : > { %8937 = vmatprep.mubr.msk.f32.mxu0 %vm9037_vm3, %v12059_v52  ;;  %v11792_v18 = vsub.f32 %v6174_v14, %v11781_v35 }
 0x428   : > { %v8582_v10 = vpop.f32.mrf.mxu1 }
 0x42a   : > { %v4570_v15 = vpop.f32.mrf.mxu1 }
 0x430   : > { %v8547_v6 = vpop.f32.mrf.mxu0 }
 0x431   : > { %v4577_v61 = vadd.f32 %v8582_v10, %v8547_v6 }
 0x432   : > { %v4409_v9 = vpop.f32.mrf.mxu0 }
 0x433   : > { %v4571_v5 = vadd.f32 %v4570_v15, %v4409_v9 }
 0x449   : > { %v8652_v2 = vpop.f32.mrf.mxu1 }
 0x44b   : > { %v4776_v54 = vpop.f32.mrf.mxu1 }
 0x451   : > { %v8617_v49 = vpop.f32.mrf.mxu0 }
 0x452   : > { %v4688_v8 = vadd.f32 %v8617_v49, %v4577_v61  ;;  %v6245_v49 = vand.u32 4294901760, %v11792_v18 }
 0x453   : > { %v4680_v59 = vpop.f32.mrf.mxu0 }
 0x454   : > { %v4681_v11 = vadd.f32 %v4680_v59, %v4571_v5  ;;  %v4785_v51 = vadd.f32 %v8652_v2, %v4688_v8  ;;  %v6246_v2 = vsub.f32 %v11792_v18, %v6245_v49 }
 0x456   : > { %v4777_v21 = vadd.f32 %v4776_v54, %v4681_v11  ;;  %v6247_v59 = vand.u32 4294901760, %v6246_v2 }
 0x46b   : > { %v8722_v4 = vpop.f32.mrf.mxu1 }
 0x46d   : > { %v4996_v58 = vpop.f32.mrf.mxu1 }
 0x473   : > { %v8687_v39 = vpop.f32.mrf.mxu0 }
 0x474   : > { %v4910_v41 = vadd.f32 %v8687_v39, %v4785_v51 }
 0x475   : > { %v4903_v44 = vpop.f32.mrf.mxu0 }
 0x476   : > { %v4904_v28 = vadd.f32 %v4903_v44, %v4777_v21  ;;  %v5003_v16 = vadd.f32 %v8722_v4, %v4910_v41 }
 0x478   : > { %v4997_v32 = vadd.f32 %v4996_v58, %v4904_v28 }
 0x48d   : > { %v8792_v24 = vpop.f32.mrf.mxu1 }
 0x48f   : > { %v5270_v25 = vpop.f32.mrf.mxu1 }
 0x495   : > { %v8757_v50 = vpop.f32.mrf.mxu0 }
 0x496   : > { %v5277_v27 = vadd.f32 %v8792_v24, %v8757_v50 }
 0x497   : > { %v5109_v3 = vpop.f32.mrf.mxu0 }
 0x498   : > { %v5271_v29 = vadd.f32 %v5270_v25, %v5109_v3 }
 0x4af   : > { %v8862_v12 = vpop.f32.mrf.mxu1 }
 0x4b1   : > { %v5476_v30 = vpop.f32.mrf.mxu1 }
 0x4b7   : > { %v8827_v33 = vpop.f32.mrf.mxu0 }
 0x4b8   : > { %v5388_v7 = vadd.f32 %v8827_v33, %v5277_v27 }
 0x4b9   : > { %v5380_v63 = vpop.f32.mrf.mxu0 }
 0x4ba   : > { %v5381_v20 = vadd.f32 %v5380_v63, %v5271_v29  ;;  %v5485_v48 = vadd.f32 %v8862_v12, %v5388_v7 }
 0x4bc   : > { %v5477_v55 = vadd.f32 %v5476_v30, %v5381_v20 }
 0x4d1   : > { %v8932_v46 = vpop.f32.mrf.mxu1 }
 0x4d3   : > { %v5696_v13 = vpop.f32.mrf.mxu1 }
 0x4d8   : > { %v8897_v42 = vpop.f32.mrf.mxu0 }
 0x4d9   : > { %v5610_v38 = vadd.f32 %v8897_v42, %v5485_v48 }
 0x4da   : > { %v5603_v34 = vpop.f32.mrf.mxu0 }
 0x4db   : > { %v5703_v56 = vadd.f32 %v8932_v46, %v5610_v38  ;;  %v5604_v53 = vadd.f32 %v5603_v34, %v5477_v55 }
 0x4dd   : > { %v5707_v37 = vmax.f32 %v5003_v16, %v5703_v56  ;;  %v5697_v1 = vadd.f32 %v5696_v13, %v5604_v53 }
 0x4df   : > { %v11779_v36 = vand.u32 4294901760, %v5707_v37  ;;  %v5706_v0 = vmax.f32 %v4997_v32, %v5697_v1 }
 0x4e1   : > { %v5820_v31 = vsub.f32 %v5707_v37, %v11779_v36  ;;  %v11784_v17 = vand.u32 4294901760, %v5706_v0  ;;  %8934 = vmatpush3.msra.mxu0 %v11779_v36 }
 0x4e2   : > { %8935 = vmatprep.subr.mxu0 %v12059_v52 }
 0x4e3   : > { %v5827_v60 = vsub.f32 %v5706_v0, %v11784_v17  ;;  %8936 = vmatpush3.msra.mxu0 %v11784_v17  ;;  %v5821_v26 = vand.u32 4294901760, %v5820_v31 }
 0x4e4   : > { %8947 = vmatprep.subr.mxu0 %v12059_v52  ;;  %8938 = vmatmul.mubr.f32.vlgmr.msra.gmra.mxu0 %v5784_v22 }
 0x4e5   : > { %8948 = vmatpush3.msra.mxu0 %v5820_v31  ;;  %8951 = vmatprep.mubr.msk.f32.mxu0 %vm9037_vm3, %v12059_v52  ;;  %v5822_v40 = vsub.f32 %v5820_v31, %v5821_v26  ;;  %v5828_v6 = vand.u32 4294901760, %v5827_v60 }
 0x4e6   : > { %8949 = vmatprep.subr.mxu0 %v12059_v52 }
 0x4e7   : > { %8950 = vmatpush3.msra.mxu0 %v5827_v60  ;;  %v5823_v10 = vand.u32 4294901760, %v5822_v40  ;;  %v5829_v9 = vsub.f32 %v5827_v60, %v5828_v6 }
 0x4e8   : > { %8961 = vmatprep.subr.mxu0 %v12059_v52  ;;  %8952 = vmatmul.mubr.f32.vlgmr.msra.gmra.mxu0 %v11771_v47 }
 0x4e9   : > { %8941 = vmatpush3.msra.mxu1 %v5823_v10  ;;  %8962 = vmatpush3.msra.mxu0 %v5821_v26  ;;  %v5830_v15 = vand.u32 4294901760, %v5829_v9 }
 0x4ea   : > { %8942 = vmatprep.subr.mxu1 %v12059_v52  ;;  %8963 = vmatprep.subr.mxu0 %v12059_v52 }
 0x4eb   : > { %8943 = vmatpush3.msra.mxu1 %v5830_v15  ;;  %8964 = vmatpush3.msra.mxu0 %v5828_v6 }
 0x4ec   : > { %8945 = vmatmul.mubr.f32.vlgmr.msra.gmra.mxu1 %v11768_v62  ;;  %8954 = vmatprep.subr.mxu1 %v12059_v52 }
 0x4ed   : > { %8965 = vmatprep.mubr.msk.f32.mxu0 %vm9037_vm3, %v12059_v52  ;;  %8975 = vmatprep.subr.mxu0 %v12059_v52 }
 0x4ee   : > { %8955 = vmatpush3.msra.mxu1 %v11779_v36  ;;  %8966 = vmatmul.mubr.f32.vlgmr.msra.gmra.mxu0 %v11768_v62 }
 0x4ef   : > { %8976 = vmatpush3.msra.mxu0 %v11779_v36  ;;  %8956 = vmatprep.subr.mxu1 %v12059_v52 }
 0x4f0   : > { %8977 = vmatprep.subr.mxu0 %v12059_v52  ;;  %8957 = vmatpush3.msra.mxu1 %v11784_v17 }
 0x4f1   : > { %8958 = vmatprep.mubr.msk.f32.mxu1 %vm9037_vm3, %v12059_v52  ;;  %8978 = vmatpush3.msra.mxu0 %v11784_v17 }
 0x4f2   : > { %8959 = vmatmul.mubr.f32.vlgmr.msra.gmra.mxu1 %v5782_v43  ;;  %8968 = vmatprep.subr.mxu1 %v12059_v52 }
 0x4f3   : > { %8979 = vmatprep.mubr.msk.f32.mxu0 %vm9037_vm3, %v12059_v52  ;;  %8989 = vmatprep.subr.mxu0 %v12059_v52 }
 0x4f4   : > { %8969 = vmatpush3.msra.mxu1 %v11779_v36  ;;  %8980 = vmatmul.mubr.f32.vlgmr.msra.gmra.mxu0 %v6247_v59 }
 0x4f5   : > { %8990 = vmatpush3.msra.mxu0 %v5820_v31  ;;  %8970 = vmatprep.subr.mxu1 %v12059_v52 }
 0x4f6   : > { %8991 = vmatprep.subr.mxu0 %v12059_v52  ;;  %8971 = vmatpush3.msra.mxu1 %v11784_v17 }
 0x4f7   : > { %8972 = vmatprep.mubr.msk.f32.mxu1 %vm9037_vm3, %v12059_v52  ;;  %8992 = vmatpush3.msra.mxu0 %v5827_v60 }
 0x4f8   : > { %8973 = vmatmul.mubr.f32.vlgmr.msra.gmra.mxu1 %v11768_v62  ;;  %8982 = vmatprep.subr.mxu1 %v12059_v52 }
 0x4f9   : > { %8993 = vmatprep.mubr.msk.f32.mxu0 %vm9037_vm3, %v12059_v52  ;;  %9003 = vmatprep.subr.mxu0 %v12059_v52 }
 0x4fa   : > { %8983 = vmatpush3.msra.mxu1 %v5823_v10  ;;  %8994 = vmatmul.mubr.f32.vlgmr.msra.gmra.mxu0 %v11792_v18 }
 0x4fb   : > { %9004 = vmatpush3.msra.mxu0 %v5821_v26  ;;  %8984 = vmatprep.subr.mxu1 %v12059_v52 }
 0x4fc   : > { %9005 = vmatprep.subr.mxu0 %v12059_v52  ;;  %8985 = vmatpush3.msra.mxu1 %v5830_v15 }
 0x4fd   : > { %8986 = vmatprep.mubr.msk.f32.mxu1 %vm9037_vm3, %v12059_v52  ;;  %9006 = vmatpush3.msra.mxu0 %v5828_v6 }
 0x4fe   : > { %8987 = vmatmul.mubr.f32.vlgmr.msra.gmra.mxu1 %v11781_v35  ;;  %8996 = vmatprep.subr.mxu1 %v12059_v52 }
 0x4ff   : > { %8997 = vmatpush3.msra.mxu1 %v11779_v36  ;;  %9000 = vmatprep.mubr.msk.f32.mxu1 %vm9037_vm3, %v12059_v52 }
 0x500   : > { %8998 = vmatprep.subr.mxu1 %v12059_v52  ;;  %9007 = vmatprep.mubr.msk.f32.mxu0 %vm9037_vm3, %v12059_v52 }
 0x501   : > { %8999 = vmatpush3.msra.mxu1 %v11784_v17  ;;  %9008 = vmatmul.mubr.f32.vlgmr.msra.gmra.mxu0 %v11781_v35 }
 0x502   : > { %9001 = vmatmul.mubr.f32.vlgmr.msra.gmra.mxu1 %v6245_v49  ;;  %9010 = vmatprep.subr.mxu1 %v12059_v52 }
 0x503   : > { %9011 = vmatpush3.msra.mxu1 %v11779_v36  ;;  %9014 = vmatprep.mubr.msk.f32.mxu1 %vm9037_vm3, %v12059_v52 }
 0x504   : > { %9012 = vmatprep.subr.mxu1 %v12059_v52 }
 0x505   : > { %9013 = vmatpush3.msra.mxu1 %v11784_v17 }
 0x506   : > { %9015 = vmatmul.mubr.f32.vlgmr.msra.gmra.mxu1 %v11781_v35 }
 0x5a4   : > { %v5786_v39 = vpop.f32.mrf.mxu0 }
 0x5a6   : > { %v8939_v54 = vpop.f32.mrf.mxu0 }
 0x5a8   : > { %v5943_v4 = vpop.f32.mrf.mxu0 }
 0x5aa   : > { %v8953_v44 = vpop.f32.mrf.mxu0 }
 0x5ac   : > { %v5867_v50 = vpop.f32.mrf.mxu1 }
 0x5ad   : > { %v5868_v25 = vadd.f32 %v5867_v50, %v5786_v39 }
 0x5ae   : > { %v8946_v58 = vpop.f32.mrf.mxu1  ;;  %v6095_v45 = vpop.f32.mrf.mxu0 }
 0x5af   : > { %v5944_v8 = vadd.f32 %v5943_v4, %v5868_v25 }
 0x5b0   : > { %v8967_v24 = vpop.f32.mrf.mxu0 }
 0x5b2   : > { %v6018_v3 = vpop.f32.mrf.mxu1 }
 0x5b3   : > { %v6019_v63 = vadd.f32 %v6018_v3, %v5944_v8 }
 0x5b4   : > { %v8960_v23 = vpop.f32.mrf.mxu1  ;;  %v6249_v33 = vpop.f32.mrf.mxu0 }
 0x5b5   : > { %v6096_v20 = vadd.f32 %v6095_v45, %v6019_v63 }
 0x5b6   : > { %v8981_v61 = vpop.f32.mrf.mxu0 }
 0x5b8   : > { %v6168_v62 = vpop.f32.mrf.mxu1 }
 0x5b9   : > { %v6169_v42 = vadd.f32 %v6168_v62, %v6096_v20 }
 0x5ba   : > { %v8974_v5 = vpop.f32.mrf.mxu1  ;;  %v6406_v52 = vpop.f32.mrf.mxu0 }
 0x5bc   : > { %v8995_v27 = vpop.f32.mrf.mxu0 }
 0x5be   : > { %v6330_v12 = vpop.f32.mrf.mxu1 }
 0x5bf   : > { %v6331_v11 = vadd.f32 %v6330_v12, %v6249_v33 }
 0x5c0   : > { %v8988_v29 = vpop.f32.mrf.mxu1 }
 0x5c1   : > { %v6407_v7 = vadd.f32 %v6406_v52, %v6331_v11  ;;  %v6558_v47 = vpop.f32.mrf.mxu0 }
 0x5c2   : > { %v6481_v51 = vpop.f32.mrf.mxu1 }
 0x5c3   : > { %v6482_v30 = vadd.f32 %v6481_v51, %v6407_v7  ;;  %v9009_v41 = vpop.f32.mrf.mxu0 }
 0x5c4   : > { %v9002_v21 = vpop.f32.mrf.mxu1 }
 0x5c5   : > { %v6559_v48 = vadd.f32 %v6558_v47, %v6482_v30 }
 0x5c6   : > { %v6631_v46 = vpop.f32.mrf.mxu1 }
 0x5c7   : > { %v6632_v43 = vadd.f32 %v6631_v46, %v6559_v48 }
 0x5c8   : > { %v9016_v28 = vpop.f32.mrf.mxu1 }
 0x5c9   : > { %v6635_v38 = vmax.f32 %v6169_v42, %v6632_v43 }
 0x5cb   : > { %6636 = vst.msk [vmem:[%s370_s26] sm:$0xff] %vm400_vm1, %v6635_v38 }
 0x5cc PF: > { %s21_s13 = sadd.s32 1, %s9034_s13  }
 0x5cd   : > { %p18_p4 = scmp.ge.s32.totalorder %s21_s13, 4  }
 0x5cf   :  { %20 = sbr.rel (!%p18_p4) target bundleno = 1 (0x1), region = 102 }

</bundles_post_ra>
